<compile_context>
chip_gen: v5e
topology: v5e:2x2
jax: 0.10.0
libtpu: 0.0.40
codegen_flags: <defaults>
</compile_context>

<pallas_src>
import functools
import math

import jax
import jax.numpy as jnp
from jax.experimental import pallas as pl
from jax.experimental.pallas import tpu as pltpu

_VMEM_LIMIT = 48 * 1024 * 1024        # safe on v5e (128M), v6e (128M), v7x (64M)
_NEG = -1e9


def _round_up(x, m):
    return ((x + m - 1) // m) * m


def _pick_tile(dim, desired, align):
    """Largest tile <= desired that divides round_up(dim, align) (avoids padding)."""
    dp = _round_up(dim, align)
    if dp <= desired:
        return dp
    for t in (desired, desired // 2, desired // 4, align):
        if t >= align and dp % t == 0:
            return t
    return align


# ----------------------------- linear kernel -------------------------------

def _matmul_kernel(x_ref, w_ref, b_ref, o_ref, acc_ref, *, relu):
    """Tiled y = x @ w + b (optional ReLU). Grid = (M-tiles, N-tiles, K-tiles)."""
    k = pl.program_id(2)

    @pl.when(k == 0)
    def _():
        acc_ref[...] = jnp.zeros_like(acc_ref)

    acc_ref[...] += jnp.dot(x_ref[...], w_ref[...],
                            preferred_element_type=jnp.float32)

    @pl.when(k == pl.num_programs(2) - 1)
    def _():
        y = acc_ref[...] + b_ref[...]
        if relu:
            y = jnp.maximum(y, 0.0)
        o_ref[...] = y.astype(o_ref.dtype)


def linear(x, w, b, relu=False, out_dtype=jnp.bfloat16, *, tm=512, tn=512, tk=512):
    """y = x @ w + b (optionally ReLU); bf16 MXU inputs, f32 accumulation."""
    lead = x.shape[:-1]
    K = x.shape[-1]
    N = w.shape[-1]
    x2 = x.reshape(-1, K).astype(jnp.bfloat16)
    wb = w.astype(jnp.bfloat16)          # no-op when weights pre-cast in prepare_params
    M = x2.shape[0]

    tm = min(tm, _round_up(M, 8))
    tn = _pick_tile(N, tn, 128)
    tk = _pick_tile(K, tk, 128)
    Mp, Kp, Np = _round_up(M, tm), _round_up(K, tk), _round_up(N, tn)

    # TODO(synk): for non-dividing M a masked epilogue would avoid this activation pad.
    if (Mp, Kp) != (M, K):
        x2 = jnp.pad(x2, ((0, Mp - M), (0, Kp - K)))
    if (Kp, Np) != (K, N):
        wb = jnp.pad(wb, ((0, Kp - K), (0, Np - N)))
    bb = b.astype(jnp.float32)
    if Np != N:
        bb = jnp.pad(bb, ((0, Np - N),))
    bb = bb.reshape(1, Np)

    out = pl.pallas_call(
        functools.partial(_matmul_kernel, relu=relu),
        grid=(Mp // tm, Np // tn, Kp // tk),
        out_shape=jax.ShapeDtypeStruct((Mp, Np), out_dtype),
        in_specs=[
            pl.BlockSpec((tm, tk), lambda i, j, k: (i, k)),
            pl.BlockSpec((tk, tn), lambda i, j, k: (k, j)),
            pl.BlockSpec((1, tn), lambda i, j, k: (0, j)),
        ],
        out_specs=pl.BlockSpec((tm, tn), lambda i, j, k: (i, j)),
        scratch_shapes=[pltpu.VMEM((tm, tn), jnp.float32)],
        compiler_params=pltpu.CompilerParams(
            dimension_semantics=("parallel", "parallel", "arbitrary"),
            vmem_limit_bytes=_VMEM_LIMIT),
    )(x2, wb, bb)
    if (Mp, Np) != (M, N):
        out = out[:M, :N]
    return out.reshape(*lead, N)


# -------------------- fused residual-add + LayerNorm ------------------------

def _add_ln_kernel(x_ref, h_ref, g_ref, b_ref, o_ref, *, eps):
    """LayerNorm(x + h): bf16 in, f32 math on the VPU, bf16 out."""
    x = x_ref[...].astype(jnp.float32) + h_ref[...].astype(jnp.float32)
    mu = jnp.mean(x, axis=-1, keepdims=True)
    xc = x - mu
    var = jnp.mean(xc * xc, axis=-1, keepdims=True)
    y = xc * jax.lax.rsqrt(var + eps) * g_ref[...] + b_ref[...]
    o_ref[...] = y.astype(o_ref.dtype)


def add_layernorm(x, h, g, b, eps=1e-5):
    lead = x.shape[:-1]
    D = x.shape[-1]
    x2 = x.reshape(-1, D)
    h2 = h.reshape(-1, D)
    M = x2.shape[0]
    tm = min(512, _round_up(M, 8))
    Mp = _round_up(M, tm)
    if Mp != M:
        x2 = jnp.pad(x2, ((0, Mp - M), (0, 0)))
        h2 = jnp.pad(h2, ((0, Mp - M), (0, 0)))
    out = pl.pallas_call(
        functools.partial(_add_ln_kernel, eps=eps),
        grid=(Mp // tm,),
        out_shape=jax.ShapeDtypeStruct((Mp, D), jnp.bfloat16),
        in_specs=[
            pl.BlockSpec((tm, D), lambda i: (i, 0)),
            pl.BlockSpec((tm, D), lambda i: (i, 0)),
            pl.BlockSpec((1, D), lambda i: (0, 0)),
            pl.BlockSpec((1, D), lambda i: (0, 0)),
        ],
        out_specs=pl.BlockSpec((tm, D), lambda i: (i, 0)),
        compiler_params=pltpu.CompilerParams(dimension_semantics=("parallel",)),
    )(x2, h2, g.reshape(1, D).astype(jnp.float32),
      b.reshape(1, D).astype(jnp.float32))
    if Mp != M:
        out = out[:M]
    return out.reshape(*lead, D)


# ------------------- flash-style multi-head attention -----------------------

def _flash_attn_kernel(q_ref, k_ref, v_ref, qb_ref, kb_ref, o_ref,
                       m_sc, l_sc, acc_sc, *,
                       n_head, scale, causal, use_qb, use_kb, tq, tk):
    """Online-softmax attention. Grid = (B, Sq-tiles, KV-tiles); all heads are
    computed inside the kernel and streamed into the (tq, D) acc scratch so the
    final output store is a single lane-dense slab."""
    j = pl.program_id(2)

    @pl.when(j == 0)
    def _():
        m_sc[...] = jnp.full(m_sc.shape, -jnp.inf, m_sc.dtype)
        l_sc[...] = jnp.zeros(l_sc.shape, l_sc.dtype)
        acc_sc[...] = jnp.zeros(acc_sc.shape, acc_sc.dtype)

    q = q_ref[0]                       # (tq, D) bf16
    k = k_ref[0]                       # (tk, D) bf16
    v = v_ref[0]                       # (tk, D) bf16
    D = q.shape[-1]
    dh = D // n_head

    # Additive bias built in-kernel from compact per-row / per-col masks + iota.
    bias = None
    if use_qb:
        bias = qb_ref[0]               # (tq, 1) f32, 0 / -1e9
    if use_kb:
        kb = kb_ref[0]                 # (1, tk) f32, 0 / -1e9
        bias = kb if bias is None else bias + kb
    if causal:
        i = pl.program_id(1)
        rows = jax.lax.broadcasted_iota(jnp.int32, (tq, tk), 0) + i * tq
        cols = jax.lax.broadcasted_iota(jnp.int32, (tq, tk), 1) + j * tk
        cb = jnp.where(cols <= rows, 0.0, _NEG).astype(jnp.float32)
        bias = cb if bias is None else bias + cb

    # TODO(synk): for dh >= 128 move heads to a grid axis to avoid lane-unaligned
    # per-head slices on v6e/v7x; dh < 128 keeps the in-kernel split (accepted).
    for h in range(n_head):
        sl = slice(h * dh, (h + 1) * dh)
        s = jax.lax.dot_general(q[:, sl], k[:, sl],
                                (((1,), (1,)), ((), ())),
                                preferred_element_type=jnp.float32) * scale
        if bias is not None:
            s = s + bias
        m_prev = m_sc[h]                                        # (tq, 1)
        m_new = jnp.maximum(m_prev, jnp.max(s, axis=-1, keepdims=True))
        alpha = jnp.exp(m_prev - m_new)
        p = jnp.exp(s - m_new)
        l_sc[h] = alpha * l_sc[h] + jnp.sum(p, axis=-1, keepdims=True)
        acc_sc[:, sl] = alpha * acc_sc[:, sl] + jnp.dot(
            p.astype(v.dtype), v[:, sl], preferred_element_type=jnp.float32)
        m_sc[h] = m_new

    @pl.when(j == pl.num_programs(2) - 1)
    def _():
        for h in range(n_head):
            sl = slice(h * dh, (h + 1) * dh)
            acc_sc[:, sl] = acc_sc[:, sl] * pl.reciprocal(l_sc[h], approx=True)
        o_ref[0] = acc_sc[...].astype(o_ref.dtype)


def scaled_dot_attention(q, k, v, n_head, *, q_bias=None, k_bias=None,
                         causal=False, tq=256, tk=512):
    """q: (B,Sq,D); k/v: (B,Sk,D) bf16. q_bias: (B,Sq,1), k_bias: (B,1,Sk) f32
    additive pad biases (0 valid / -1e9 masked); causal builds tril in-kernel."""
    B, Sq, D = q.shape
    Sk = k.shape[1]
    dh = D // n_head
    scale = 1.0 / math.sqrt(dh)

    tq = min(tq, _round_up(Sq, 8))
    tk = min(tk, _round_up(Sk, 8))
    Sqp = _round_up(Sq, tq)
    Skp = _round_up(Sk, tk)

    use_qb = q_bias is not None
    use_kb = (k_bias is not None) or (Skp != Sk)

    if Skp != Sk:
        k = jnp.pad(k, ((0, 0), (0, Skp - Sk), (0, 0)))
        v = jnp.pad(v, ((0, 0), (0, Skp - Sk), (0, 0)))
        if k_bias is None:
            k_bias = jnp.zeros((B, 1, Sk), jnp.float32)
        k_bias = jnp.pad(k_bias, ((0, 0), (0, 0), (0, Skp - Sk)),
                         constant_values=_NEG)
    if Sqp != Sq:
        q = jnp.pad(q, ((0, 0), (0, Sqp - Sq), (0, 0)))
        if q_bias is not None:
            q_bias = jnp.pad(q_bias, ((0, 0), (0, Sqp - Sq), (0, 0)))
    if q_bias is None:
        q_bias = jnp.zeros((B, Sqp, 1), jnp.float32)
    if k_bias is None:
        k_bias = jnp.zeros((B, 1, Skp), jnp.float32)

    out = pl.pallas_call(
        functools.partial(_flash_attn_kernel, n_head=n_head, scale=scale,
                          causal=causal, use_qb=use_qb, use_kb=use_kb,
                          tq=tq, tk=tk),
        grid=(B, Sqp // tq, Skp // tk),
        out_shape=jax.ShapeDtypeStruct((B, Sqp, D), jnp.bfloat16),
        in_specs=[
            pl.BlockSpec((1, tq, D), lambda b, i, j: (b, i, 0)),
            pl.BlockSpec((1, tk, D), lambda b, i, j: (b, j, 0)),
            pl.BlockSpec((1, tk, D), lambda b, i, j: (b, j, 0)),
            pl.BlockSpec((1, tq, 1), lambda b, i, j: (b, i, 0)),
            pl.BlockSpec((1, 1, tk), lambda b, i, j: (b, 0, j)),
        ],
        out_specs=pl.BlockSpec((1, tq, D), lambda b, i, j: (b, i, 0)),
        scratch_shapes=[
            pltpu.VMEM((n_head, tq, 1), jnp.float32),   # m (running max)
            pltpu.VMEM((n_head, tq, 1), jnp.float32),   # l (running sum)
            pltpu.VMEM((tq, D), jnp.float32),           # acc (all heads, lane-dense)
        ],
        compiler_params=pltpu.CompilerParams(
            dimension_semantics=("parallel", "parallel", "arbitrary"),
            vmem_limit_bytes=_VMEM_LIMIT),
    )(q.astype(jnp.bfloat16), k.astype(jnp.bfloat16), v.astype(jnp.bfloat16),
      q_bias.astype(jnp.float32), k_bias.astype(jnp.float32))
    if Sqp != Sq:
        out = out[:, :Sq]
    return out


# ----------------------------- model (glue JAX) -----------------------------

def multi_head_attention(p, q_in, kv_in, n_head, *, q_bias=None, k_bias=None,
                         causal=False):
    D = q_in.shape[-1]
    if "qkv" in p:                       # self-attention: fused QKV projection
        qkv = linear(q_in, p["qkv"]["w"], p["qkv"]["b"])
        q, k, v = qkv[..., :D], qkv[..., D:2 * D], qkv[..., 2 * D:]
    else:                                # cross-attention: Q + fused KV
        q = linear(q_in, p["q"]["w"], p["q"]["b"])
        kv = linear(kv_in, p["kv"]["w"], p["kv"]["b"])
        k, v = kv[..., :D], kv[..., D:]
    out = scaled_dot_attention(q, k, v, n_head, q_bias=q_bias, k_bias=k_bias,
                               causal=causal)
    return linear(out, p["o"]["w"], p["o"]["b"])


def encoder_forward(p, src_ids, n_head):
    # NOTE: the reference Transformer.forward calls encoder(src) with no mask,
    # so encoder self-attention is unmasked here (faithful to the spec).
    x = p["emb"][src_ids]                                   # (B, S, bert_d)
    x = linear(x, p["proj"]["w"], p["proj"]["b"])           # -> (B, S, d_model)
    for lp in p["layers"]:
        h = multi_head_attention(lp["attn"], x, x, n_head)
        x = add_layernorm(x, h, lp["ln1_g"], lp["ln1_b"])
        h = linear(x, lp["ffn1"]["w"], lp["ffn1"]["b"], relu=True)
        h = linear(h, lp["ffn2"]["w"], lp["ffn2"]["b"])
        x = add_layernorm(x, h, lp["ln2_g"], lp["ln2_b"])
    return x


def decoder_forward(p, trg_ids, enc_src, src_valid, n_head):
    B, S = trg_ids.shape
    x = p["emb"][trg_ids] + p["pe"][:S][None]               # (B, S, d_model)
    # Compact masks (built once, reused across layers); causal term is in-kernel.
    trg_valid = (trg_ids != 0)            # pad idx 0, faithful to the reference
    q_bias = jnp.where(trg_valid, 0.0, _NEG).astype(jnp.float32)[:, :, None]
    k_bias = jnp.where(src_valid, 0.0, _NEG).astype(jnp.float32)[:, None, :]
    for lp in p["layers"]:
        h = multi_head_attention(lp["self_attn"], x, x, n_head,
                                 q_bias=q_bias, causal=True)
        x = add_layernorm(x, h, lp["ln1_g"], lp["ln1_b"])
        h = multi_head_attention(lp["cross_attn"], x, enc_src, n_head,
                                 k_bias=k_bias)
        x = add_layernorm(x, h, lp["ln2_g"], lp["ln2_b"])
        h = linear(x, lp["ffn1"]["w"], lp["ffn1"]["b"], relu=True)
        h = linear(h, lp["ffn2"]["w"], lp["ffn2"]["b"])
        x = add_layernorm(x, h, lp["ln3_g"], lp["ln3_b"])
    return linear(x, p["out"]["w"], p["out"]["b"], out_dtype=jnp.float32)


def transformer_forward(params, src, trg, *, src_pad_idx, n_head):
    enc_src = encoder_forward(params["encoder"], src, n_head)
    src_valid = (src != src_pad_idx)                        # (B, S_src) bool
    return decoder_forward(params["decoder"], trg, enc_src, src_valid, n_head)


# ------------------------------- parameters --------------------------------

def sinusoid_encoding(max_len, d_model):
    pos = jnp.arange(max_len, dtype=jnp.float32)[:, None]
    i = jnp.arange(0, d_model, 2, dtype=jnp.float32)
    div = jnp.power(10000.0, i / d_model)
    pe = jnp.zeros((max_len, d_model), jnp.float32)
    pe = pe.at[:, 0::2].set(jnp.sin(pos / div))
    pe = pe.at[:, 1::2].set(jnp.cos(pos / div))
    return pe


def init_params(key, *, d_model, n_head, ffn_hidden, n_layers,
                enc_voc_size, dec_voc_size, bert_d, max_len):
    keys = iter(jax.random.split(key, 512))

    def lin(din, dout):
        k1, k2 = next(keys), next(keys)
        bound = 1.0 / math.sqrt(din)
        return {"w": jax.random.uniform(k1, (din, dout), jnp.float32, -bound, bound),
                "b": jax.random.uniform(k2, (dout,), jnp.float32, -bound, bound)}

    def attn():
        return {"q": lin(d_model, d_model), "k": lin(d_model, d_model),
                "v": lin(d_model, d_model), "o": lin(d_model, d_model)}

    def enc_layer():
        return {"attn": attn(),
                "ln1_g": jnp.ones((d_model,), jnp.float32),
                "ln1_b": jnp.zeros((d_model,), jnp.float32),
                "ffn1": lin(d_model, ffn_hidden), "ffn2": lin(ffn_hidden, d_model),
                "ln2_g": jnp.ones((d_model,), jnp.float32),
                "ln2_b": jnp.zeros((d_model,), jnp.float32)}

    def dec_layer():
        return {"self_attn": attn(), "cross_attn": attn(),
                "ln1_g": jnp.ones((d_model,), jnp.float32),
                "ln1_b": jnp.zeros((d_model,), jnp.float32),
                "ln2_g": jnp.ones((d_model,), jnp.float32),
                "ln2_b": jnp.zeros((d_model,), jnp.float32),
                "ffn1": lin(d_model, ffn_hidden), "ffn2": lin(ffn_hidden, d_model),
                "ln3_g": jnp.ones((d_model,), jnp.float32),
                "ln3_b": jnp.zeros((d_model,), jnp.float32)}

    # TODO(synk): Encoder/Decoder source not provided; encoder "bert" embedding is
    # a frozen (enc_voc, bert_d) table projected to d_model (stand-in for BERT).
    encoder = {"emb": 0.02 * jax.random.normal(next(keys), (enc_voc_size, bert_d), jnp.float32),
               "proj": lin(bert_d, d_model),
               "layers": [enc_layer() for _ in range(n_layers)]}
    decoder = {"emb": 0.02 * jax.random.normal(next(keys), (dec_voc_size, d_model), jnp.float32),
               "pe": sinusoid_encoding(max_len, d_model),
               "layers": [dec_layer() for _ in range(n_layers)],
               "out": lin(d_model, dec_voc_size)}
    return {"encoder": encoder, "decoder": decoder}


def prepare_params(raw):
    """One-time (outside jit) weight prep: fuse QKV / KV, cast weights to bf16."""
    def cast_lin(l):
        return {"w": l["w"].astype(jnp.bfloat16), "b": l["b"].astype(jnp.float32)}

    def fuse_self(a):
        return {"qkv": {"w": jnp.concatenate([a["q"]["w"], a["k"]["w"], a["v"]["w"]],
                                             axis=1).astype(jnp.bfloat16),
                        "b": jnp.concatenate([a["q"]["b"], a["k"]["b"], a["v"]["b"]]
                                             ).astype(jnp.float32)},
                "o": cast_lin(a["o"])}

    def fuse_cross(a):
        return {"q": cast_lin(a["q"]),
                "kv": {"w": jnp.concatenate([a["k"]["w"], a["v"]["w"]],
                                            axis=1).astype(jnp.bfloat16),
                       "b": jnp.concatenate([a["k"]["b"], a["v"]["b"]]
                                            ).astype(jnp.float32)},
                "o": cast_lin(a["o"])}

    enc = raw["encoder"]
    enc_p = {"emb": enc["emb"], "proj": cast_lin(enc["proj"]),
             "layers": [{"attn": fuse_self(l["attn"]),
                         "ln1_g": l["ln1_g"], "ln1_b": l["ln1_b"],
                         "ffn1": cast_lin(l["ffn1"]), "ffn2": cast_lin(l["ffn2"]),
                         "ln2_g": l["ln2_g"], "ln2_b": l["ln2_b"]}
                        for l in enc["layers"]]}
    dec = raw["decoder"]
    dec_p = {"emb": dec["emb"], "pe": dec["pe"],
             "layers": [{"self_attn": fuse_self(l["self_attn"]),
                         "cross_attn": fuse_cross(l["cross_attn"]),
                         "ln1_g": l["ln1_g"], "ln1_b": l["ln1_b"],
                         "ln2_g": l["ln2_g"], "ln2_b": l["ln2_b"],
                         "ffn1": cast_lin(l["ffn1"]), "ffn2": cast_lin(l["ffn2"]),
                         "ln3_g": l["ln3_g"], "ln3_b": l["ln3_b"]}
                        for l in dec["layers"]],
             "out": cast_lin(dec["out"])}
    return {"encoder": enc_p, "decoder": dec_p}


# ---------------------------------- main ------------------------------------

if __name__ == "__main__":
    B, S_src, S_trg = 2, 8, 8
    d_model, n_head, ffn_hidden, n_layers = 32, 4, 64, 2
    bert_d, enc_voc_size, dec_voc_size, max_len = 16, 32, 32, 16
    src_pad_idx, trg_pad_idx, trg_sos_idx = 0, 0, 1

    key = jax.random.PRNGKey(0)
    k_param, k_src, k_trg = jax.random.split(key, 3)

    raw_params = init_params(k_param, d_model=d_model, n_head=n_head,
                             ffn_hidden=ffn_hidden, n_layers=n_layers,
                             enc_voc_size=enc_voc_size, dec_voc_size=dec_voc_size,
                             bert_d=bert_d, max_len=max_len)
    params = prepare_params(raw_params)          # fuse + bf16-cast once, outside jit

    src = jax.random.randint(k_src, (B, S_src), 1, enc_voc_size, dtype=jnp.int32)
    trg = jax.random.randint(k_trg, (B, S_trg), 1, dec_voc_size, dtype=jnp.int32)

    fwd = jax.jit(functools.partial(transformer_forward,
                                    src_pad_idx=src_pad_idx, n_head=n_head))
    out = fwd(params, src, trg)
    out = jax.block_until_ready(out)

    assert out.shape == (B, S_trg, dec_voc_size), out.shape
    assert out.dtype == jnp.float32
    assert bool(jnp.all(jnp.isfinite(out)))
    print("KERNEL_OK")
</pallas_src>

<mosaic_0001>
module attributes {stable_mosaic.version = 11 : i64} {
  func.func @_matmul_kernel(%arg0: i32, %arg1: i32, %arg2: i32, %arg3: memref<16x128xbf16, #tpu.memory_space<vmem>>, %arg4: memref<128x128xbf16, #tpu.memory_space<vmem>>, %arg5: memref<1x128xf32, #tpu.memory_space<vmem>>, %arg6: memref<16x128xbf16, #tpu.memory_space<vmem>>, %arg7: memref<16x128xf32, #tpu.memory_space<vmem>>) attributes {dimension_semantics = [#tpu.dimension_semantics<parallel>, #tpu.dimension_semantics<parallel>, #tpu.dimension_semantics<arbitrary>], iteration_bounds = array<i64: 1, 1, 1>, scalar_prefetch = 0 : i64, scratch_operands = 1 : i64, tpu.core_type = #tpu.core_type<tc>, window_params = [{transform_indices = @transform_0, window_bounds = array<i64: 16, 128>}, {transform_indices = @transform_1, window_bounds = array<i64: 128, 128>}, {transform_indices = @transform_2, window_bounds = array<i64: 1, 128>}, {transform_indices = @transform_3, window_bounds = array<i64: 16, 128>}]} {
    %c0_i32 = arith.constant 0 : i32
    %0 = arith.cmpi eq, %arg2, %c0_i32 : i32
    %1 = arith.extui %0 : i1 to i32
    %c0_i32_0 = arith.constant 0 : i32
    %2 = arith.cmpi ne, %1, %c0_i32_0 : i32
    scf.if %2 {
      %cst_10 = arith.constant 0.000000e+00 : f32
      %12 = vector.broadcast %cst_10 : f32 to vector<16x128xf32>
      %c0_11 = arith.constant 0 : index
      %c0_12 = arith.constant 0 : index
      %13 = vector.load %arg7[%c0_11, %c0_12] : memref<16x128xf32, #tpu.memory_space<vmem>>, vector<16x128xf32>
      tpu.vector_store %arg7[%c0_11, %c0_12], %12 {strides = array<i32>} : memref<16x128xf32, #tpu.memory_space<vmem>>, vector<16x128xf32>,
    } else {
    }
    %c0 = arith.constant 0 : index
    %c0_1 = arith.constant 0 : index
    %3 = vector.load %arg7[%c0, %c0_1] : memref<16x128xf32, #tpu.memory_space<vmem>>, vector<16x128xf32>
    %c0_2 = arith.constant 0 : index
    %c0_3 = arith.constant 0 : index
    %4 = vector.load %arg3[%c0_2, %c0_3] : memref<16x128xbf16, #tpu.memory_space<vmem>>, vector<16x128xbf16>
    %c0_4 = arith.constant 0 : index
    %c0_5 = arith.constant 0 : index
    %5 = vector.load %arg4[%c0_4, %c0_5] : memref<128x128xbf16, #tpu.memory_space<vmem>>, vector<128x128xbf16>
    %cst = arith.constant dense<0.000000e+00> : vector<16x128xf32>
    %6 = tpu.matmul %4, %5, %cst {dimension_numbers = #tpu.dot_dimension_numbers<[1], [0], [0], [1], [0, 0, 1, 1], [], []>} : vector<16x128xbf16>, vector<128x128xbf16>, vector<16x128xf32> -> vector<16x128xf32>
    %7 = arith.addf %3, %6 : vector<16x128xf32>
    %c0_6 = arith.constant 0 : index
    %c0_7 = arith.constant 0 : index
    %8 = vector.load %arg7[%c0_6, %c0_7] : memref<16x128xf32, #tpu.memory_space<vmem>>, vector<16x128xf32>
    tpu.vector_store %arg7[%c0_6, %c0_7], %7 {strides = array<i32>} : memref<16x128xf32, #tpu.memory_space<vmem>>, vector<16x128xf32>,
    %c0_i32_8 = arith.constant 0 : i32
    %9 = arith.cmpi eq, %arg2, %c0_i32_8 : i32
    %10 = arith.extui %9 : i1 to i32
    %c0_i32_9 = arith.constant 0 : i32
    %11 = arith.cmpi ne, %10, %c0_i32_9 : i32
    scf.if %11 {
      %c0_10 = arith.constant 0 : index
      %c0_11 = arith.constant 0 : index
      %12 = vector.load %arg7[%c0_10, %c0_11] : memref<16x128xf32, #tpu.memory_space<vmem>>, vector<16x128xf32>
      %c0_12 = arith.constant 0 : index
      %c0_13 = arith.constant 0 : index
      %13 = vector.load %arg5[%c0_12, %c0_13] : memref<1x128xf32, #tpu.memory_space<vmem>>, vector<1x128xf32>
      %14 = vector.broadcast %13 : vector<1x128xf32> to vector<16x128xf32>
      %15 = arith.addf %12, %14 : vector<16x128xf32>
      %16 = arith.truncf %15 : vector<16x128xf32> to vector<16x128xbf16>
      %c0_14 = arith.constant 0 : index
      %c0_15 = arith.constant 0 : index
      %17 = vector.load %arg6[%c0_14, %c0_15] : memref<16x128xbf16, #tpu.memory_space<vmem>>, vector<16x128xbf16>
      tpu.vector_store %arg6[%c0_14, %c0_15], %16 {strides = array<i32>} : memref<16x128xbf16, #tpu.memory_space<vmem>>, vector<16x128xbf16>,
    } else {
    }
    return
  }
  func.func @transform_0(%arg0: i32, %arg1: i32, %arg2: i32) -> (i32, i32) {
    %c0_i32 = arith.constant 0 : i32
    return %arg0, %arg2 : i32, i32
  }
  func.func @transform_1(%arg0: i32, %arg1: i32, %arg2: i32) -> (i32, i32) {
    %c0_i32 = arith.constant 0 : i32
    return %arg2, %arg1 : i32, i32
  }
  func.func @transform_2(%arg0: i32, %arg1: i32, %arg2: i32) -> (i32, i32) {
    %c0_i32 = arith.constant 0 : i32
    %c0_i32_0 = arith.constant 0 : i32
    return %c0_i32, %arg1 : i32, i32
  }
  func.func @transform_3(%arg0: i32, %arg1: i32, %arg2: i32) -> (i32, i32) {
    %c0_i32 = arith.constant 0 : i32
    return %arg0, %arg1 : i32, i32
  }
}

module attributes {stable_mosaic.version = 11 : i64} {
  func.func @_add_ln_kernel(%arg0: i32, %arg1: memref<16x32xbf16, #tpu.memory_space<vmem>>, %arg2: memref<16x32xbf16, #tpu.memory_space<vmem>>, %arg3: memref<1x32xf32, #tpu.memory_space<vmem>>, %arg4: memref<1x32xf32, #tpu.memory_space<vmem>>, %arg5: memref<16x32xbf16, #tpu.memory_space<vmem>>) attributes {dimension_semantics = [#tpu.dimension_semantics<parallel>], iteration_bounds = array<i64: 1>, scalar_prefetch = 0 : i64, scratch_operands = 0 : i64, tpu.core_type = #tpu.core_type<tc>, window_params = [{transform_indices = @transform_0, window_bounds = array<i64: 16, 32>}, {transform_indices = @transform_1, window_bounds = array<i64: 16, 32>}, {pipeline_mode = #tpu.pipeline_mode<synchronous>, transform_indices = @transform_2, window_bounds = array<i64: 1, 32>}, {pipeline_mode = #tpu.pipeline_mode<synchronous>, transform_indices = @transform_3, window_bounds = array<i64: 1, 32>}, {transform_indices = @transform_4, window_bounds = array<i64: 16, 32>}]} {
    %c0 = arith.constant 0 : index
    %c0_0 = arith.constant 0 : index
    %0 = vector.load %arg1[%c0, %c0_0] : memref<16x32xbf16, #tpu.memory_space<vmem>>, vector<16x32xbf16>
    %1 = arith.extf %0 : vector<16x32xbf16> to vector<16x32xf32>
    %c0_1 = arith.constant 0 : index
    %c0_2 = arith.constant 0 : index
    %2 = vector.load %arg2[%c0_1, %c0_2] : memref<16x32xbf16, #tpu.memory_space<vmem>>, vector<16x32xbf16>
    %3 = arith.extf %2 : vector<16x32xbf16> to vector<16x32xf32>
    %4 = arith.addf %1, %3 : vector<16x32xf32>
    %cst = arith.constant dense<0.000000e+00> : vector<16xf32>
    %5 = vector.multi_reduction <add>, %4, %cst [1] : vector<16x32xf32> to vector<16xf32>
    %6 = vector.shape_cast %5 : vector<16xf32> to vector<16x1xf32>
    %cst_3 = arith.constant 3.200000e+01 : f32
    %7 = vector.broadcast %cst_3 : f32 to vector<16x1xf32>
    %8 = arith.divf %6, %7 : vector<16x1xf32>
    %9 = vector.broadcast %8 : vector<16x1xf32> to vector<16x32xf32>
    %10 = arith.subf %4, %9 : vector<16x32xf32>
    %11 = arith.mulf %10, %10 : vector<16x32xf32>
    %cst_4 = arith.constant dense<0.000000e+00> : vector<16xf32>
    %12 = vector.multi_reduction <add>, %11, %cst_4 [1] : vector<16x32xf32> to vector<16xf32>
    %13 = vector.shape_cast %12 : vector<16xf32> to vector<16x1xf32>
    %cst_5 = arith.constant 3.200000e+01 : f32
    %14 = vector.broadcast %cst_5 : f32 to vector<16x1xf32>
    %15 = arith.divf %13, %14 : vector<16x1xf32>
    %cst_6 = arith.constant 9.99999974E-6 : f32
    %16 = vector.broadcast %cst_6 : f32 to vector<16x1xf32>
    %17 = arith.addf %15, %16 : vector<16x1xf32>
    %18 = math.rsqrt %17 : vector<16x1xf32>
    %19 = vector.broadcast %18 : vector<16x1xf32> to vector<16x32xf32>
    %20 = arith.mulf %10, %19 : vector<16x32xf32>
    %c0_7 = arith.constant 0 : index
    %c0_8 = arith.constant 0 : index
    %21 = vector.load %arg3[%c0_7, %c0_8] : memref<1x32xf32, #tpu.memory_space<vmem>>, vector<1x32xf32>
    %22 = vector.broadcast %21 : vector<1x32xf32> to vector<16x32xf32>
    %23 = arith.mulf %20, %22 : vector<16x32xf32>
    %c0_9 = arith.constant 0 : index
    %c0_10 = arith.constant 0 : index
    %24 = vector.load %arg4[%c0_9, %c0_10] : memref<1x32xf32, #tpu.memory_space<vmem>>, vector<1x32xf32>
    %25 = vector.broadcast %24 : vector<1x32xf32> to vector<16x32xf32>
    %26 = arith.addf %23, %25 : vector<16x32xf32>
    %27 = arith.truncf %26 : vector<16x32xf32> to vector<16x32xbf16>
    %c0_11 = arith.constant 0 : index
    %c0_12 = arith.constant 0 : index
    %28 = vector.load %arg5[%c0_11, %c0_12] : memref<16x32xbf16, #tpu.memory_space<vmem>>, vector<16x32xbf16>
    tpu.vector_store %arg5[%c0_11, %c0_12], %27 {strides = array<i32>} : memref<16x32xbf16, #tpu.memory_space<vmem>>, vector<16x32xbf16>,
    return
  }
  func.func @transform_0(%arg0: i32) -> (i32, i32) {
    %c0_i32 = arith.constant 0 : i32
    %c0_i32_0 = arith.constant 0 : i32
    return %arg0, %c0_i32 : i32, i32
  }
  func.func @transform_1(%arg0: i32) -> (i32, i32) {
    %c0_i32 = arith.constant 0 : i32
    %c0_i32_0 = arith.constant 0 : i32
    return %arg0, %c0_i32 : i32, i32
  }
  func.func @transform_2(%arg0: i32) -> (i32, i32) {
    %c0_i32 = arith.constant 0 : i32
    %c0_i32_0 = arith.constant 0 : i32
    %c0_i32_1 = arith.constant 0 : i32
    return %c0_i32, %c0_i32_0 : i32, i32
  }
  func.func @transform_3(%arg0: i32) -> (i32, i32) {
    %c0_i32 = arith.constant 0 : i32
    %c0_i32_0 = arith.constant 0 : i32
    %c0_i32_1 = arith.constant 0 : i32
    return %c0_i32, %c0_i32_0 : i32, i32
  }
  func.func @transform_4(%arg0: i32) -> (i32, i32) {
    %c0_i32 = arith.constant 0 : i32
    %c0_i32_0 = arith.constant 0 : i32
    return %arg0, %c0_i32 : i32, i32
  }
}

module attributes {stable_mosaic.version = 11 : i64} {
  func.func @_flash_attn_kernel(%arg0: i32, %arg1: i32, %arg2: i32, %arg3: memref<1x8x32xbf16, #tpu.memory_space<vmem>>, %arg4: memref<1x8x32xbf16, #tpu.memory_space<vmem>>, %arg5: memref<1x8x32xbf16, #tpu.memory_space<vmem>>, %arg6: memref<1x8x1xf32, #tpu.memory_space<vmem>>, %arg7: memref<1x1x8xf32, #tpu.memory_space<vmem>>, %arg8: memref<1x8x32xbf16, #tpu.memory_space<vmem>>, %arg9: memref<4x8x1xf32, #tpu.memory_space<vmem>>, %arg10: memref<4x8x1xf32, #tpu.memory_space<vmem>>, %arg11: memref<8x32xf32, #tpu.memory_space<vmem>>) attributes {dimension_semantics = [#tpu.dimension_semantics<parallel>, #tpu.dimension_semantics<parallel>, #tpu.dimension_semantics<arbitrary>], iteration_bounds = array<i64: 2, 1, 1>, scalar_prefetch = 0 : i64, scratch_operands = 3 : i64, tpu.core_type = #tpu.core_type<tc>, window_params = [{transform_indices = @transform_0, window_bounds = array<i64: 1, 8, 32>}, {transform_indices = @transform_1, window_bounds = array<i64: 1, 8, 32>}, {transform_indices = @transform_2, window_bounds = array<i64: 1, 8, 32>}, {transform_indices = @transform_3, window_bounds = array<i64: 1, 8, 1>}, {transform_indices = @transform_4, window_bounds = array<i64: 1, 1, 8>}, {transform_indices = @transform_5, window_bounds = array<i64: 1, 8, 32>}]} {
    %c0_i32 = arith.constant 0 : i32
    %0 = arith.cmpi eq, %arg2, %c0_i32 : i32
    %1 = arith.extui %0 : i1 to i32
    %c0_i32_0 = arith.constant 0 : i32
    %2 = arith.cmpi ne, %1, %c0_i32_0 : i32
    scf.if %2 {
      %cst_88 = arith.constant 0xFF800000 : f32
      %152 = vector.broadcast %cst_88 : f32 to vector<4x8x1xf32>
      %c0_89 = arith.constant 0 : index
      %c0_90 = arith.constant 0 : index
      %c0_91 = arith.constant 0 : index
      %153 = vector.load %arg9[%c0_89, %c0_90, %c0_91] : memref<4x8x1xf32, #tpu.memory_space<vmem>>, vector<4x8x1xf32>
      tpu.vector_store %arg9[%c0_89, %c0_90, %c0_91], %152 {strides = array<i32>} : memref<4x8x1xf32, #tpu.memory_space<vmem>>, vector<4x8x1xf32>,
      %cst_92 = arith.constant 0.000000e+00 : f32
      %154 = vector.broadcast %cst_92 : f32 to vector<4x8x1xf32>
      %c0_93 = arith.constant 0 : index
      %c0_94 = arith.constant 0 : index
      %c0_95 = arith.constant 0 : index
      %155 = vector.load %arg10[%c0_93, %c0_94, %c0_95] : memref<4x8x1xf32, #tpu.memory_space<vmem>>, vector<4x8x1xf32>
      tpu.vector_store %arg10[%c0_93, %c0_94, %c0_95], %154 {strides = array<i32>} : memref<4x8x1xf32, #tpu.memory_space<vmem>>, vector<4x8x1xf32>,
      %cst_96 = arith.constant 0.000000e+00 : f32
      %156 = vector.broadcast %cst_96 : f32 to vector<8x32xf32>
      %c0_97 = arith.constant 0 : index
      %c0_98 = arith.constant 0 : index
      %157 = vector.load %arg11[%c0_97, %c0_98] : memref<8x32xf32, #tpu.memory_space<vmem>>, vector<8x32xf32>
      tpu.vector_store %arg11[%c0_97, %c0_98], %156 {strides = array<i32>} : memref<8x32xf32, #tpu.memory_space<vmem>>, vector<8x32xf32>,
    } else {
    }
    %c0 = arith.constant 0 : index
    %c0_1 = arith.constant 0 : index
    %c0_2 = arith.constant 0 : index
    %3 = vector.load %arg3[%c0, %c0_1, %c0_2] : memref<1x8x32xbf16, #tpu.memory_space<vmem>>, vector<1x8x32xbf16>
    %4 = vector.shape_cast %3 : vector<1x8x32xbf16> to vector<8x32xbf16>
    %c0_3 = arith.constant 0 : index
    %c0_4 = arith.constant 0 : index
    %c0_5 = arith.constant 0 : index
    %5 = vector.load %arg4[%c0_3, %c0_4, %c0_5] : memref<1x8x32xbf16, #tpu.memory_space<vmem>>, vector<1x8x32xbf16>
    %6 = vector.shape_cast %5 : vector<1x8x32xbf16> to vector<8x32xbf16>
    %c0_6 = arith.constant 0 : index
    %c0_7 = arith.constant 0 : index
    %c0_8 = arith.constant 0 : index
    %7 = vector.load %arg5[%c0_6, %c0_7, %c0_8] : memref<1x8x32xbf16, #tpu.memory_space<vmem>>, vector<1x8x32xbf16>
    %8 = vector.shape_cast %7 : vector<1x8x32xbf16> to vector<8x32xbf16>
    %9 = vector.extract_strided_slice %4 {offsets = [0, 0], sizes = [8, 8], strides = [1, 1]} : vector<8x32xbf16> to vector<8x8xbf16>
    %10 = vector.extract_strided_slice %6 {offsets = [0, 0], sizes = [8, 8], strides = [1, 1]} : vector<8x32xbf16> to vector<8x8xbf16>
    %cst = arith.constant dense<0.000000e+00> : vector<8x8xf32>
    %11 = tpu.matmul %9, %10, %cst {dimension_numbers = #tpu.dot_dimension_numbers<[1], [1], [0], [0], [0, 0, 1, 0], [], []>} : vector<8x8xbf16>, vector<8x8xbf16>, vector<8x8xf32> -> vector<8x8xf32>
    %cst_9 = arith.constant 0.353553385 : f32
    %12 = vector.broadcast %cst_9 : f32 to vector<8x8xf32>
    %13 = arith.mulf %11, %12 : vector<8x8xf32>
    %c0_10 = arith.constant 0 : index
    %c0_11 = arith.constant 0 : index
    %c0_12 = arith.constant 0 : index
    %14 = vector.load %arg9[%c0_10, %c0_11, %c0_12] : memref<4x8x1xf32, #tpu.memory_space<vmem>>, vector<1x8x1xf32>
    %15 = vector.shape_cast %14 : vector<1x8x1xf32> to vector<8x1xf32>
    %cst_13 = arith.constant dense<0xFF800000> : vector<8xf32>
    %16 = vector.multi_reduction <maximumf>, %13, %cst_13 [1] : vector<8x8xf32> to vector<8xf32>
    %17 = vector.shape_cast %16 : vector<8xf32> to vector<8x1xf32>
    %18 = arith.maximumf %15, %17 : vector<8x1xf32>
    %19 = arith.subf %15, %18 : vector<8x1xf32>
    %20 = math.exp %19 : vector<8x1xf32>
    %21 = vector.broadcast %18 : vector<8x1xf32> to vector<8x8xf32>
    %22 = arith.subf %13, %21 : vector<8x8xf32>
    %23 = math.exp %22 : vector<8x8xf32>
    %c0_14 = arith.constant 0 : index
    %c0_15 = arith.constant 0 : index
    %c0_16 = arith.constant 0 : index
    %24 = vector.load %arg10[%c0_14, %c0_15, %c0_16] : memref<4x8x1xf32, #tpu.memory_space<vmem>>, vector<1x8x1xf32>
    %25 = vector.shape_cast %24 : vector<1x8x1xf32> to vector<8x1xf32>
    %26 = arith.mulf %20, %25 : vector<8x1xf32>
    %cst_17 = arith.constant dense<0.000000e+00> : vector<8xf32>
    %27 = vector.multi_reduction <add>, %23, %cst_17 [1] : vector<8x8xf32> to vector<8xf32>
    %28 = vector.shape_cast %27 : vector<8xf32> to vector<8x1xf32>
    %29 = arith.addf %26, %28 : vector<8x1xf32>
    %c0_18 = arith.constant 0 : index
    %c0_19 = arith.constant 0 : index
    %c0_20 = arith.constant 0 : index
    %30 = vector.load %arg10[%c0_18, %c0_19, %c0_20] : memref<4x8x1xf32, #tpu.memory_space<vmem>>, vector<1x8x1xf32>
    %31 = vector.shape_cast %30 : vector<1x8x1xf32> to vector<8x1xf32>
    %32 = vector.shape_cast %29 : vector<8x1xf32> to vector<1x8x1xf32>
    tpu.vector_store %arg10[%c0_18, %c0_19, %c0_20], %32 {strides = array<i32>} : memref<4x8x1xf32, #tpu.memory_space<vmem>>, vector<1x8x1xf32>,
    %c0_21 = arith.constant 0 : index
    %c0_22 = arith.constant 0 : index
    %33 = vector.load %arg11[%c0_21, %c0_22] : memref<8x32xf32, #tpu.memory_space<vmem>>, vector<8x8xf32>
    %34 = vector.broadcast %20 : vector<8x1xf32> to vector<8x8xf32>
    %35 = arith.mulf %34, %33 : vector<8x8xf32>
    %36 = arith.truncf %23 : vector<8x8xf32> to vector<8x8xbf16>
    %37 = vector.extract_strided_slice %8 {offsets = [0, 0], sizes = [8, 8], strides = [1, 1]} : vector<8x32xbf16> to vector<8x8xbf16>
    %cst_23 = arith.constant dense<0.000000e+00> : vector<8x8xf32>
    %38 = tpu.matmul %36, %37, %cst_23 {dimension_numbers = #tpu.dot_dimension_numbers<[1], [0], [0], [1], [0, 0, 1, 1], [], []>} : vector<8x8xbf16>, vector<8x8xbf16>, vector<8x8xf32> -> vector<8x8xf32>
    %39 = arith.addf %35, %38 : vector<8x8xf32>
    %c0_24 = arith.constant 0 : index
    %c0_25 = arith.constant 0 : index
    %40 = vector.load %arg11[%c0_24, %c0_25] : memref<8x32xf32, #tpu.memory_space<vmem>>, vector<8x8xf32>
    tpu.vector_store %arg11[%c0_24, %c0_25], %39 {strides = array<i32>} : memref<8x32xf32, #tpu.memory_space<vmem>>, vector<8x8xf32>,
    %c0_26 = arith.constant 0 : index
    %c0_27 = arith.constant 0 : index
    %c0_28 = arith.constant 0 : index
    %41 = vector.load %arg9[%c0_26, %c0_27, %c0_28] : memref<4x8x1xf32, #tpu.memory_space<vmem>>, vector<1x8x1xf32>
    %42 = vector.shape_cast %41 : vector<1x8x1xf32> to vector<8x1xf32>
    %43 = vector.shape_cast %18 : vector<8x1xf32> to vector<1x8x1xf32>
    tpu.vector_store %arg9[%c0_26, %c0_27, %c0_28], %43 {strides = array<i32>} : memref<4x8x1xf32, #tpu.memory_space<vmem>>, vector<1x8x1xf32>,
    %44 = vector.extract_strided_slice %4 {offsets = [0, 8], sizes = [8, 8], strides = [1, 1]} : vector<8x32xbf16> to vector<8x8xbf16>
    %45 = vector.extract_strided_slice %6 {offsets = [0, 8], sizes = [8, 8], strides = [1, 1]} : vector<8x32xbf16> to vector<8x8xbf16>
    %cst_29 = arith.constant dense<0.000000e+00> : vector<8x8xf32>
    %46 = tpu.matmul %44, %45, %cst_29 {dimension_numbers = #tpu.dot_dimension_numbers<[1], [1], [0], [0], [0, 0, 1, 0], [], []>} : vector<8x8xbf16>, vector<8x8xbf16>, vector<8x8xf32> -> vector<8x8xf32>
    %cst_30 = arith.constant 0.353553385 : f32
    %47 = vector.broadcast %cst_30 : f32 to vector<8x8xf32>
    %48 = arith.mulf %46, %47 : vector<8x8xf32>
    %c1 = arith.constant 1 : index
    %c0_31 = arith.constant 0 : index
    %c0_32 = arith.constant 0 : index
    %49 = vector.load %arg9[%c1, %c0_31, %c0_32] : memref<4x8x1xf32, #tpu.memory_space<vmem>>, vector<1x8x1xf32>
    %50 = vector.shape_cast %49 : vector<1x8x1xf32> to vector<8x1xf32>
    %cst_33 = arith.constant dense<0xFF800000> : vector<8xf32>
    %51 = vector.multi_reduction <maximumf>, %48, %cst_33 [1] : vector<8x8xf32> to vector<8xf32>
    %52 = vector.shape_cast %51 : vector<8xf32> to vector<8x1xf32>
    %53 = arith.maximumf %50, %52 : vector<8x1xf32>
    %54 = arith.subf %50, %53 : vector<8x1xf32>
    %55 = math.exp %54 : vector<8x1xf32>
    %56 = vector.broadcast %53 : vector<8x1xf32> to vector<8x8xf32>
    %57 = arith.subf %48, %56 : vector<8x8xf32>
    %58 = math.exp %57 : vector<8x8xf32>
    %c1_34 = arith.constant 1 : index
    %c0_35 = arith.constant 0 : index
    %c0_36 = arith.constant 0 : index
    %59 = vector.load %arg10[%c1_34, %c0_35, %c0_36] : memref<4x8x1xf32, #tpu.memory_space<vmem>>, vector<1x8x1xf32>
    %60 = vector.shape_cast %59 : vector<1x8x1xf32> to vector<8x1xf32>
    %61 = arith.mulf %55, %60 : vector<8x1xf32>
    %cst_37 = arith.constant dense<0.000000e+00> : vector<8xf32>
    %62 = vector.multi_reduction <add>, %58, %cst_37 [1] : vector<8x8xf32> to vector<8xf32>
    %63 = vector.shape_cast %62 : vector<8xf32> to vector<8x1xf32>
    %64 = arith.addf %61, %63 : vector<8x1xf32>
    %c1_38 = arith.constant 1 : index
    %c0_39 = arith.constant 0 : index
    %c0_40 = arith.constant 0 : index
    %65 = vector.load %arg10[%c1_38, %c0_39, %c0_40] : memref<4x8x1xf32, #tpu.memory_space<vmem>>, vector<1x8x1xf32>
    %66 = vector.shape_cast %65 : vector<1x8x1xf32> to vector<8x1xf32>
    %67 = vector.shape_cast %64 : vector<8x1xf32> to vector<1x8x1xf32>
    tpu.vector_store %arg10[%c1_38, %c0_39, %c0_40], %67 {strides = array<i32>} : memref<4x8x1xf32, #tpu.memory_space<vmem>>, vector<1x8x1xf32>,
    %c0_41 = arith.constant 0 : index
    %c8 = arith.constant 8 : index
    %68 = vector.load %arg11[%c0_41, %c8] : memref<8x32xf32, #tpu.memory_space<vmem>>, vector<8x8xf32>
    %69 = vector.broadcast %55 : vector<8x1xf32> to vector<8x8xf32>
    %70 = arith.mulf %69, %68 : vector<8x8xf32>
    %71 = arith.truncf %58 : vector<8x8xf32> to vector<8x8xbf16>
    %72 = vector.extract_strided_slice %8 {offsets = [0, 8], sizes = [8, 8], strides = [1, 1]} : vector<8x32xbf16> to vector<8x8xbf16>
    %cst_42 = arith.constant dense<0.000000e+00> : vector<8x8xf32>
    %73 = tpu.matmul %71, %72, %cst_42 {dimension_numbers = #tpu.dot_dimension_numbers<[1], [0], [0], [1], [0, 0, 1, 1], [], []>} : vector<8x8xbf16>, vector<8x8xbf16>, vector<8x8xf32> -> vector<8x8xf32>
    %74 = arith.addf %70, %73 : vector<8x8xf32>
    %c0_43 = arith.constant 0 : index
    %c8_44 = arith.constant 8 : index
    %75 = vector.load %arg11[%c0_43, %c8_44] : memref<8x32xf32, #tpu.memory_space<vmem>>, vector<8x8xf32>
    tpu.vector_store %arg11[%c0_43, %c8_44], %74 {strides = array<i32>} : memref<8x32xf32, #tpu.memory_space<vmem>>, vector<8x8xf32>,
    %c1_45 = arith.constant 1 : index
    %c0_46 = arith.constant 0 : index
    %c0_47 = arith.constant 0 : index
    %76 = vector.load %arg9[%c1_45, %c0_46, %c0_47] : memref<4x8x1xf32, #tpu.memory_space<vmem>>, vector<1x8x1xf32>
    %77 = vector.shape_cast %76 : vector<1x8x1xf32> to vector<8x1xf32>
    %78 = vector.shape_cast %53 : vector<8x1xf32> to vector<1x8x1xf32>
    tpu.vector_store %arg9[%c1_45, %c0_46, %c0_47], %78 {strides = array<i32>} : memref<4x8x1xf32, #tpu.memory_space<vmem>>, vector<1x8x1xf32>,
    %79 = vector.extract_strided_slice %4 {offsets = [0, 16], sizes = [8, 8], strides = [1, 1]} : vector<8x32xbf16> to vector<8x8xbf16>
    %80 = vector.extract_strided_slice %6 {offsets = [0, 16], sizes = [8, 8], strides = [1, 1]} : vector<8x32xbf16> to vector<8x8xbf16>
    %cst_48 = arith.constant dense<0.000000e+00> : vector<8x8xf32>
    %81 = tpu.matmul %79, %80, %cst_48 {dimension_numbers = #tpu.dot_dimension_numbers<[1], [1], [0], [0], [0, 0, 1, 0], [], []>} : vector<8x8xbf16>, vector<8x8xbf16>, vector<8x8xf32> -> vector<8x8xf32>
    %cst_49 = arith.constant 0.353553385 : f32
    %82 = vector.broadcast %cst_49 : f32 to vector<8x8xf32>
    %83 = arith.mulf %81, %82 : vector<8x8xf32>
    %c2 = arith.constant 2 : index
    %c0_50 = arith.constant 0 : index
    %c0_51 = arith.constant 0 : index
    %84 = vector.load %arg9[%c2, %c0_50, %c0_51] : memref<4x8x1xf32, #tpu.memory_space<vmem>>, vector<1x8x1xf32>
    %85 = vector.shape_cast %84 : vector<1x8x1xf32> to vector<8x1xf32>
    %cst_52 = arith.constant dense<0xFF800000> : vector<8xf32>
    %86 = vector.multi_reduction <maximumf>, %83, %cst_52 [1] : vector<8x8xf32> to vector<8xf32>
    %87 = vector.shape_cast %86 : vector<8xf32> to vector<8x1xf32>
    %88 = arith.maximumf %85, %87 : vector<8x1xf32>
    %89 = arith.subf %85, %88 : vector<8x1xf32>
    %90 = math.exp %89 : vector<8x1xf32>
    %91 = vector.broadcast %88 : vector<8x1xf32> to vector<8x8xf32>
    %92 = arith.subf %83, %91 : vector<8x8xf32>
    %93 = math.exp %92 : vector<8x8xf32>
    %c2_53 = arith.constant 2 : index
    %c0_54 = arith.constant 0 : index
    %c0_55 = arith.constant 0 : index
    %94 = vector.load %arg10[%c2_53, %c0_54, %c0_55] : memref<4x8x1xf32, #tpu.memory_space<vmem>>, vector<1x8x1xf32>
    %95 = vector.shape_cast %94 : vector<1x8x1xf32> to vector<8x1xf32>
    %96 = arith.mulf %90, %95 : vector<8x1xf32>
    %cst_56 = arith.constant dense<0.000000e+00> : vector<8xf32>
    %97 = vector.multi_reduction <add>, %93, %cst_56 [1] : vector<8x8xf32> to vector<8xf32>
    %98 = vector.shape_cast %97 : vector<8xf32> to vector<8x1xf32>
    %99 = arith.addf %96, %98 : vector<8x1xf32>
    %c2_57 = arith.constant 2 : index
    %c0_58 = arith.constant 0 : index
    %c0_59 = arith.constant 0 : index
    %100 = vector.load %arg10[%c2_57, %c0_58, %c0_59] : memref<4x8x1xf32, #tpu.memory_space<vmem>>, vector<1x8x1xf32>
    %101 = vector.shape_cast %100 : vector<1x8x1xf32> to vector<8x1xf32>
    %102 = vector.shape_cast %99 : vector<8x1xf32> to vector<1x8x1xf32>
    tpu.vector_store %arg10[%c2_57, %c0_58, %c0_59], %102 {strides = array<i32>} : memref<4x8x1xf32, #tpu.memory_space<vmem>>, vector<1x8x1xf32>,
    %c0_60 = arith.constant 0 : index
    %c16 = arith.constant 16 : index
    %103 = vector.load %arg11[%c0_60, %c16] : memref<8x32xf32, #tpu.memory_space<vmem>>, vector<8x8xf32>
    %104 = vector.broadcast %90 : vector<8x1xf32> to vector<8x8xf32>
    %105 = arith.mulf %104, %103 : vector<8x8xf32>
    %106 = arith.truncf %93 : vector<8x8xf32> to vector<8x8xbf16>
    %107 = vector.extract_strided_slice %8 {offsets = [0, 16], sizes = [8, 8], strides = [1, 1]} : vector<8x32xbf16> to vector<8x8xbf16>
    %cst_61 = arith.constant dense<0.000000e+00> : vector<8x8xf32>
    %108 = tpu.matmul %106, %107, %cst_61 {dimension_numbers = #tpu.dot_dimension_numbers<[1], [0], [0], [1], [0, 0, 1, 1], [], []>} : vector<8x8xbf16>, vector<8x8xbf16>, vector<8x8xf32> -> vector<8x8xf32>
    %109 = arith.addf %105, %108 : vector<8x8xf32>
    %c0_62 = arith.constant 0 : index
    %c16_63 = arith.constant 16 : index
    %110 = vector.load %arg11[%c0_62, %c16_63] : memref<8x32xf32, #tpu.memory_space<vmem>>, vector<8x8xf32>
    tpu.vector_store %arg11[%c0_62, %c16_63], %109 {strides = array<i32>} : memref<8x32xf32, #tpu.memory_space<vmem>>, vector<8x8xf32>,
    %c2_64 = arith.constant 2 : index
    %c0_65 = arith.constant 0 : index
    %c0_66 = arith.constant 0 : index
    %111 = vector.load %arg9[%c2_64, %c0_65, %c0_66] : memref<4x8x1xf32, #tpu.memory_space<vmem>>, vector<1x8x1xf32>
    %112 = vector.shape_cast %111 : vector<1x8x1xf32> to vector<8x1xf32>
    %113 = vector.shape_cast %88 : vector<8x1xf32> to vector<1x8x1xf32>
    tpu.vector_store %arg9[%c2_64, %c0_65, %c0_66], %113 {strides = array<i32>} : memref<4x8x1xf32, #tpu.memory_space<vmem>>, vector<1x8x1xf32>,
    %114 = vector.extract_strided_slice %4 {offsets = [0, 24], sizes = [8, 8], strides = [1, 1]} : vector<8x32xbf16> to vector<8x8xbf16>
    %115 = vector.extract_strided_slice %6 {offsets = [0, 24], sizes = [8, 8], strides = [1, 1]} : vector<8x32xbf16> to vector<8x8xbf16>
    %cst_67 = arith.constant dense<0.000000e+00> : vector<8x8xf32>
    %116 = tpu.matmul %114, %115, %cst_67 {dimension_numbers = #tpu.dot_dimension_numbers<[1], [1], [0], [0], [0, 0, 1, 0], [], []>} : vector<8x8xbf16>, vector<8x8xbf16>, vector<8x8xf32> -> vector<8x8xf32>
    %cst_68 = arith.constant 0.353553385 : f32
    %117 = vector.broadcast %cst_68 : f32 to vector<8x8xf32>
    %118 = arith.mulf %116, %117 : vector<8x8xf32>
    %c3 = arith.constant 3 : index
    %c0_69 = arith.constant 0 : index
    %c0_70 = arith.constant 0 : index
    %119 = vector.load %arg9[%c3, %c0_69, %c0_70] : memref<4x8x1xf32, #tpu.memory_space<vmem>>, vector<1x8x1xf32>
    %120 = vector.shape_cast %119 : vector<1x8x1xf32> to vector<8x1xf32>
    %cst_71 = arith.constant dense<0xFF800000> : vector<8xf32>
    %121 = vector.multi_reduction <maximumf>, %118, %cst_71 [1] : vector<8x8xf32> to vector<8xf32>
    %122 = vector.shape_cast %121 : vector<8xf32> to vector<8x1xf32>
    %123 = arith.maximumf %120, %122 : vector<8x1xf32>
    %124 = arith.subf %120, %123 : vector<8x1xf32>
    %125 = math.exp %124 : vector<8x1xf32>
    %126 = vector.broadcast %123 : vector<8x1xf32> to vector<8x8xf32>
    %127 = arith.subf %118, %126 : vector<8x8xf32>
    %128 = math.exp %127 : vector<8x8xf32>
    %c3_72 = arith.constant 3 : index
    %c0_73 = arith.constant 0 : index
    %c0_74 = arith.constant 0 : index
    %129 = vector.load %arg10[%c3_72, %c0_73, %c0_74] : memref<4x8x1xf32, #tpu.memory_space<vmem>>, vector<1x8x1xf32>
    %130 = vector.shape_cast %129 : vector<1x8x1xf32> to vector<8x1xf32>
    %131 = arith.mulf %125, %130 : vector<8x1xf32>
    %cst_75 = arith.constant dense<0.000000e+00> : vector<8xf32>
    %132 = vector.multi_reduction <add>, %128, %cst_75 [1] : vector<8x8xf32> to vector<8xf32>
    %133 = vector.shape_cast %132 : vector<8xf32> to vector<8x1xf32>
    %134 = arith.addf %131, %133 : vector<8x1xf32>
    %c3_76 = arith.constant 3 : index
    %c0_77 = arith.constant 0 : index
    %c0_78 = arith.constant 0 : index
    %135 = vector.load %arg10[%c3_76, %c0_77, %c0_78] : memref<4x8x1xf32, #tpu.memory_space<vmem>>, vector<1x8x1xf32>
    %136 = vector.shape_cast %135 : vector<1x8x1xf32> to vector<8x1xf32>
    %137 = vector.shape_cast %134 : vector<8x1xf32> to vector<1x8x1xf32>
    tpu.vector_store %arg10[%c3_76, %c0_77, %c0_78], %137 {strides = array<i32>} : memref<4x8x1xf32, #tpu.memory_space<vmem>>, vector<1x8x1xf32>,
    %c0_79 = arith.constant 0 : index
    %c24 = arith.constant 24 : index
    %138 = vector.load %arg11[%c0_79, %c24] : memref<8x32xf32, #tpu.memory_space<vmem>>, vector<8x8xf32>
    %139 = vector.broadcast %125 : vector<8x1xf32> to vector<8x8xf32>
    %140 = arith.mulf %139, %138 : vector<8x8xf32>
    %141 = arith.truncf %128 : vector<8x8xf32> to vector<8x8xbf16>
    %142 = vector.extract_strided_slice %8 {offsets = [0, 24], sizes = [8, 8], strides = [1, 1]} : vector<8x32xbf16> to vector<8x8xbf16>
    %cst_80 = arith.constant dense<0.000000e+00> : vector<8x8xf32>
    %143 = tpu.matmul %141, %142, %cst_80 {dimension_numbers = #tpu.dot_dimension_numbers<[1], [0], [0], [1], [0, 0, 1, 1], [], []>} : vector<8x8xbf16>, vector<8x8xbf16>, vector<8x8xf32> -> vector<8x8xf32>
    %144 = arith.addf %140, %143 : vector<8x8xf32>
    %c0_81 = arith.constant 0 : index
    %c24_82 = arith.constant 24 : index
    %145 = vector.load %arg11[%c0_81, %c24_82] : memref<8x32xf32, #tpu.memory_space<vmem>>, vector<8x8xf32>
    tpu.vector_store %arg11[%c0_81, %c24_82], %144 {strides = array<i32>} : memref<8x32xf32, #tpu.memory_space<vmem>>, vector<8x8xf32>,
    %c3_83 = arith.constant 3 : index
    %c0_84 = arith.constant 0 : index
    %c0_85 = arith.constant 0 : index
    %146 = vector.load %arg9[%c3_83, %c0_84, %c0_85] : memref<4x8x1xf32, #tpu.memory_space<vmem>>, vector<1x8x1xf32>
    %147 = vector.shape_cast %146 : vector<1x8x1xf32> to vector<8x1xf32>
    %148 = vector.shape_cast %123 : vector<8x1xf32> to vector<1x8x1xf32>
    tpu.vector_store %arg9[%c3_83, %c0_84, %c0_85], %148 {strides = array<i32>} : memref<4x8x1xf32, #tpu.memory_space<vmem>>, vector<1x8x1xf32>,
    %c0_i32_86 = arith.constant 0 : i32
    %149 = arith.cmpi eq, %arg2, %c0_i32_86 : i32
    %150 = arith.extui %149 : i1 to i32
    %c0_i32_87 = arith.constant 0 : i32
    %151 = arith.cmpi ne, %150, %c0_i32_87 : i32
    scf.if %151 {
      %c0_88 = arith.constant 0 : index
      %c0_89 = arith.constant 0 : index
      %152 = vector.load %arg11[%c0_88, %c0_89] : memref<8x32xf32, #tpu.memory_space<vmem>>, vector<8x8xf32>
      %c0_90 = arith.constant 0 : index
      %c0_91 = arith.constant 0 : index
      %c0_92 = arith.constant 0 : index
      %153 = vector.load %arg10[%c0_90, %c0_91, %c0_92] : memref<4x8x1xf32, #tpu.memory_space<vmem>>, vector<1x8x1xf32>
      %154 = vector.shape_cast %153 : vector<1x8x1xf32> to vector<8x1xf32>
      %155 = tpu.reciprocal %154 {approx = true} : vector<8x1xf32> -> vector<8x1xf32>
      %156 = vector.broadcast %155 : vector<8x1xf32> to vector<8x8xf32>
      %157 = arith.mulf %152, %156 : vector<8x8xf32>
      %c0_93 = arith.constant 0 : index
      %c0_94 = arith.constant 0 : index
      %158 = vector.load %arg11[%c0_93, %c0_94] : memref<8x32xf32, #tpu.memory_space<vmem>>, vector<8x8xf32>
      tpu.vector_store %arg11[%c0_93, %c0_94], %157 {strides = array<i32>} : memref<8x32xf32, #tpu.memory_space<vmem>>, vector<8x8xf32>,
      %c0_95 = arith.constant 0 : index
      %c8_96 = arith.constant 8 : index
      %159 = vector.load %arg11[%c0_95, %c8_96] : memref<8x32xf32, #tpu.memory_space<vmem>>, vector<8x8xf32>
      %c1_97 = arith.constant 1 : index
      %c0_98 = arith.constant 0 : index
      %c0_99 = arith.constant 0 : index
      %160 = vector.load %arg10[%c1_97, %c0_98, %c0_99] : memref<4x8x1xf32, #tpu.memory_space<vmem>>, vector<1x8x1xf32>
      %161 = vector.shape_cast %160 : vector<1x8x1xf32> to vector<8x1xf32>
      %162 = tpu.reciprocal %161 {approx = true} : vector<8x1xf32> -> vector<8x1xf32>
      %163 = vector.broadcast %162 : vector<8x1xf32> to vector<8x8xf32>
      %164 = arith.mulf %159, %163 : vector<8x8xf32>
      %c0_100 = arith.constant 0 : index
      %c8_101 = arith.constant 8 : index
      %165 = vector.load %arg11[%c0_100, %c8_101] : memref<8x32xf32, #tpu.memory_space<vmem>>, vector<8x8xf32>
      tpu.vector_store %arg11[%c0_100, %c8_101], %164 {strides = array<i32>} : memref<8x32xf32, #tpu.memory_space<vmem>>, vector<8x8xf32>,
      %c0_102 = arith.constant 0 : index
      %c16_103 = arith.constant 16 : index
      %166 = vector.load %arg11[%c0_102, %c16_103] : memref<8x32xf32, #tpu.memory_space<vmem>>, vector<8x8xf32>
      %c2_104 = arith.constant 2 : index
      %c0_105 = arith.constant 0 : index
      %c0_106 = arith.constant 0 : index
      %167 = vector.load %arg10[%c2_104, %c0_105, %c0_106] : memref<4x8x1xf32, #tpu.memory_space<vmem>>, vector<1x8x1xf32>
      %168 = vector.shape_cast %167 : vector<1x8x1xf32> to vector<8x1xf32>
      %169 = tpu.reciprocal %168 {approx = true} : vector<8x1xf32> -> vector<8x1xf32>
      %170 = vector.broadcast %169 : vector<8x1xf32> to vector<8x8xf32>
      %171 = arith.mulf %166, %170 : vector<8x8xf32>
      %c0_107 = arith.constant 0 : index
      %c16_108 = arith.constant 16 : index
      %172 = vector.load %arg11[%c0_107, %c16_108] : memref<8x32xf32, #tpu.memory_space<vmem>>, vector<8x8xf32>
      tpu.vector_store %arg11[%c0_107, %c16_108], %171 {strides = array<i32>} : memref<8x32xf32, #tpu.memory_space<vmem>>, vector<8x8xf32>,
      %c0_109 = arith.constant 0 : index
      %c24_110 = arith.constant 24 : index
      %173 = vector.load %arg11[%c0_109, %c24_110] : memref<8x32xf32, #tpu.memory_space<vmem>>, vector<8x8xf32>
      %c3_111 = arith.constant 3 : index
      %c0_112 = arith.constant 0 : index
      %c0_113 = arith.constant 0 : index
      %174 = vector.load %arg10[%c3_111, %c0_112, %c0_113] : memref<4x8x1xf32, #tpu.memory_space<vmem>>, vector<1x8x1xf32>
      %175 = vector.shape_cast %174 : vector<1x8x1xf32> to vector<8x1xf32>
      %176 = tpu.reciprocal %175 {approx = true} : vector<8x1xf32> -> vector<8x1xf32>
      %177 = vector.broadcast %176 : vector<8x1xf32> to vector<8x8xf32>
      %178 = arith.mulf %173, %177 : vector<8x8xf32>
      %c0_114 = arith.constant 0 : index
      %c24_115 = arith.constant 24 : index
      %179 = vector.load %arg11[%c0_114, %c24_115] : memref<8x32xf32, #tpu.memory_space<vmem>>, vector<8x8xf32>
      tpu.vector_store %arg11[%c0_114, %c24_115], %178 {strides = array<i32>} : memref<8x32xf32, #tpu.memory_space<vmem>>, vector<8x8xf32>,
      %c0_116 = arith.constant 0 : index
      %c0_117 = arith.constant 0 : index
      %180 = vector.load %arg11[%c0_116, %c0_117] : memref<8x32xf32, #tpu.memory_space<vmem>>, vector<8x32xf32>
      %181 = arith.truncf %180 : vector<8x32xf32> to vector<8x32xbf16>
      %c0_118 = arith.constant 0 : index
      %c0_119 = arith.constant 0 : index
      %c0_120 = arith.constant 0 : index
      %182 = vector.load %arg8[%c0_118, %c0_119, %c0_120] : memref<1x8x32xbf16, #tpu.memory_space<vmem>>, vector<1x8x32xbf16>
      %183 = vector.shape_cast %182 : vector<1x8x32xbf16> to vector<8x32xbf16>
      %184 = vector.shape_cast %181 : vector<8x32xbf16> to vector<1x8x32xbf16>
      tpu.vector_store %arg8[%c0_118, %c0_119, %c0_120], %184 {strides = array<i32>} : memref<1x8x32xbf16, #tpu.memory_space<vmem>>, vector<1x8x32xbf16>,
    } else {
    }
    return
  }
  func.func @transform_0(%arg0: i32, %arg1: i32, %arg2: i32) -> (i32, i32, i32) {
    %c0_i32 = arith.constant 0 : i32
    %c0_i32_0 = arith.constant 0 : i32
    return %arg0, %arg1, %c0_i32 : i32, i32, i32
  }
  func.func @transform_1(%arg0: i32, %arg1: i32, %arg2: i32) -> (i32, i32, i32) {
    %c0_i32 = arith.constant 0 : i32
    %c0_i32_0 = arith.constant 0 : i32
    return %arg0, %arg2, %c0_i32 : i32, i32, i32
  }
  func.func @transform_2(%arg0: i32, %arg1: i32, %arg2: i32) -> (i32, i32, i32) {
    %c0_i32 = arith.constant 0 : i32
    %c0_i32_0 = arith.constant 0 : i32
    return %arg0, %arg2, %c0_i32 : i32, i32, i32
  }
  func.func @transform_3(%arg0: i32, %arg1: i32, %arg2: i32) -> (i32, i32, i32) {
    %c0_i32 = arith.constant 0 : i32
    %c0_i32_0 = arith.constant 0 : i32
    return %arg0, %arg1, %c0_i32 : i32, i32, i32
  }
  func.func @transform_4(%arg0: i32, %arg1: i32, %arg2: i32) -> (i32, i32, i32) {
    %c0_i32 = arith.constant 0 : i32
    %c0_i32_0 = arith.constant 0 : i32
    return %arg0, %c0_i32, %arg2 : i32, i32, i32
  }
  func.func @transform_5(%arg0: i32, %arg1: i32, %arg2: i32) -> (i32, i32, i32) {
    %c0_i32 = arith.constant 0 : i32
    %c0_i32_0 = arith.constant 0 : i32
    return %arg0, %arg1, %c0_i32 : i32, i32, i32
  }
}

module attributes {stable_mosaic.version = 11 : i64} {
  func.func @_matmul_kernel(%arg0: i32, %arg1: i32, %arg2: i32, %arg3: memref<16x128xbf16, #tpu.memory_space<vmem>>, %arg4: memref<128x128xbf16, #tpu.memory_space<vmem>>, %arg5: memref<1x128xf32, #tpu.memory_space<vmem>>, %arg6: memref<16x128xbf16, #tpu.memory_space<vmem>>, %arg7: memref<16x128xf32, #tpu.memory_space<vmem>>) attributes {dimension_semantics = [#tpu.dimension_semantics<parallel>, #tpu.dimension_semantics<parallel>, #tpu.dimension_semantics<arbitrary>], iteration_bounds = array<i64: 1, 1, 1>, scalar_prefetch = 0 : i64, scratch_operands = 1 : i64, tpu.core_type = #tpu.core_type<tc>, window_params = [{transform_indices = @transform_0, window_bounds = array<i64: 16, 128>}, {transform_indices = @transform_1, window_bounds = array<i64: 128, 128>}, {transform_indices = @transform_2, window_bounds = array<i64: 1, 128>}, {transform_indices = @transform_3, window_bounds = array<i64: 16, 128>}]} {
    %c0_i32 = arith.constant 0 : i32
    %0 = arith.cmpi eq, %arg2, %c0_i32 : i32
    %1 = arith.extui %0 : i1 to i32
    %c0_i32_0 = arith.constant 0 : i32
    %2 = arith.cmpi ne, %1, %c0_i32_0 : i32
    scf.if %2 {
      %cst_10 = arith.constant 0.000000e+00 : f32
      %12 = vector.broadcast %cst_10 : f32 to vector<16x128xf32>
      %c0_11 = arith.constant 0 : index
      %c0_12 = arith.constant 0 : index
      %13 = vector.load %arg7[%c0_11, %c0_12] : memref<16x128xf32, #tpu.memory_space<vmem>>, vector<16x128xf32>
      tpu.vector_store %arg7[%c0_11, %c0_12], %12 {strides = array<i32>} : memref<16x128xf32, #tpu.memory_space<vmem>>, vector<16x128xf32>,
    } else {
    }
    %c0 = arith.constant 0 : index
    %c0_1 = arith.constant 0 : index
    %3 = vector.load %arg7[%c0, %c0_1] : memref<16x128xf32, #tpu.memory_space<vmem>>, vector<16x128xf32>
    %c0_2 = arith.constant 0 : index
    %c0_3 = arith.constant 0 : index
    %4 = vector.load %arg3[%c0_2, %c0_3] : memref<16x128xbf16, #tpu.memory_space<vmem>>, vector<16x128xbf16>
    %c0_4 = arith.constant 0 : index
    %c0_5 = arith.constant 0 : index
    %5 = vector.load %arg4[%c0_4, %c0_5] : memref<128x128xbf16, #tpu.memory_space<vmem>>, vector<128x128xbf16>
    %cst = arith.constant dense<0.000000e+00> : vector<16x128xf32>
    %6 = tpu.matmul %4, %5, %cst {dimension_numbers = #tpu.dot_dimension_numbers<[1], [0], [0], [1], [0, 0, 1, 1], [], []>} : vector<16x128xbf16>, vector<128x128xbf16>, vector<16x128xf32> -> vector<16x128xf32>
    %7 = arith.addf %3, %6 : vector<16x128xf32>
    %c0_6 = arith.constant 0 : index
    %c0_7 = arith.constant 0 : index
    %8 = vector.load %arg7[%c0_6, %c0_7] : memref<16x128xf32, #tpu.memory_space<vmem>>, vector<16x128xf32>
    tpu.vector_store %arg7[%c0_6, %c0_7], %7 {strides = array<i32>} : memref<16x128xf32, #tpu.memory_space<vmem>>, vector<16x128xf32>,
    %c0_i32_8 = arith.constant 0 : i32
    %9 = arith.cmpi eq, %arg2, %c0_i32_8 : i32
    %10 = arith.extui %9 : i1 to i32
    %c0_i32_9 = arith.constant 0 : i32
    %11 = arith.cmpi ne, %10, %c0_i32_9 : i32
    scf.if %11 {
      %c0_10 = arith.constant 0 : index
      %c0_11 = arith.constant 0 : index
      %12 = vector.load %arg7[%c0_10, %c0_11] : memref<16x128xf32, #tpu.memory_space<vmem>>, vector<16x128xf32>
      %c0_12 = arith.constant 0 : index
      %c0_13 = arith.constant 0 : index
      %13 = vector.load %arg5[%c0_12, %c0_13] : memref<1x128xf32, #tpu.memory_space<vmem>>, vector<1x128xf32>
      %14 = vector.broadcast %13 : vector<1x128xf32> to vector<16x128xf32>
      %15 = arith.addf %12, %14 : vector<16x128xf32>
      %cst_14 = arith.constant 0.000000e+00 : f32
      %16 = vector.broadcast %cst_14 : f32 to vector<16x128xf32>
      %17 = arith.maximumf %15, %16 : vector<16x128xf32>
      %18 = arith.truncf %17 : vector<16x128xf32> to vector<16x128xbf16>
      %c0_15 = arith.constant 0 : index
      %c0_16 = arith.constant 0 : index
      %19 = vector.load %arg6[%c0_15, %c0_16] : memref<16x128xbf16, #tpu.memory_space<vmem>>, vector<16x128xbf16>
      tpu.vector_store %arg6[%c0_15, %c0_16], %18 {strides = array<i32>} : memref<16x128xbf16, #tpu.memory_space<vmem>>, vector<16x128xbf16>,
    } else {
    }
    return
  }
  func.func @transform_0(%arg0: i32, %arg1: i32, %arg2: i32) -> (i32, i32) {
    %c0_i32 = arith.constant 0 : i32
    return %arg0, %arg2 : i32, i32
  }
  func.func @transform_1(%arg0: i32, %arg1: i32, %arg2: i32) -> (i32, i32) {
    %c0_i32 = arith.constant 0 : i32
    return %arg2, %arg1 : i32, i32
  }
  func.func @transform_2(%arg0: i32, %arg1: i32, %arg2: i32) -> (i32, i32) {
    %c0_i32 = arith.constant 0 : i32
    %c0_i32_0 = arith.constant 0 : i32
    return %c0_i32, %arg1 : i32, i32
  }
  func.func @transform_3(%arg0: i32, %arg1: i32, %arg2: i32) -> (i32, i32) {
    %c0_i32 = arith.constant 0 : i32
    return %arg0, %arg1 : i32, i32
  }
}

module attributes {stable_mosaic.version = 11 : i64} {
  func.func @_add_ln_kernel(%arg0: i32, %arg1: memref<16x32xf32, #tpu.memory_space<vmem>>, %arg2: memref<16x32xbf16, #tpu.memory_space<vmem>>, %arg3: memref<1x32xf32, #tpu.memory_space<vmem>>, %arg4: memref<1x32xf32, #tpu.memory_space<vmem>>, %arg5: memref<16x32xbf16, #tpu.memory_space<vmem>>) attributes {dimension_semantics = [#tpu.dimension_semantics<parallel>], iteration_bounds = array<i64: 1>, scalar_prefetch = 0 : i64, scratch_operands = 0 : i64, tpu.core_type = #tpu.core_type<tc>, window_params = [{transform_indices = @transform_0, window_bounds = array<i64: 16, 32>}, {transform_indices = @transform_1, window_bounds = array<i64: 16, 32>}, {pipeline_mode = #tpu.pipeline_mode<synchronous>, transform_indices = @transform_2, window_bounds = array<i64: 1, 32>}, {pipeline_mode = #tpu.pipeline_mode<synchronous>, transform_indices = @transform_3, window_bounds = array<i64: 1, 32>}, {transform_indices = @transform_4, window_bounds = array<i64: 16, 32>}]} {
    %c0 = arith.constant 0 : index
    %c0_0 = arith.constant 0 : index
    %0 = vector.load %arg1[%c0, %c0_0] : memref<16x32xf32, #tpu.memory_space<vmem>>, vector<16x32xf32>
    %c0_1 = arith.constant 0 : index
    %c0_2 = arith.constant 0 : index
    %1 = vector.load %arg2[%c0_1, %c0_2] : memref<16x32xbf16, #tpu.memory_space<vmem>>, vector<16x32xbf16>
    %2 = arith.extf %1 : vector<16x32xbf16> to vector<16x32xf32>
    %3 = arith.addf %0, %2 : vector<16x32xf32>
    %cst = arith.constant dense<0.000000e+00> : vector<16xf32>
    %4 = vector.multi_reduction <add>, %3, %cst [1] : vector<16x32xf32> to vector<16xf32>
    %5 = vector.shape_cast %4 : vector<16xf32> to vector<16x1xf32>
    %cst_3 = arith.constant 3.200000e+01 : f32
    %6 = vector.broadcast %cst_3 : f32 to vector<16x1xf32>
    %7 = arith.divf %5, %6 : vector<16x1xf32>
    %8 = vector.broadcast %7 : vector<16x1xf32> to vector<16x32xf32>
    %9 = arith.subf %3, %8 : vector<16x32xf32>
    %10 = arith.mulf %9, %9 : vector<16x32xf32>
    %cst_4 = arith.constant dense<0.000000e+00> : vector<16xf32>
    %11 = vector.multi_reduction <add>, %10, %cst_4 [1] : vector<16x32xf32> to vector<16xf32>
    %12 = vector.shape_cast %11 : vector<16xf32> to vector<16x1xf32>
    %cst_5 = arith.constant 3.200000e+01 : f32
    %13 = vector.broadcast %cst_5 : f32 to vector<16x1xf32>
    %14 = arith.divf %12, %13 : vector<16x1xf32>
    %cst_6 = arith.constant 9.99999974E-6 : f32
    %15 = vector.broadcast %cst_6 : f32 to vector<16x1xf32>
    %16 = arith.addf %14, %15 : vector<16x1xf32>
    %17 = math.rsqrt %16 : vector<16x1xf32>
    %18 = vector.broadcast %17 : vector<16x1xf32> to vector<16x32xf32>
    %19 = arith.mulf %9, %18 : vector<16x32xf32>
    %c0_7 = arith.constant 0 : index
    %c0_8 = arith.constant 0 : index
    %20 = vector.load %arg3[%c0_7, %c0_8] : memref<1x32xf32, #tpu.memory_space<vmem>>, vector<1x32xf32>
    %21 = vector.broadcast %20 : vector<1x32xf32> to vector<16x32xf32>
    %22 = arith.mulf %19, %21 : vector<16x32xf32>
    %c0_9 = arith.constant 0 : index
    %c0_10 = arith.constant 0 : index
    %23 = vector.load %arg4[%c0_9, %c0_10] : memref<1x32xf32, #tpu.memory_space<vmem>>, vector<1x32xf32>
    %24 = vector.broadcast %23 : vector<1x32xf32> to vector<16x32xf32>
    %25 = arith.addf %22, %24 : vector<16x32xf32>
    %26 = arith.truncf %25 : vector<16x32xf32> to vector<16x32xbf16>
    %c0_11 = arith.constant 0 : index
    %c0_12 = arith.constant 0 : index
    %27 = vector.load %arg5[%c0_11, %c0_12] : memref<16x32xbf16, #tpu.memory_space<vmem>>, vector<16x32xbf16>
    tpu.vector_store %arg5[%c0_11, %c0_12], %26 {strides = array<i32>} : memref<16x32xbf16, #tpu.memory_space<vmem>>, vector<16x32xbf16>,
    return
  }
  func.func @transform_0(%arg0: i32) -> (i32, i32) {
    %c0_i32 = arith.constant 0 : i32
    %c0_i32_0 = arith.constant 0 : i32
    return %arg0, %c0_i32 : i32, i32
  }
  func.func @transform_1(%arg0: i32) -> (i32, i32) {
    %c0_i32 = arith.constant 0 : i32
    %c0_i32_0 = arith.constant 0 : i32
    return %arg0, %c0_i32 : i32, i32
  }
  func.func @transform_2(%arg0: i32) -> (i32, i32) {
    %c0_i32 = arith.constant 0 : i32
    %c0_i32_0 = arith.constant 0 : i32
    %c0_i32_1 = arith.constant 0 : i32
    return %c0_i32, %c0_i32_0 : i32, i32
  }
  func.func @transform_3(%arg0: i32) -> (i32, i32) {
    %c0_i32 = arith.constant 0 : i32
    %c0_i32_0 = arith.constant 0 : i32
    %c0_i32_1 = arith.constant 0 : i32
    return %c0_i32, %c0_i32_0 : i32, i32
  }
  func.func @transform_4(%arg0: i32) -> (i32, i32) {
    %c0_i32 = arith.constant 0 : i32
    %c0_i32_0 = arith.constant 0 : i32
    return %arg0, %c0_i32 : i32, i32
  }
}

module attributes {stable_mosaic.version = 11 : i64} {
  func.func @_flash_attn_kernel(%arg0: i32, %arg1: i32, %arg2: i32, %arg3: memref<1x8x32xbf16, #tpu.memory_space<vmem>>, %arg4: memref<1x8x32xbf16, #tpu.memory_space<vmem>>, %arg5: memref<1x8x32xbf16, #tpu.memory_space<vmem>>, %arg6: memref<1x8x1xf32, #tpu.memory_space<vmem>>, %arg7: memref<1x1x8xf32, #tpu.memory_space<vmem>>, %arg8: memref<1x8x32xbf16, #tpu.memory_space<vmem>>, %arg9: memref<4x8x1xf32, #tpu.memory_space<vmem>>, %arg10: memref<4x8x1xf32, #tpu.memory_space<vmem>>, %arg11: memref<8x32xf32, #tpu.memory_space<vmem>>) attributes {dimension_semantics = [#tpu.dimension_semantics<parallel>, #tpu.dimension_semantics<parallel>, #tpu.dimension_semantics<arbitrary>], iteration_bounds = array<i64: 2, 1, 1>, scalar_prefetch = 0 : i64, scratch_operands = 3 : i64, tpu.core_type = #tpu.core_type<tc>, window_params = [{transform_indices = @transform_0, window_bounds = array<i64: 1, 8, 32>}, {transform_indices = @transform_1, window_bounds = array<i64: 1, 8, 32>}, {transform_indices = @transform_2, window_bounds = array<i64: 1, 8, 32>}, {transform_indices = @transform_3, window_bounds = array<i64: 1, 8, 1>}, {transform_indices = @transform_4, window_bounds = array<i64: 1, 1, 8>}, {transform_indices = @transform_5, window_bounds = array<i64: 1, 8, 32>}]} {
    %c0_i32 = arith.constant 0 : i32
    %0 = arith.cmpi eq, %arg2, %c0_i32 : i32
    %1 = arith.extui %0 : i1 to i32
    %c0_i32_0 = arith.constant 0 : i32
    %2 = arith.cmpi ne, %1, %c0_i32_0 : i32
    scf.if %2 {
      %cst_94 = arith.constant 0xFF800000 : f32
      %172 = vector.broadcast %cst_94 : f32 to vector<4x8x1xf32>
      %c0_95 = arith.constant 0 : index
      %c0_96 = arith.constant 0 : index
      %c0_97 = arith.constant 0 : index
      %173 = vector.load %arg9[%c0_95, %c0_96, %c0_97] : memref<4x8x1xf32, #tpu.memory_space<vmem>>, vector<4x8x1xf32>
      tpu.vector_store %arg9[%c0_95, %c0_96, %c0_97], %172 {strides = array<i32>} : memref<4x8x1xf32, #tpu.memory_space<vmem>>, vector<4x8x1xf32>,
      %cst_98 = arith.constant 0.000000e+00 : f32
      %174 = vector.broadcast %cst_98 : f32 to vector<4x8x1xf32>
      %c0_99 = arith.constant 0 : index
      %c0_100 = arith.constant 0 : index
      %c0_101 = arith.constant 0 : index
      %175 = vector.load %arg10[%c0_99, %c0_100, %c0_101] : memref<4x8x1xf32, #tpu.memory_space<vmem>>, vector<4x8x1xf32>
      tpu.vector_store %arg10[%c0_99, %c0_100, %c0_101], %174 {strides = array<i32>} : memref<4x8x1xf32, #tpu.memory_space<vmem>>, vector<4x8x1xf32>,
      %cst_102 = arith.constant 0.000000e+00 : f32
      %176 = vector.broadcast %cst_102 : f32 to vector<8x32xf32>
      %c0_103 = arith.constant 0 : index
      %c0_104 = arith.constant 0 : index
      %177 = vector.load %arg11[%c0_103, %c0_104] : memref<8x32xf32, #tpu.memory_space<vmem>>, vector<8x32xf32>
      tpu.vector_store %arg11[%c0_103, %c0_104], %176 {strides = array<i32>} : memref<8x32xf32, #tpu.memory_space<vmem>>, vector<8x32xf32>,
    } else {
    }
    %c0 = arith.constant 0 : index
    %c0_1 = arith.constant 0 : index
    %c0_2 = arith.constant 0 : index
    %3 = vector.load %arg3[%c0, %c0_1, %c0_2] : memref<1x8x32xbf16, #tpu.memory_space<vmem>>, vector<1x8x32xbf16>
    %4 = vector.shape_cast %3 : vector<1x8x32xbf16> to vector<8x32xbf16>
    %c0_3 = arith.constant 0 : index
    %c0_4 = arith.constant 0 : index
    %c0_5 = arith.constant 0 : index
    %5 = vector.load %arg4[%c0_3, %c0_4, %c0_5] : memref<1x8x32xbf16, #tpu.memory_space<vmem>>, vector<1x8x32xbf16>
    %6 = vector.shape_cast %5 : vector<1x8x32xbf16> to vector<8x32xbf16>
    %c0_6 = arith.constant 0 : index
    %c0_7 = arith.constant 0 : index
    %c0_8 = arith.constant 0 : index
    %7 = vector.load %arg5[%c0_6, %c0_7, %c0_8] : memref<1x8x32xbf16, #tpu.memory_space<vmem>>, vector<1x8x32xbf16>
    %8 = vector.shape_cast %7 : vector<1x8x32xbf16> to vector<8x32xbf16>
    %c0_9 = arith.constant 0 : index
    %c0_10 = arith.constant 0 : index
    %c0_11 = arith.constant 0 : index
    %9 = vector.load %arg6[%c0_9, %c0_10, %c0_11] : memref<1x8x1xf32, #tpu.memory_space<vmem>>, vector<1x8x1xf32>
    %10 = vector.shape_cast %9 : vector<1x8x1xf32> to vector<8x1xf32>
    %11 = tpu.iota {dimensions = array<i32: 0>} : vector<8x8xi32>
    %c8_i32 = arith.constant 8 : i32
    %12 = arith.muli %arg1, %c8_i32 : i32
    %13 = vector.broadcast %12 : i32 to vector<8x8xi32>
    %14 = arith.addi %11, %13 : vector<8x8xi32>
    %15 = tpu.iota {dimensions = array<i32: 1>} : vector<8x8xi32>
    %c8_i32_12 = arith.constant 8 : i32
    %16 = arith.muli %arg2, %c8_i32_12 : i32
    %17 = vector.broadcast %16 : i32 to vector<8x8xi32>
    %18 = arith.addi %15, %17 : vector<8x8xi32>
    %19 = arith.cmpi sle, %18, %14 : vector<8x8xi32>
    %cst = arith.constant 0.000000e+00 : f32
    %cst_13 = arith.constant -1.000000e+09 : f32
    %20 = vector.broadcast %cst : f32 to vector<8x8xf32>
    %21 = vector.broadcast %cst_13 : f32 to vector<8x8xf32>
    %22 = arith.select %19, %20, %21 : vector<8x8xi1>, vector<8x8xf32>
    %23 = vector.broadcast %10 : vector<8x1xf32> to vector<8x8xf32>
    %24 = arith.addf %23, %22 : vector<8x8xf32>
    %25 = vector.extract_strided_slice %4 {offsets = [0, 0], sizes = [8, 8], strides = [1, 1]} : vector<8x32xbf16> to vector<8x8xbf16>
    %26 = vector.extract_strided_slice %6 {offsets = [0, 0], sizes = [8, 8], strides = [1, 1]} : vector<8x32xbf16> to vector<8x8xbf16>
    %cst_14 = arith.constant dense<0.000000e+00> : vector<8x8xf32>
    %27 = tpu.matmul %25, %26, %cst_14 {dimension_numbers = #tpu.dot_dimension_numbers<[1], [1], [0], [0], [0, 0, 1, 0], [], []>} : vector<8x8xbf16>, vector<8x8xbf16>, vector<8x8xf32> -> vector<8x8xf32>
    %cst_15 = arith.constant 0.353553385 : f32
    %28 = vector.broadcast %cst_15 : f32 to vector<8x8xf32>
    %29 = arith.mulf %27, %28 : vector<8x8xf32>
    %30 = arith.addf %29, %24 : vector<8x8xf32>
    %c0_16 = arith.constant 0 : index
    %c0_17 = arith.constant 0 : index
    %c0_18 = arith.constant 0 : index
    %31 = vector.load %arg9[%c0_16, %c0_17, %c0_18] : memref<4x8x1xf32, #tpu.memory_space<vmem>>, vector<1x8x1xf32>
    %32 = vector.shape_cast %31 : vector<1x8x1xf32> to vector<8x1xf32>
    %cst_19 = arith.constant dense<0xFF800000> : vector<8xf32>
    %33 = vector.multi_reduction <maximumf>, %30, %cst_19 [1] : vector<8x8xf32> to vector<8xf32>
    %34 = vector.shape_cast %33 : vector<8xf32> to vector<8x1xf32>
    %35 = arith.maximumf %32, %34 : vector<8x1xf32>
    %36 = arith.subf %32, %35 : vector<8x1xf32>
    %37 = math.exp %36 : vector<8x1xf32>
    %38 = vector.broadcast %35 : vector<8x1xf32> to vector<8x8xf32>
    %39 = arith.subf %30, %38 : vector<8x8xf32>
    %40 = math.exp %39 : vector<8x8xf32>
    %c0_20 = arith.constant 0 : index
    %c0_21 = arith.constant 0 : index
    %c0_22 = arith.constant 0 : index
    %41 = vector.load %arg10[%c0_20, %c0_21, %c0_22] : memref<4x8x1xf32, #tpu.memory_space<vmem>>, vector<1x8x1xf32>
    %42 = vector.shape_cast %41 : vector<1x8x1xf32> to vector<8x1xf32>
    %43 = arith.mulf %37, %42 : vector<8x1xf32>
    %cst_23 = arith.constant dense<0.000000e+00> : vector<8xf32>
    %44 = vector.multi_reduction <add>, %40, %cst_23 [1] : vector<8x8xf32> to vector<8xf32>
    %45 = vector.shape_cast %44 : vector<8xf32> to vector<8x1xf32>
    %46 = arith.addf %43, %45 : vector<8x1xf32>
    %c0_24 = arith.constant 0 : index
    %c0_25 = arith.constant 0 : index
    %c0_26 = arith.constant 0 : index
    %47 = vector.load %arg10[%c0_24, %c0_25, %c0_26] : memref<4x8x1xf32, #tpu.memory_space<vmem>>, vector<1x8x1xf32>
    %48 = vector.shape_cast %47 : vector<1x8x1xf32> to vector<8x1xf32>
    %49 = vector.shape_cast %46 : vector<8x1xf32> to vector<1x8x1xf32>
    tpu.vector_store %arg10[%c0_24, %c0_25, %c0_26], %49 {strides = array<i32>} : memref<4x8x1xf32, #tpu.memory_space<vmem>>, vector<1x8x1xf32>,
    %c0_27 = arith.constant 0 : index
    %c0_28 = arith.constant 0 : index
    %50 = vector.load %arg11[%c0_27, %c0_28] : memref<8x32xf32, #tpu.memory_space<vmem>>, vector<8x8xf32>
    %51 = vector.broadcast %37 : vector<8x1xf32> to vector<8x8xf32>
    %52 = arith.mulf %51, %50 : vector<8x8xf32>
    %53 = arith.truncf %40 : vector<8x8xf32> to vector<8x8xbf16>
    %54 = vector.extract_strided_slice %8 {offsets = [0, 0], sizes = [8, 8], strides = [1, 1]} : vector<8x32xbf16> to vector<8x8xbf16>
    %cst_29 = arith.constant dense<0.000000e+00> : vector<8x8xf32>
    %55 = tpu.matmul %53, %54, %cst_29 {dimension_numbers = #tpu.dot_dimension_numbers<[1], [0], [0], [1], [0, 0, 1, 1], [], []>} : vector<8x8xbf16>, vector<8x8xbf16>, vector<8x8xf32> -> vector<8x8xf32>
    %56 = arith.addf %52, %55 : vector<8x8xf32>
    %c0_30 = arith.constant 0 : index
    %c0_31 = arith.constant 0 : index
    %57 = vector.load %arg11[%c0_30, %c0_31] : memref<8x32xf32, #tpu.memory_space<vmem>>, vector<8x8xf32>
    tpu.vector_store %arg11[%c0_30, %c0_31], %56 {strides = array<i32>} : memref<8x32xf32, #tpu.memory_space<vmem>>, vector<8x8xf32>,
    %c0_32 = arith.constant 0 : index
    %c0_33 = arith.constant 0 : index
    %c0_34 = arith.constant 0 : index
    %58 = vector.load %arg9[%c0_32, %c0_33, %c0_34] : memref<4x8x1xf32, #tpu.memory_space<vmem>>, vector<1x8x1xf32>
    %59 = vector.shape_cast %58 : vector<1x8x1xf32> to vector<8x1xf32>
    %60 = vector.shape_cast %35 : vector<8x1xf32> to vector<1x8x1xf32>
    tpu.vector_store %arg9[%c0_32, %c0_33, %c0_34], %60 {strides = array<i32>} : memref<4x8x1xf32, #tpu.memory_space<vmem>>, vector<1x8x1xf32>,
    %61 = vector.extract_strided_slice %4 {offsets = [0, 8], sizes = [8, 8], strides = [1, 1]} : vector<8x32xbf16> to vector<8x8xbf16>
    %62 = vector.extract_strided_slice %6 {offsets = [0, 8], sizes = [8, 8], strides = [1, 1]} : vector<8x32xbf16> to vector<8x8xbf16>
    %cst_35 = arith.constant dense<0.000000e+00> : vector<8x8xf32>
    %63 = tpu.matmul %61, %62, %cst_35 {dimension_numbers = #tpu.dot_dimension_numbers<[1], [1], [0], [0], [0, 0, 1, 0], [], []>} : vector<8x8xbf16>, vector<8x8xbf16>, vector<8x8xf32> -> vector<8x8xf32>
    %cst_36 = arith.constant 0.353553385 : f32
    %64 = vector.broadcast %cst_36 : f32 to vector<8x8xf32>
    %65 = arith.mulf %63, %64 : vector<8x8xf32>
    %66 = arith.addf %65, %24 : vector<8x8xf32>
    %c1 = arith.constant 1 : index
    %c0_37 = arith.constant 0 : index
    %c0_38 = arith.constant 0 : index
    %67 = vector.load %arg9[%c1, %c0_37, %c0_38] : memref<4x8x1xf32, #tpu.memory_space<vmem>>, vector<1x8x1xf32>
    %68 = vector.shape_cast %67 : vector<1x8x1xf32> to vector<8x1xf32>
    %cst_39 = arith.constant dense<0xFF800000> : vector<8xf32>
    %69 = vector.multi_reduction <maximumf>, %66, %cst_39 [1] : vector<8x8xf32> to vector<8xf32>
    %70 = vector.shape_cast %69 : vector<8xf32> to vector<8x1xf32>
    %71 = arith.maximumf %68, %70 : vector<8x1xf32>
    %72 = arith.subf %68, %71 : vector<8x1xf32>
    %73 = math.exp %72 : vector<8x1xf32>
    %74 = vector.broadcast %71 : vector<8x1xf32> to vector<8x8xf32>
    %75 = arith.subf %66, %74 : vector<8x8xf32>
    %76 = math.exp %75 : vector<8x8xf32>
    %c1_40 = arith.constant 1 : index
    %c0_41 = arith.constant 0 : index
    %c0_42 = arith.constant 0 : index
    %77 = vector.load %arg10[%c1_40, %c0_41, %c0_42] : memref<4x8x1xf32, #tpu.memory_space<vmem>>, vector<1x8x1xf32>
    %78 = vector.shape_cast %77 : vector<1x8x1xf32> to vector<8x1xf32>
    %79 = arith.mulf %73, %78 : vector<8x1xf32>
    %cst_43 = arith.constant dense<0.000000e+00> : vector<8xf32>
    %80 = vector.multi_reduction <add>, %76, %cst_43 [1] : vector<8x8xf32> to vector<8xf32>
    %81 = vector.shape_cast %80 : vector<8xf32> to vector<8x1xf32>
    %82 = arith.addf %79, %81 : vector<8x1xf32>
    %c1_44 = arith.constant 1 : index
    %c0_45 = arith.constant 0 : index
    %c0_46 = arith.constant 0 : index
    %83 = vector.load %arg10[%c1_44, %c0_45, %c0_46] : memref<4x8x1xf32, #tpu.memory_space<vmem>>, vector<1x8x1xf32>
    %84 = vector.shape_cast %83 : vector<1x8x1xf32> to vector<8x1xf32>
    %85 = vector.shape_cast %82 : vector<8x1xf32> to vector<1x8x1xf32>
    tpu.vector_store %arg10[%c1_44, %c0_45, %c0_46], %85 {strides = array<i32>} : memref<4x8x1xf32, #tpu.memory_space<vmem>>, vector<1x8x1xf32>,
    %c0_47 = arith.constant 0 : index
    %c8 = arith.constant 8 : index
    %86 = vector.load %arg11[%c0_47, %c8] : memref<8x32xf32, #tpu.memory_space<vmem>>, vector<8x8xf32>
    %87 = vector.broadcast %73 : vector<8x1xf32> to vector<8x8xf32>
    %88 = arith.mulf %87, %86 : vector<8x8xf32>
    %89 = arith.truncf %76 : vector<8x8xf32> to vector<8x8xbf16>
    %90 = vector.extract_strided_slice %8 {offsets = [0, 8], sizes = [8, 8], strides = [1, 1]} : vector<8x32xbf16> to vector<8x8xbf16>
    %cst_48 = arith.constant dense<0.000000e+00> : vector<8x8xf32>
    %91 = tpu.matmul %89, %90, %cst_48 {dimension_numbers = #tpu.dot_dimension_numbers<[1], [0], [0], [1], [0, 0, 1, 1], [], []>} : vector<8x8xbf16>, vector<8x8xbf16>, vector<8x8xf32> -> vector<8x8xf32>
    %92 = arith.addf %88, %91 : vector<8x8xf32>
    %c0_49 = arith.constant 0 : index
    %c8_50 = arith.constant 8 : index
    %93 = vector.load %arg11[%c0_49, %c8_50] : memref<8x32xf32, #tpu.memory_space<vmem>>, vector<8x8xf32>
    tpu.vector_store %arg11[%c0_49, %c8_50], %92 {strides = array<i32>} : memref<8x32xf32, #tpu.memory_space<vmem>>, vector<8x8xf32>,
    %c1_51 = arith.constant 1 : index
    %c0_52 = arith.constant 0 : index
    %c0_53 = arith.constant 0 : index
    %94 = vector.load %arg9[%c1_51, %c0_52, %c0_53] : memref<4x8x1xf32, #tpu.memory_space<vmem>>, vector<1x8x1xf32>
    %95 = vector.shape_cast %94 : vector<1x8x1xf32> to vector<8x1xf32>
    %96 = vector.shape_cast %71 : vector<8x1xf32> to vector<1x8x1xf32>
    tpu.vector_store %arg9[%c1_51, %c0_52, %c0_53], %96 {strides = array<i32>} : memref<4x8x1xf32, #tpu.memory_space<vmem>>, vector<1x8x1xf32>,
    %97 = vector.extract_strided_slice %4 {offsets = [0, 16], sizes = [8, 8], strides = [1, 1]} : vector<8x32xbf16> to vector<8x8xbf16>
    %98 = vector.extract_strided_slice %6 {offsets = [0, 16], sizes = [8, 8], strides = [1, 1]} : vector<8x32xbf16> to vector<8x8xbf16>
    %cst_54 = arith.constant dense<0.000000e+00> : vector<8x8xf32>
    %99 = tpu.matmul %97, %98, %cst_54 {dimension_numbers = #tpu.dot_dimension_numbers<[1], [1], [0], [0], [0, 0, 1, 0], [], []>} : vector<8x8xbf16>, vector<8x8xbf16>, vector<8x8xf32> -> vector<8x8xf32>
    %cst_55 = arith.constant 0.353553385 : f32
    %100 = vector.broadcast %cst_55 : f32 to vector<8x8xf32>
    %101 = arith.mulf %99, %100 : vector<8x8xf32>
    %102 = arith.addf %101, %24 : vector<8x8xf32>
    %c2 = arith.constant 2 : index
    %c0_56 = arith.constant 0 : index
    %c0_57 = arith.constant 0 : index
    %103 = vector.load %arg9[%c2, %c0_56, %c0_57] : memref<4x8x1xf32, #tpu.memory_space<vmem>>, vector<1x8x1xf32>
    %104 = vector.shape_cast %103 : vector<1x8x1xf32> to vector<8x1xf32>
    %cst_58 = arith.constant dense<0xFF800000> : vector<8xf32>
    %105 = vector.multi_reduction <maximumf>, %102, %cst_58 [1] : vector<8x8xf32> to vector<8xf32>
    %106 = vector.shape_cast %105 : vector<8xf32> to vector<8x1xf32>
    %107 = arith.maximumf %104, %106 : vector<8x1xf32>
    %108 = arith.subf %104, %107 : vector<8x1xf32>
    %109 = math.exp %108 : vector<8x1xf32>
    %110 = vector.broadcast %107 : vector<8x1xf32> to vector<8x8xf32>
    %111 = arith.subf %102, %110 : vector<8x8xf32>
    %112 = math.exp %111 : vector<8x8xf32>
    %c2_59 = arith.constant 2 : index
    %c0_60 = arith.constant 0 : index
    %c0_61 = arith.constant 0 : index
    %113 = vector.load %arg10[%c2_59, %c0_60, %c0_61] : memref<4x8x1xf32, #tpu.memory_space<vmem>>, vector<1x8x1xf32>
    %114 = vector.shape_cast %113 : vector<1x8x1xf32> to vector<8x1xf32>
    %115 = arith.mulf %109, %114 : vector<8x1xf32>
    %cst_62 = arith.constant dense<0.000000e+00> : vector<8xf32>
    %116 = vector.multi_reduction <add>, %112, %cst_62 [1] : vector<8x8xf32> to vector<8xf32>
    %117 = vector.shape_cast %116 : vector<8xf32> to vector<8x1xf32>
    %118 = arith.addf %115, %117 : vector<8x1xf32>
    %c2_63 = arith.constant 2 : index
    %c0_64 = arith.constant 0 : index
    %c0_65 = arith.constant 0 : index
    %119 = vector.load %arg10[%c2_63, %c0_64, %c0_65] : memref<4x8x1xf32, #tpu.memory_space<vmem>>, vector<1x8x1xf32>
    %120 = vector.shape_cast %119 : vector<1x8x1xf32> to vector<8x1xf32>
    %121 = vector.shape_cast %118 : vector<8x1xf32> to vector<1x8x1xf32>
    tpu.vector_store %arg10[%c2_63, %c0_64, %c0_65], %121 {strides = array<i32>} : memref<4x8x1xf32, #tpu.memory_space<vmem>>, vector<1x8x1xf32>,
    %c0_66 = arith.constant 0 : index
    %c16 = arith.constant 16 : index
    %122 = vector.load %arg11[%c0_66, %c16] : memref<8x32xf32, #tpu.memory_space<vmem>>, vector<8x8xf32>
    %123 = vector.broadcast %109 : vector<8x1xf32> to vector<8x8xf32>
    %124 = arith.mulf %123, %122 : vector<8x8xf32>
    %125 = arith.truncf %112 : vector<8x8xf32> to vector<8x8xbf16>
    %126 = vector.extract_strided_slice %8 {offsets = [0, 16], sizes = [8, 8], strides = [1, 1]} : vector<8x32xbf16> to vector<8x8xbf16>
    %cst_67 = arith.constant dense<0.000000e+00> : vector<8x8xf32>
    %127 = tpu.matmul %125, %126, %cst_67 {dimension_numbers = #tpu.dot_dimension_numbers<[1], [0], [0], [1], [0, 0, 1, 1], [], []>} : vector<8x8xbf16>, vector<8x8xbf16>, vector<8x8xf32> -> vector<8x8xf32>
    %128 = arith.addf %124, %127 : vector<8x8xf32>
    %c0_68 = arith.constant 0 : index
    %c16_69 = arith.constant 16 : index
    %129 = vector.load %arg11[%c0_68, %c16_69] : memref<8x32xf32, #tpu.memory_space<vmem>>, vector<8x8xf32>
    tpu.vector_store %arg11[%c0_68, %c16_69], %128 {strides = array<i32>} : memref<8x32xf32, #tpu.memory_space<vmem>>, vector<8x8xf32>,
    %c2_70 = arith.constant 2 : index
    %c0_71 = arith.constant 0 : index
    %c0_72 = arith.constant 0 : index
    %130 = vector.load %arg9[%c2_70, %c0_71, %c0_72] : memref<4x8x1xf32, #tpu.memory_space<vmem>>, vector<1x8x1xf32>
    %131 = vector.shape_cast %130 : vector<1x8x1xf32> to vector<8x1xf32>
    %132 = vector.shape_cast %107 : vector<8x1xf32> to vector<1x8x1xf32>
    tpu.vector_store %arg9[%c2_70, %c0_71, %c0_72], %132 {strides = array<i32>} : memref<4x8x1xf32, #tpu.memory_space<vmem>>, vector<1x8x1xf32>,
    %133 = vector.extract_strided_slice %4 {offsets = [0, 24], sizes = [8, 8], strides = [1, 1]} : vector<8x32xbf16> to vector<8x8xbf16>
    %134 = vector.extract_strided_slice %6 {offsets = [0, 24], sizes = [8, 8], strides = [1, 1]} : vector<8x32xbf16> to vector<8x8xbf16>
    %cst_73 = arith.constant dense<0.000000e+00> : vector<8x8xf32>
    %135 = tpu.matmul %133, %134, %cst_73 {dimension_numbers = #tpu.dot_dimension_numbers<[1], [1], [0], [0], [0, 0, 1, 0], [], []>} : vector<8x8xbf16>, vector<8x8xbf16>, vector<8x8xf32> -> vector<8x8xf32>
    %cst_74 = arith.constant 0.353553385 : f32
    %136 = vector.broadcast %cst_74 : f32 to vector<8x8xf32>
    %137 = arith.mulf %135, %136 : vector<8x8xf32>
    %138 = arith.addf %137, %24 : vector<8x8xf32>
    %c3 = arith.constant 3 : index
    %c0_75 = arith.constant 0 : index
    %c0_76 = arith.constant 0 : index
    %139 = vector.load %arg9[%c3, %c0_75, %c0_76] : memref<4x8x1xf32, #tpu.memory_space<vmem>>, vector<1x8x1xf32>
    %140 = vector.shape_cast %139 : vector<1x8x1xf32> to vector<8x1xf32>
    %cst_77 = arith.constant dense<0xFF800000> : vector<8xf32>
    %141 = vector.multi_reduction <maximumf>, %138, %cst_77 [1] : vector<8x8xf32> to vector<8xf32>
    %142 = vector.shape_cast %141 : vector<8xf32> to vector<8x1xf32>
    %143 = arith.maximumf %140, %142 : vector<8x1xf32>
    %144 = arith.subf %140, %143 : vector<8x1xf32>
    %145 = math.exp %144 : vector<8x1xf32>
    %146 = vector.broadcast %143 : vector<8x1xf32> to vector<8x8xf32>
    %147 = arith.subf %138, %146 : vector<8x8xf32>
    %148 = math.exp %147 : vector<8x8xf32>
    %c3_78 = arith.constant 3 : index
    %c0_79 = arith.constant 0 : index
    %c0_80 = arith.constant 0 : index
    %149 = vector.load %arg10[%c3_78, %c0_79, %c0_80] : memref<4x8x1xf32, #tpu.memory_space<vmem>>, vector<1x8x1xf32>
    %150 = vector.shape_cast %149 : vector<1x8x1xf32> to vector<8x1xf32>
    %151 = arith.mulf %145, %150 : vector<8x1xf32>
    %cst_81 = arith.constant dense<0.000000e+00> : vector<8xf32>
    %152 = vector.multi_reduction <add>, %148, %cst_81 [1] : vector<8x8xf32> to vector<8xf32>
    %153 = vector.shape_cast %152 : vector<8xf32> to vector<8x1xf32>
    %154 = arith.addf %151, %153 : vector<8x1xf32>
    %c3_82 = arith.constant 3 : index
    %c0_83 = arith.constant 0 : index
    %c0_84 = arith.constant 0 : index
    %155 = vector.load %arg10[%c3_82, %c0_83, %c0_84] : memref<4x8x1xf32, #tpu.memory_space<vmem>>, vector<1x8x1xf32>
    %156 = vector.shape_cast %155 : vector<1x8x1xf32> to vector<8x1xf32>
    %157 = vector.shape_cast %154 : vector<8x1xf32> to vector<1x8x1xf32>
    tpu.vector_store %arg10[%c3_82, %c0_83, %c0_84], %157 {strides = array<i32>} : memref<4x8x1xf32, #tpu.memory_space<vmem>>, vector<1x8x1xf32>,
    %c0_85 = arith.constant 0 : index
    %c24 = arith.constant 24 : index
    %158 = vector.load %arg11[%c0_85, %c24] : memref<8x32xf32, #tpu.memory_space<vmem>>, vector<8x8xf32>
    %159 = vector.broadcast %145 : vector<8x1xf32> to vector<8x8xf32>
    %160 = arith.mulf %159, %158 : vector<8x8xf32>
    %161 = arith.truncf %148 : vector<8x8xf32> to vector<8x8xbf16>
    %162 = vector.extract_strided_slice %8 {offsets = [0, 24], sizes = [8, 8], strides = [1, 1]} : vector<8x32xbf16> to vector<8x8xbf16>
    %cst_86 = arith.constant dense<0.000000e+00> : vector<8x8xf32>
    %163 = tpu.matmul %161, %162, %cst_86 {dimension_numbers = #tpu.dot_dimension_numbers<[1], [0], [0], [1], [0, 0, 1, 1], [], []>} : vector<8x8xbf16>, vector<8x8xbf16>, vector<8x8xf32> -> vector<8x8xf32>
    %164 = arith.addf %160, %163 : vector<8x8xf32>
    %c0_87 = arith.constant 0 : index
    %c24_88 = arith.constant 24 : index
    %165 = vector.load %arg11[%c0_87, %c24_88] : memref<8x32xf32, #tpu.memory_space<vmem>>, vector<8x8xf32>
    tpu.vector_store %arg11[%c0_87, %c24_88], %164 {strides = array<i32>} : memref<8x32xf32, #tpu.memory_space<vmem>>, vector<8x8xf32>,
    %c3_89 = arith.constant 3 : index
    %c0_90 = arith.constant 0 : index
    %c0_91 = arith.constant 0 : index
    %166 = vector.load %arg9[%c3_89, %c0_90, %c0_91] : memref<4x8x1xf32, #tpu.memory_space<vmem>>, vector<1x8x1xf32>
    %167 = vector.shape_cast %166 : vector<1x8x1xf32> to vector<8x1xf32>
    %168 = vector.shape_cast %143 : vector<8x1xf32> to vector<1x8x1xf32>
    tpu.vector_store %arg9[%c3_89, %c0_90, %c0_91], %168 {strides = array<i32>} : memref<4x8x1xf32, #tpu.memory_space<vmem>>, vector<1x8x1xf32>,
    %c0_i32_92 = arith.constant 0 : i32
    %169 = arith.cmpi eq, %arg2, %c0_i32_92 : i32
    %170 = arith.extui %169 : i1 to i32
    %c0_i32_93 = arith.constant 0 : i32
    %171 = arith.cmpi ne, %170, %c0_i32_93 : i32
    scf.if %171 {
      %c0_94 = arith.constant 0 : index
      %c0_95 = arith.constant 0 : index
      %172 = vector.load %arg11[%c0_94, %c0_95] : memref<8x32xf32, #tpu.memory_space<vmem>>, vector<8x8xf32>
      %c0_96 = arith.constant 0 : index
      %c0_97 = arith.constant 0 : index
      %c0_98 = arith.constant 0 : index
      %173 = vector.load %arg10[%c0_96, %c0_97, %c0_98] : memref<4x8x1xf32, #tpu.memory_space<vmem>>, vector<1x8x1xf32>
      %174 = vector.shape_cast %173 : vector<1x8x1xf32> to vector<8x1xf32>
      %175 = tpu.reciprocal %174 {approx = true} : vector<8x1xf32> -> vector<8x1xf32>
      %176 = vector.broadcast %175 : vector<8x1xf32> to vector<8x8xf32>
      %177 = arith.mulf %172, %176 : vector<8x8xf32>
      %c0_99 = arith.constant 0 : index
      %c0_100 = arith.constant 0 : index
      %178 = vector.load %arg11[%c0_99, %c0_100] : memref<8x32xf32, #tpu.memory_space<vmem>>, vector<8x8xf32>
      tpu.vector_store %arg11[%c0_99, %c0_100], %177 {strides = array<i32>} : memref<8x32xf32, #tpu.memory_space<vmem>>, vector<8x8xf32>,
      %c0_101 = arith.constant 0 : index
      %c8_102 = arith.constant 8 : index
      %179 = vector.load %arg11[%c0_101, %c8_102] : memref<8x32xf32, #tpu.memory_space<vmem>>, vector<8x8xf32>
      %c1_103 = arith.constant 1 : index
      %c0_104 = arith.constant 0 : index
      %c0_105 = arith.constant 0 : index
      %180 = vector.load %arg10[%c1_103, %c0_104, %c0_105] : memref<4x8x1xf32, #tpu.memory_space<vmem>>, vector<1x8x1xf32>
      %181 = vector.shape_cast %180 : vector<1x8x1xf32> to vector<8x1xf32>
      %182 = tpu.reciprocal %181 {approx = true} : vector<8x1xf32> -> vector<8x1xf32>
      %183 = vector.broadcast %182 : vector<8x1xf32> to vector<8x8xf32>
      %184 = arith.mulf %179, %183 : vector<8x8xf32>
      %c0_106 = arith.constant 0 : index
      %c8_107 = arith.constant 8 : index
      %185 = vector.load %arg11[%c0_106, %c8_107] : memref<8x32xf32, #tpu.memory_space<vmem>>, vector<8x8xf32>
      tpu.vector_store %arg11[%c0_106, %c8_107], %184 {strides = array<i32>} : memref<8x32xf32, #tpu.memory_space<vmem>>, vector<8x8xf32>,
      %c0_108 = arith.constant 0 : index
      %c16_109 = arith.constant 16 : index
      %186 = vector.load %arg11[%c0_108, %c16_109] : memref<8x32xf32, #tpu.memory_space<vmem>>, vector<8x8xf32>
      %c2_110 = arith.constant 2 : index
      %c0_111 = arith.constant 0 : index
      %c0_112 = arith.constant 0 : index
      %187 = vector.load %arg10[%c2_110, %c0_111, %c0_112] : memref<4x8x1xf32, #tpu.memory_space<vmem>>, vector<1x8x1xf32>
      %188 = vector.shape_cast %187 : vector<1x8x1xf32> to vector<8x1xf32>
      %189 = tpu.reciprocal %188 {approx = true} : vector<8x1xf32> -> vector<8x1xf32>
      %190 = vector.broadcast %189 : vector<8x1xf32> to vector<8x8xf32>
      %191 = arith.mulf %186, %190 : vector<8x8xf32>
      %c0_113 = arith.constant 0 : index
      %c16_114 = arith.constant 16 : index
      %192 = vector.load %arg11[%c0_113, %c16_114] : memref<8x32xf32, #tpu.memory_space<vmem>>, vector<8x8xf32>
      tpu.vector_store %arg11[%c0_113, %c16_114], %191 {strides = array<i32>} : memref<8x32xf32, #tpu.memory_space<vmem>>, vector<8x8xf32>,
      %c0_115 = arith.constant 0 : index
      %c24_116 = arith.constant 24 : index
      %193 = vector.load %arg11[%c0_115, %c24_116] : memref<8x32xf32, #tpu.memory_space<vmem>>, vector<8x8xf32>
      %c3_117 = arith.constant 3 : index
      %c0_118 = arith.constant 0 : index
      %c0_119 = arith.constant 0 : index
      %194 = vector.load %arg10[%c3_117, %c0_118, %c0_119] : memref<4x8x1xf32, #tpu.memory_space<vmem>>, vector<1x8x1xf32>
      %195 = vector.shape_cast %194 : vector<1x8x1xf32> to vector<8x1xf32>
      %196 = tpu.reciprocal %195 {approx = true} : vector<8x1xf32> -> vector<8x1xf32>
      %197 = vector.broadcast %196 : vector<8x1xf32> to vector<8x8xf32>
      %198 = arith.mulf %193, %197 : vector<8x8xf32>
      %c0_120 = arith.constant 0 : index
      %c24_121 = arith.constant 24 : index
      %199 = vector.load %arg11[%c0_120, %c24_121] : memref<8x32xf32, #tpu.memory_space<vmem>>, vector<8x8xf32>
      tpu.vector_store %arg11[%c0_120, %c24_121], %198 {strides = array<i32>} : memref<8x32xf32, #tpu.memory_space<vmem>>, vector<8x8xf32>,
      %c0_122 = arith.constant 0 : index
      %c0_123 = arith.constant 0 : index
      %200 = vector.load %arg11[%c0_122, %c0_123] : memref<8x32xf32, #tpu.memory_space<vmem>>, vector<8x32xf32>
      %201 = arith.truncf %200 : vector<8x32xf32> to vector<8x32xbf16>
      %c0_124 = arith.constant 0 : index
      %c0_125 = arith.constant 0 : index
      %c0_126 = arith.constant 0 : index
      %202 = vector.load %arg8[%c0_124, %c0_125, %c0_126] : memref<1x8x32xbf16, #tpu.memory_space<vmem>>, vector<1x8x32xbf16>
      %203 = vector.shape_cast %202 : vector<1x8x32xbf16> to vector<8x32xbf16>
      %204 = vector.shape_cast %201 : vector<8x32xbf16> to vector<1x8x32xbf16>
      tpu.vector_store %arg8[%c0_124, %c0_125, %c0_126], %204 {strides = array<i32>} : memref<1x8x32xbf16, #tpu.memory_space<vmem>>, vector<1x8x32xbf16>,
    } else {
    }
    return
  }
  func.func @transform_0(%arg0: i32, %arg1: i32, %arg2: i32) -> (i32, i32, i32) {
    %c0_i32 = arith.constant 0 : i32
    %c0_i32_0 = arith.constant 0 : i32
    return %arg0, %arg1, %c0_i32 : i32, i32, i32
  }
  func.func @transform_1(%arg0: i32, %arg1: i32, %arg2: i32) -> (i32, i32, i32) {
    %c0_i32 = arith.constant 0 : i32
    %c0_i32_0 = arith.constant 0 : i32
    return %arg0, %arg2, %c0_i32 : i32, i32, i32
  }
  func.func @transform_2(%arg0: i32, %arg1: i32, %arg2: i32) -> (i32, i32, i32) {
    %c0_i32 = arith.constant 0 : i32
    %c0_i32_0 = arith.constant 0 : i32
    return %arg0, %arg2, %c0_i32 : i32, i32, i32
  }
  func.func @transform_3(%arg0: i32, %arg1: i32, %arg2: i32) -> (i32, i32, i32) {
    %c0_i32 = arith.constant 0 : i32
    %c0_i32_0 = arith.constant 0 : i32
    return %arg0, %arg1, %c0_i32 : i32, i32, i32
  }
  func.func @transform_4(%arg0: i32, %arg1: i32, %arg2: i32) -> (i32, i32, i32) {
    %c0_i32 = arith.constant 0 : i32
    %c0_i32_0 = arith.constant 0 : i32
    return %arg0, %c0_i32, %arg2 : i32, i32, i32
  }
  func.func @transform_5(%arg0: i32, %arg1: i32, %arg2: i32) -> (i32, i32, i32) {
    %c0_i32 = arith.constant 0 : i32
    %c0_i32_0 = arith.constant 0 : i32
    return %arg0, %arg1, %c0_i32 : i32, i32, i32
  }
}

module attributes {stable_mosaic.version = 11 : i64} {
  func.func @_flash_attn_kernel(%arg0: i32, %arg1: i32, %arg2: i32, %arg3: memref<1x8x32xbf16, #tpu.memory_space<vmem>>, %arg4: memref<1x8x32xbf16, #tpu.memory_space<vmem>>, %arg5: memref<1x8x32xbf16, #tpu.memory_space<vmem>>, %arg6: memref<1x8x1xf32, #tpu.memory_space<vmem>>, %arg7: memref<1x1x8xf32, #tpu.memory_space<vmem>>, %arg8: memref<1x8x32xbf16, #tpu.memory_space<vmem>>, %arg9: memref<4x8x1xf32, #tpu.memory_space<vmem>>, %arg10: memref<4x8x1xf32, #tpu.memory_space<vmem>>, %arg11: memref<8x32xf32, #tpu.memory_space<vmem>>) attributes {dimension_semantics = [#tpu.dimension_semantics<parallel>, #tpu.dimension_semantics<parallel>, #tpu.dimension_semantics<arbitrary>], iteration_bounds = array<i64: 2, 1, 1>, scalar_prefetch = 0 : i64, scratch_operands = 3 : i64, tpu.core_type = #tpu.core_type<tc>, window_params = [{transform_indices = @transform_0, window_bounds = array<i64: 1, 8, 32>}, {transform_indices = @transform_1, window_bounds = array<i64: 1, 8, 32>}, {transform_indices = @transform_2, window_bounds = array<i64: 1, 8, 32>}, {transform_indices = @transform_3, window_bounds = array<i64: 1, 8, 1>}, {transform_indices = @transform_4, window_bounds = array<i64: 1, 1, 8>}, {transform_indices = @transform_5, window_bounds = array<i64: 1, 8, 32>}]} {
    %c0_i32 = arith.constant 0 : i32
    %0 = arith.cmpi eq, %arg2, %c0_i32 : i32
    %1 = arith.extui %0 : i1 to i32
    %c0_i32_0 = arith.constant 0 : i32
    %2 = arith.cmpi ne, %1, %c0_i32_0 : i32
    scf.if %2 {
      %cst_91 = arith.constant 0xFF800000 : f32
      %162 = vector.broadcast %cst_91 : f32 to vector<4x8x1xf32>
      %c0_92 = arith.constant 0 : index
      %c0_93 = arith.constant 0 : index
      %c0_94 = arith.constant 0 : index
      %163 = vector.load %arg9[%c0_92, %c0_93, %c0_94] : memref<4x8x1xf32, #tpu.memory_space<vmem>>, vector<4x8x1xf32>
      tpu.vector_store %arg9[%c0_92, %c0_93, %c0_94], %162 {strides = array<i32>} : memref<4x8x1xf32, #tpu.memory_space<vmem>>, vector<4x8x1xf32>,
      %cst_95 = arith.constant 0.000000e+00 : f32
      %164 = vector.broadcast %cst_95 : f32 to vector<4x8x1xf32>
      %c0_96 = arith.constant 0 : index
      %c0_97 = arith.constant 0 : index
      %c0_98 = arith.constant 0 : index
      %165 = vector.load %arg10[%c0_96, %c0_97, %c0_98] : memref<4x8x1xf32, #tpu.memory_space<vmem>>, vector<4x8x1xf32>
      tpu.vector_store %arg10[%c0_96, %c0_97, %c0_98], %164 {strides = array<i32>} : memref<4x8x1xf32, #tpu.memory_space<vmem>>, vector<4x8x1xf32>,
      %cst_99 = arith.constant 0.000000e+00 : f32
      %166 = vector.broadcast %cst_99 : f32 to vector<8x32xf32>
      %c0_100 = arith.constant 0 : index
      %c0_101 = arith.constant 0 : index
      %167 = vector.load %arg11[%c0_100, %c0_101] : memref<8x32xf32, #tpu.memory_space<vmem>>, vector<8x32xf32>
      tpu.vector_store %arg11[%c0_100, %c0_101], %166 {strides = array<i32>} : memref<8x32xf32, #tpu.memory_space<vmem>>, vector<8x32xf32>,
    } else {
    }
    %c0 = arith.constant 0 : index
    %c0_1 = arith.constant 0 : index
    %c0_2 = arith.constant 0 : index
    %3 = vector.load %arg3[%c0, %c0_1, %c0_2] : memref<1x8x32xbf16, #tpu.memory_space<vmem>>, vector<1x8x32xbf16>
    %4 = vector.shape_cast %3 : vector<1x8x32xbf16> to vector<8x32xbf16>
    %c0_3 = arith.constant 0 : index
    %c0_4 = arith.constant 0 : index
    %c0_5 = arith.constant 0 : index
    %5 = vector.load %arg4[%c0_3, %c0_4, %c0_5] : memref<1x8x32xbf16, #tpu.memory_space<vmem>>, vector<1x8x32xbf16>
    %6 = vector.shape_cast %5 : vector<1x8x32xbf16> to vector<8x32xbf16>
    %c0_6 = arith.constant 0 : index
    %c0_7 = arith.constant 0 : index
    %c0_8 = arith.constant 0 : index
    %7 = vector.load %arg5[%c0_6, %c0_7, %c0_8] : memref<1x8x32xbf16, #tpu.memory_space<vmem>>, vector<1x8x32xbf16>
    %8 = vector.shape_cast %7 : vector<1x8x32xbf16> to vector<8x32xbf16>
    %c0_9 = arith.constant 0 : index
    %c0_10 = arith.constant 0 : index
    %c0_11 = arith.constant 0 : index
    %9 = vector.load %arg7[%c0_9, %c0_10, %c0_11] : memref<1x1x8xf32, #tpu.memory_space<vmem>>, vector<1x1x8xf32>
    %10 = vector.shape_cast %9 : vector<1x1x8xf32> to vector<1x8xf32>
    %11 = vector.extract_strided_slice %4 {offsets = [0, 0], sizes = [8, 8], strides = [1, 1]} : vector<8x32xbf16> to vector<8x8xbf16>
    %12 = vector.extract_strided_slice %6 {offsets = [0, 0], sizes = [8, 8], strides = [1, 1]} : vector<8x32xbf16> to vector<8x8xbf16>
    %cst = arith.constant dense<0.000000e+00> : vector<8x8xf32>
    %13 = tpu.matmul %11, %12, %cst {dimension_numbers = #tpu.dot_dimension_numbers<[1], [1], [0], [0], [0, 0, 1, 0], [], []>} : vector<8x8xbf16>, vector<8x8xbf16>, vector<8x8xf32> -> vector<8x8xf32>
    %cst_12 = arith.constant 0.353553385 : f32
    %14 = vector.broadcast %cst_12 : f32 to vector<8x8xf32>
    %15 = arith.mulf %13, %14 : vector<8x8xf32>
    %16 = vector.broadcast %10 : vector<1x8xf32> to vector<8x8xf32>
    %17 = arith.addf %15, %16 : vector<8x8xf32>
    %c0_13 = arith.constant 0 : index
    %c0_14 = arith.constant 0 : index
    %c0_15 = arith.constant 0 : index
    %18 = vector.load %arg9[%c0_13, %c0_14, %c0_15] : memref<4x8x1xf32, #tpu.memory_space<vmem>>, vector<1x8x1xf32>
    %19 = vector.shape_cast %18 : vector<1x8x1xf32> to vector<8x1xf32>
    %cst_16 = arith.constant dense<0xFF800000> : vector<8xf32>
    %20 = vector.multi_reduction <maximumf>, %17, %cst_16 [1] : vector<8x8xf32> to vector<8xf32>
    %21 = vector.shape_cast %20 : vector<8xf32> to vector<8x1xf32>
    %22 = arith.maximumf %19, %21 : vector<8x1xf32>
    %23 = arith.subf %19, %22 : vector<8x1xf32>
    %24 = math.exp %23 : vector<8x1xf32>
    %25 = vector.broadcast %22 : vector<8x1xf32> to vector<8x8xf32>
    %26 = arith.subf %17, %25 : vector<8x8xf32>
    %27 = math.exp %26 : vector<8x8xf32>
    %c0_17 = arith.constant 0 : index
    %c0_18 = arith.constant 0 : index
    %c0_19 = arith.constant 0 : index
    %28 = vector.load %arg10[%c0_17, %c0_18, %c0_19] : memref<4x8x1xf32, #tpu.memory_space<vmem>>, vector<1x8x1xf32>
    %29 = vector.shape_cast %28 : vector<1x8x1xf32> to vector<8x1xf32>
    %30 = arith.mulf %24, %29 : vector<8x1xf32>
    %cst_20 = arith.constant dense<0.000000e+00> : vector<8xf32>
    %31 = vector.multi_reduction <add>, %27, %cst_20 [1] : vector<8x8xf32> to vector<8xf32>
    %32 = vector.shape_cast %31 : vector<8xf32> to vector<8x1xf32>
    %33 = arith.addf %30, %32 : vector<8x1xf32>
    %c0_21 = arith.constant 0 : index
    %c0_22 = arith.constant 0 : index
    %c0_23 = arith.constant 0 : index
    %34 = vector.load %arg10[%c0_21, %c0_22, %c0_23] : memref<4x8x1xf32, #tpu.memory_space<vmem>>, vector<1x8x1xf32>
    %35 = vector.shape_cast %34 : vector<1x8x1xf32> to vector<8x1xf32>
    %36 = vector.shape_cast %33 : vector<8x1xf32> to vector<1x8x1xf32>
    tpu.vector_store %arg10[%c0_21, %c0_22, %c0_23], %36 {strides = array<i32>} : memref<4x8x1xf32, #tpu.memory_space<vmem>>, vector<1x8x1xf32>,
    %c0_24 = arith.constant 0 : index
    %c0_25 = arith.constant 0 : index
    %37 = vector.load %arg11[%c0_24, %c0_25] : memref<8x32xf32, #tpu.memory_space<vmem>>, vector<8x8xf32>
    %38 = vector.broadcast %24 : vector<8x1xf32> to vector<8x8xf32>
    %39 = arith.mulf %38, %37 : vector<8x8xf32>
    %40 = arith.truncf %27 : vector<8x8xf32> to vector<8x8xbf16>
    %41 = vector.extract_strided_slice %8 {offsets = [0, 0], sizes = [8, 8], strides = [1, 1]} : vector<8x32xbf16> to vector<8x8xbf16>
    %cst_26 = arith.constant dense<0.000000e+00> : vector<8x8xf32>
    %42 = tpu.matmul %40, %41, %cst_26 {dimension_numbers = #tpu.dot_dimension_numbers<[1], [0], [0], [1], [0, 0, 1, 1], [], []>} : vector<8x8xbf16>, vector<8x8xbf16>, vector<8x8xf32> -> vector<8x8xf32>
    %43 = arith.addf %39, %42 : vector<8x8xf32>
    %c0_27 = arith.constant 0 : index
    %c0_28 = arith.constant 0 : index
    %44 = vector.load %arg11[%c0_27, %c0_28] : memref<8x32xf32, #tpu.memory_space<vmem>>, vector<8x8xf32>
    tpu.vector_store %arg11[%c0_27, %c0_28], %43 {strides = array<i32>} : memref<8x32xf32, #tpu.memory_space<vmem>>, vector<8x8xf32>,
    %c0_29 = arith.constant 0 : index
    %c0_30 = arith.constant 0 : index
    %c0_31 = arith.constant 0 : index
    %45 = vector.load %arg9[%c0_29, %c0_30, %c0_31] : memref<4x8x1xf32, #tpu.memory_space<vmem>>, vector<1x8x1xf32>
    %46 = vector.shape_cast %45 : vector<1x8x1xf32> to vector<8x1xf32>
    %47 = vector.shape_cast %22 : vector<8x1xf32> to vector<1x8x1xf32>
    tpu.vector_store %arg9[%c0_29, %c0_30, %c0_31], %47 {strides = array<i32>} : memref<4x8x1xf32, #tpu.memory_space<vmem>>, vector<1x8x1xf32>,
    %48 = vector.extract_strided_slice %4 {offsets = [0, 8], sizes = [8, 8], strides = [1, 1]} : vector<8x32xbf16> to vector<8x8xbf16>
    %49 = vector.extract_strided_slice %6 {offsets = [0, 8], sizes = [8, 8], strides = [1, 1]} : vector<8x32xbf16> to vector<8x8xbf16>
    %cst_32 = arith.constant dense<0.000000e+00> : vector<8x8xf32>
    %50 = tpu.matmul %48, %49, %cst_32 {dimension_numbers = #tpu.dot_dimension_numbers<[1], [1], [0], [0], [0, 0, 1, 0], [], []>} : vector<8x8xbf16>, vector<8x8xbf16>, vector<8x8xf32> -> vector<8x8xf32>
    %cst_33 = arith.constant 0.353553385 : f32
    %51 = vector.broadcast %cst_33 : f32 to vector<8x8xf32>
    %52 = arith.mulf %50, %51 : vector<8x8xf32>
    %53 = vector.broadcast %10 : vector<1x8xf32> to vector<8x8xf32>
    %54 = arith.addf %52, %53 : vector<8x8xf32>
    %c1 = arith.constant 1 : index
    %c0_34 = arith.constant 0 : index
    %c0_35 = arith.constant 0 : index
    %55 = vector.load %arg9[%c1, %c0_34, %c0_35] : memref<4x8x1xf32, #tpu.memory_space<vmem>>, vector<1x8x1xf32>
    %56 = vector.shape_cast %55 : vector<1x8x1xf32> to vector<8x1xf32>
    %cst_36 = arith.constant dense<0xFF800000> : vector<8xf32>
    %57 = vector.multi_reduction <maximumf>, %54, %cst_36 [1] : vector<8x8xf32> to vector<8xf32>
    %58 = vector.shape_cast %57 : vector<8xf32> to vector<8x1xf32>
    %59 = arith.maximumf %56, %58 : vector<8x1xf32>
    %60 = arith.subf %56, %59 : vector<8x1xf32>
    %61 = math.exp %60 : vector<8x1xf32>
    %62 = vector.broadcast %59 : vector<8x1xf32> to vector<8x8xf32>
    %63 = arith.subf %54, %62 : vector<8x8xf32>
    %64 = math.exp %63 : vector<8x8xf32>
    %c1_37 = arith.constant 1 : index
    %c0_38 = arith.constant 0 : index
    %c0_39 = arith.constant 0 : index
    %65 = vector.load %arg10[%c1_37, %c0_38, %c0_39] : memref<4x8x1xf32, #tpu.memory_space<vmem>>, vector<1x8x1xf32>
    %66 = vector.shape_cast %65 : vector<1x8x1xf32> to vector<8x1xf32>
    %67 = arith.mulf %61, %66 : vector<8x1xf32>
    %cst_40 = arith.constant dense<0.000000e+00> : vector<8xf32>
    %68 = vector.multi_reduction <add>, %64, %cst_40 [1] : vector<8x8xf32> to vector<8xf32>
    %69 = vector.shape_cast %68 : vector<8xf32> to vector<8x1xf32>
    %70 = arith.addf %67, %69 : vector<8x1xf32>
    %c1_41 = arith.constant 1 : index
    %c0_42 = arith.constant 0 : index
    %c0_43 = arith.constant 0 : index
    %71 = vector.load %arg10[%c1_41, %c0_42, %c0_43] : memref<4x8x1xf32, #tpu.memory_space<vmem>>, vector<1x8x1xf32>
    %72 = vector.shape_cast %71 : vector<1x8x1xf32> to vector<8x1xf32>
    %73 = vector.shape_cast %70 : vector<8x1xf32> to vector<1x8x1xf32>
    tpu.vector_store %arg10[%c1_41, %c0_42, %c0_43], %73 {strides = array<i32>} : memref<4x8x1xf32, #tpu.memory_space<vmem>>, vector<1x8x1xf32>,
    %c0_44 = arith.constant 0 : index
    %c8 = arith.constant 8 : index
    %74 = vector.load %arg11[%c0_44, %c8] : memref<8x32xf32, #tpu.memory_space<vmem>>, vector<8x8xf32>
    %75 = vector.broadcast %61 : vector<8x1xf32> to vector<8x8xf32>
    %76 = arith.mulf %75, %74 : vector<8x8xf32>
    %77 = arith.truncf %64 : vector<8x8xf32> to vector<8x8xbf16>
    %78 = vector.extract_strided_slice %8 {offsets = [0, 8], sizes = [8, 8], strides = [1, 1]} : vector<8x32xbf16> to vector<8x8xbf16>
    %cst_45 = arith.constant dense<0.000000e+00> : vector<8x8xf32>
    %79 = tpu.matmul %77, %78, %cst_45 {dimension_numbers = #tpu.dot_dimension_numbers<[1], [0], [0], [1], [0, 0, 1, 1], [], []>} : vector<8x8xbf16>, vector<8x8xbf16>, vector<8x8xf32> -> vector<8x8xf32>
    %80 = arith.addf %76, %79 : vector<8x8xf32>
    %c0_46 = arith.constant 0 : index
    %c8_47 = arith.constant 8 : index
    %81 = vector.load %arg11[%c0_46, %c8_47] : memref<8x32xf32, #tpu.memory_space<vmem>>, vector<8x8xf32>
    tpu.vector_store %arg11[%c0_46, %c8_47], %80 {strides = array<i32>} : memref<8x32xf32, #tpu.memory_space<vmem>>, vector<8x8xf32>,
    %c1_48 = arith.constant 1 : index
    %c0_49 = arith.constant 0 : index
    %c0_50 = arith.constant 0 : index
    %82 = vector.load %arg9[%c1_48, %c0_49, %c0_50] : memref<4x8x1xf32, #tpu.memory_space<vmem>>, vector<1x8x1xf32>
    %83 = vector.shape_cast %82 : vector<1x8x1xf32> to vector<8x1xf32>
    %84 = vector.shape_cast %59 : vector<8x1xf32> to vector<1x8x1xf32>
    tpu.vector_store %arg9[%c1_48, %c0_49, %c0_50], %84 {strides = array<i32>} : memref<4x8x1xf32, #tpu.memory_space<vmem>>, vector<1x8x1xf32>,
    %85 = vector.extract_strided_slice %4 {offsets = [0, 16], sizes = [8, 8], strides = [1, 1]} : vector<8x32xbf16> to vector<8x8xbf16>
    %86 = vector.extract_strided_slice %6 {offsets = [0, 16], sizes = [8, 8], strides = [1, 1]} : vector<8x32xbf16> to vector<8x8xbf16>
    %cst_51 = arith.constant dense<0.000000e+00> : vector<8x8xf32>
    %87 = tpu.matmul %85, %86, %cst_51 {dimension_numbers = #tpu.dot_dimension_numbers<[1], [1], [0], [0], [0, 0, 1, 0], [], []>} : vector<8x8xbf16>, vector<8x8xbf16>, vector<8x8xf32> -> vector<8x8xf32>
    %cst_52 = arith.constant 0.353553385 : f32
    %88 = vector.broadcast %cst_52 : f32 to vector<8x8xf32>
    %89 = arith.mulf %87, %88 : vector<8x8xf32>
    %90 = vector.broadcast %10 : vector<1x8xf32> to vector<8x8xf32>
    %91 = arith.addf %89, %90 : vector<8x8xf32>
    %c2 = arith.constant 2 : index
    %c0_53 = arith.constant 0 : index
    %c0_54 = arith.constant 0 : index
    %92 = vector.load %arg9[%c2, %c0_53, %c0_54] : memref<4x8x1xf32, #tpu.memory_space<vmem>>, vector<1x8x1xf32>
    %93 = vector.shape_cast %92 : vector<1x8x1xf32> to vector<8x1xf32>
    %cst_55 = arith.constant dense<0xFF800000> : vector<8xf32>
    %94 = vector.multi_reduction <maximumf>, %91, %cst_55 [1] : vector<8x8xf32> to vector<8xf32>
    %95 = vector.shape_cast %94 : vector<8xf32> to vector<8x1xf32>
    %96 = arith.maximumf %93, %95 : vector<8x1xf32>
    %97 = arith.subf %93, %96 : vector<8x1xf32>
    %98 = math.exp %97 : vector<8x1xf32>
    %99 = vector.broadcast %96 : vector<8x1xf32> to vector<8x8xf32>
    %100 = arith.subf %91, %99 : vector<8x8xf32>
    %101 = math.exp %100 : vector<8x8xf32>
    %c2_56 = arith.constant 2 : index
    %c0_57 = arith.constant 0 : index
    %c0_58 = arith.constant 0 : index
    %102 = vector.load %arg10[%c2_56, %c0_57, %c0_58] : memref<4x8x1xf32, #tpu.memory_space<vmem>>, vector<1x8x1xf32>
    %103 = vector.shape_cast %102 : vector<1x8x1xf32> to vector<8x1xf32>
    %104 = arith.mulf %98, %103 : vector<8x1xf32>
    %cst_59 = arith.constant dense<0.000000e+00> : vector<8xf32>
    %105 = vector.multi_reduction <add>, %101, %cst_59 [1] : vector<8x8xf32> to vector<8xf32>
    %106 = vector.shape_cast %105 : vector<8xf32> to vector<8x1xf32>
    %107 = arith.addf %104, %106 : vector<8x1xf32>
    %c2_60 = arith.constant 2 : index
    %c0_61 = arith.constant 0 : index
    %c0_62 = arith.constant 0 : index
    %108 = vector.load %arg10[%c2_60, %c0_61, %c0_62] : memref<4x8x1xf32, #tpu.memory_space<vmem>>, vector<1x8x1xf32>
    %109 = vector.shape_cast %108 : vector<1x8x1xf32> to vector<8x1xf32>
    %110 = vector.shape_cast %107 : vector<8x1xf32> to vector<1x8x1xf32>
    tpu.vector_store %arg10[%c2_60, %c0_61, %c0_62], %110 {strides = array<i32>} : memref<4x8x1xf32, #tpu.memory_space<vmem>>, vector<1x8x1xf32>,
    %c0_63 = arith.constant 0 : index
    %c16 = arith.constant 16 : index
    %111 = vector.load %arg11[%c0_63, %c16] : memref<8x32xf32, #tpu.memory_space<vmem>>, vector<8x8xf32>
    %112 = vector.broadcast %98 : vector<8x1xf32> to vector<8x8xf32>
    %113 = arith.mulf %112, %111 : vector<8x8xf32>
    %114 = arith.truncf %101 : vector<8x8xf32> to vector<8x8xbf16>
    %115 = vector.extract_strided_slice %8 {offsets = [0, 16], sizes = [8, 8], strides = [1, 1]} : vector<8x32xbf16> to vector<8x8xbf16>
    %cst_64 = arith.constant dense<0.000000e+00> : vector<8x8xf32>
    %116 = tpu.matmul %114, %115, %cst_64 {dimension_numbers = #tpu.dot_dimension_numbers<[1], [0], [0], [1], [0, 0, 1, 1], [], []>} : vector<8x8xbf16>, vector<8x8xbf16>, vector<8x8xf32> -> vector<8x8xf32>
    %117 = arith.addf %113, %116 : vector<8x8xf32>
    %c0_65 = arith.constant 0 : index
    %c16_66 = arith.constant 16 : index
    %118 = vector.load %arg11[%c0_65, %c16_66] : memref<8x32xf32, #tpu.memory_space<vmem>>, vector<8x8xf32>
    tpu.vector_store %arg11[%c0_65, %c16_66], %117 {strides = array<i32>} : memref<8x32xf32, #tpu.memory_space<vmem>>, vector<8x8xf32>,
    %c2_67 = arith.constant 2 : index
    %c0_68 = arith.constant 0 : index
    %c0_69 = arith.constant 0 : index
    %119 = vector.load %arg9[%c2_67, %c0_68, %c0_69] : memref<4x8x1xf32, #tpu.memory_space<vmem>>, vector<1x8x1xf32>
    %120 = vector.shape_cast %119 : vector<1x8x1xf32> to vector<8x1xf32>
    %121 = vector.shape_cast %96 : vector<8x1xf32> to vector<1x8x1xf32>
    tpu.vector_store %arg9[%c2_67, %c0_68, %c0_69], %121 {strides = array<i32>} : memref<4x8x1xf32, #tpu.memory_space<vmem>>, vector<1x8x1xf32>,
    %122 = vector.extract_strided_slice %4 {offsets = [0, 24], sizes = [8, 8], strides = [1, 1]} : vector<8x32xbf16> to vector<8x8xbf16>
    %123 = vector.extract_strided_slice %6 {offsets = [0, 24], sizes = [8, 8], strides = [1, 1]} : vector<8x32xbf16> to vector<8x8xbf16>
    %cst_70 = arith.constant dense<0.000000e+00> : vector<8x8xf32>
    %124 = tpu.matmul %122, %123, %cst_70 {dimension_numbers = #tpu.dot_dimension_numbers<[1], [1], [0], [0], [0, 0, 1, 0], [], []>} : vector<8x8xbf16>, vector<8x8xbf16>, vector<8x8xf32> -> vector<8x8xf32>
    %cst_71 = arith.constant 0.353553385 : f32
    %125 = vector.broadcast %cst_71 : f32 to vector<8x8xf32>
    %126 = arith.mulf %124, %125 : vector<8x8xf32>
    %127 = vector.broadcast %10 : vector<1x8xf32> to vector<8x8xf32>
    %128 = arith.addf %126, %127 : vector<8x8xf32>
    %c3 = arith.constant 3 : index
    %c0_72 = arith.constant 0 : index
    %c0_73 = arith.constant 0 : index
    %129 = vector.load %arg9[%c3, %c0_72, %c0_73] : memref<4x8x1xf32, #tpu.memory_space<vmem>>, vector<1x8x1xf32>
    %130 = vector.shape_cast %129 : vector<1x8x1xf32> to vector<8x1xf32>
    %cst_74 = arith.constant dense<0xFF800000> : vector<8xf32>
    %131 = vector.multi_reduction <maximumf>, %128, %cst_74 [1] : vector<8x8xf32> to vector<8xf32>
    %132 = vector.shape_cast %131 : vector<8xf32> to vector<8x1xf32>
    %133 = arith.maximumf %130, %132 : vector<8x1xf32>
    %134 = arith.subf %130, %133 : vector<8x1xf32>
    %135 = math.exp %134 : vector<8x1xf32>
    %136 = vector.broadcast %133 : vector<8x1xf32> to vector<8x8xf32>
    %137 = arith.subf %128, %136 : vector<8x8xf32>
    %138 = math.exp %137 : vector<8x8xf32>
    %c3_75 = arith.constant 3 : index
    %c0_76 = arith.constant 0 : index
    %c0_77 = arith.constant 0 : index
    %139 = vector.load %arg10[%c3_75, %c0_76, %c0_77] : memref<4x8x1xf32, #tpu.memory_space<vmem>>, vector<1x8x1xf32>
    %140 = vector.shape_cast %139 : vector<1x8x1xf32> to vector<8x1xf32>
    %141 = arith.mulf %135, %140 : vector<8x1xf32>
    %cst_78 = arith.constant dense<0.000000e+00> : vector<8xf32>
    %142 = vector.multi_reduction <add>, %138, %cst_78 [1] : vector<8x8xf32> to vector<8xf32>
    %143 = vector.shape_cast %142 : vector<8xf32> to vector<8x1xf32>
    %144 = arith.addf %141, %143 : vector<8x1xf32>
    %c3_79 = arith.constant 3 : index
    %c0_80 = arith.constant 0 : index
    %c0_81 = arith.constant 0 : index
    %145 = vector.load %arg10[%c3_79, %c0_80, %c0_81] : memref<4x8x1xf32, #tpu.memory_space<vmem>>, vector<1x8x1xf32>
    %146 = vector.shape_cast %145 : vector<1x8x1xf32> to vector<8x1xf32>
    %147 = vector.shape_cast %144 : vector<8x1xf32> to vector<1x8x1xf32>
    tpu.vector_store %arg10[%c3_79, %c0_80, %c0_81], %147 {strides = array<i32>} : memref<4x8x1xf32, #tpu.memory_space<vmem>>, vector<1x8x1xf32>,
    %c0_82 = arith.constant 0 : index
    %c24 = arith.constant 24 : index
    %148 = vector.load %arg11[%c0_82, %c24] : memref<8x32xf32, #tpu.memory_space<vmem>>, vector<8x8xf32>
    %149 = vector.broadcast %135 : vector<8x1xf32> to vector<8x8xf32>
    %150 = arith.mulf %149, %148 : vector<8x8xf32>
    %151 = arith.truncf %138 : vector<8x8xf32> to vector<8x8xbf16>
    %152 = vector.extract_strided_slice %8 {offsets = [0, 24], sizes = [8, 8], strides = [1, 1]} : vector<8x32xbf16> to vector<8x8xbf16>
    %cst_83 = arith.constant dense<0.000000e+00> : vector<8x8xf32>
    %153 = tpu.matmul %151, %152, %cst_83 {dimension_numbers = #tpu.dot_dimension_numbers<[1], [0], [0], [1], [0, 0, 1, 1], [], []>} : vector<8x8xbf16>, vector<8x8xbf16>, vector<8x8xf32> -> vector<8x8xf32>
    %154 = arith.addf %150, %153 : vector<8x8xf32>
    %c0_84 = arith.constant 0 : index
    %c24_85 = arith.constant 24 : index
    %155 = vector.load %arg11[%c0_84, %c24_85] : memref<8x32xf32, #tpu.memory_space<vmem>>, vector<8x8xf32>
    tpu.vector_store %arg11[%c0_84, %c24_85], %154 {strides = array<i32>} : memref<8x32xf32, #tpu.memory_space<vmem>>, vector<8x8xf32>,
    %c3_86 = arith.constant 3 : index
    %c0_87 = arith.constant 0 : index
    %c0_88 = arith.constant 0 : index
    %156 = vector.load %arg9[%c3_86, %c0_87, %c0_88] : memref<4x8x1xf32, #tpu.memory_space<vmem>>, vector<1x8x1xf32>
    %157 = vector.shape_cast %156 : vector<1x8x1xf32> to vector<8x1xf32>
    %158 = vector.shape_cast %133 : vector<8x1xf32> to vector<1x8x1xf32>
    tpu.vector_store %arg9[%c3_86, %c0_87, %c0_88], %158 {strides = array<i32>} : memref<4x8x1xf32, #tpu.memory_space<vmem>>, vector<1x8x1xf32>,
    %c0_i32_89 = arith.constant 0 : i32
    %159 = arith.cmpi eq, %arg2, %c0_i32_89 : i32
    %160 = arith.extui %159 : i1 to i32
    %c0_i32_90 = arith.constant 0 : i32
    %161 = arith.cmpi ne, %160, %c0_i32_90 : i32
    scf.if %161 {
      %c0_91 = arith.constant 0 : index
      %c0_92 = arith.constant 0 : index
      %162 = vector.load %arg11[%c0_91, %c0_92] : memref<8x32xf32, #tpu.memory_space<vmem>>, vector<8x8xf32>
      %c0_93 = arith.constant 0 : index
      %c0_94 = arith.constant 0 : index
      %c0_95 = arith.constant 0 : index
      %163 = vector.load %arg10[%c0_93, %c0_94, %c0_95] : memref<4x8x1xf32, #tpu.memory_space<vmem>>, vector<1x8x1xf32>
      %164 = vector.shape_cast %163 : vector<1x8x1xf32> to vector<8x1xf32>
      %165 = tpu.reciprocal %164 {approx = true} : vector<8x1xf32> -> vector<8x1xf32>
      %166 = vector.broadcast %165 : vector<8x1xf32> to vector<8x8xf32>
      %167 = arith.mulf %162, %166 : vector<8x8xf32>
      %c0_96 = arith.constant 0 : index
      %c0_97 = arith.constant 0 : index
      %168 = vector.load %arg11[%c0_96, %c0_97] : memref<8x32xf32, #tpu.memory_space<vmem>>, vector<8x8xf32>
      tpu.vector_store %arg11[%c0_96, %c0_97], %167 {strides = array<i32>} : memref<8x32xf32, #tpu.memory_space<vmem>>, vector<8x8xf32>,
      %c0_98 = arith.constant 0 : index
      %c8_99 = arith.constant 8 : index
      %169 = vector.load %arg11[%c0_98, %c8_99] : memref<8x32xf32, #tpu.memory_space<vmem>>, vector<8x8xf32>
      %c1_100 = arith.constant 1 : index
      %c0_101 = arith.constant 0 : index
      %c0_102 = arith.constant 0 : index
      %170 = vector.load %arg10[%c1_100, %c0_101, %c0_102] : memref<4x8x1xf32, #tpu.memory_space<vmem>>, vector<1x8x1xf32>
      %171 = vector.shape_cast %170 : vector<1x8x1xf32> to vector<8x1xf32>
      %172 = tpu.reciprocal %171 {approx = true} : vector<8x1xf32> -> vector<8x1xf32>
      %173 = vector.broadcast %172 : vector<8x1xf32> to vector<8x8xf32>
      %174 = arith.mulf %169, %173 : vector<8x8xf32>
      %c0_103 = arith.constant 0 : index
      %c8_104 = arith.constant 8 : index
      %175 = vector.load %arg11[%c0_103, %c8_104] : memref<8x32xf32, #tpu.memory_space<vmem>>, vector<8x8xf32>
      tpu.vector_store %arg11[%c0_103, %c8_104], %174 {strides = array<i32>} : memref<8x32xf32, #tpu.memory_space<vmem>>, vector<8x8xf32>,
      %c0_105 = arith.constant 0 : index
      %c16_106 = arith.constant 16 : index
      %176 = vector.load %arg11[%c0_105, %c16_106] : memref<8x32xf32, #tpu.memory_space<vmem>>, vector<8x8xf32>
      %c2_107 = arith.constant 2 : index
      %c0_108 = arith.constant 0 : index
      %c0_109 = arith.constant 0 : index
      %177 = vector.load %arg10[%c2_107, %c0_108, %c0_109] : memref<4x8x1xf32, #tpu.memory_space<vmem>>, vector<1x8x1xf32>
      %178 = vector.shape_cast %177 : vector<1x8x1xf32> to vector<8x1xf32>
      %179 = tpu.reciprocal %178 {approx = true} : vector<8x1xf32> -> vector<8x1xf32>
      %180 = vector.broadcast %179 : vector<8x1xf32> to vector<8x8xf32>
      %181 = arith.mulf %176, %180 : vector<8x8xf32>
      %c0_110 = arith.constant 0 : index
      %c16_111 = arith.constant 16 : index
      %182 = vector.load %arg11[%c0_110, %c16_111] : memref<8x32xf32, #tpu.memory_space<vmem>>, vector<8x8xf32>
      tpu.vector_store %arg11[%c0_110, %c16_111], %181 {strides = array<i32>} : memref<8x32xf32, #tpu.memory_space<vmem>>, vector<8x8xf32>,
      %c0_112 = arith.constant 0 : index
      %c24_113 = arith.constant 24 : index
      %183 = vector.load %arg11[%c0_112, %c24_113] : memref<8x32xf32, #tpu.memory_space<vmem>>, vector<8x8xf32>
      %c3_114 = arith.constant 3 : index
      %c0_115 = arith.constant 0 : index
      %c0_116 = arith.constant 0 : index
      %184 = vector.load %arg10[%c3_114, %c0_115, %c0_116] : memref<4x8x1xf32, #tpu.memory_space<vmem>>, vector<1x8x1xf32>
      %185 = vector.shape_cast %184 : vector<1x8x1xf32> to vector<8x1xf32>
      %186 = tpu.reciprocal %185 {approx = true} : vector<8x1xf32> -> vector<8x1xf32>
      %187 = vector.broadcast %186 : vector<8x1xf32> to vector<8x8xf32>
      %188 = arith.mulf %183, %187 : vector<8x8xf32>
      %c0_117 = arith.constant 0 : index
      %c24_118 = arith.constant 24 : index
      %189 = vector.load %arg11[%c0_117, %c24_118] : memref<8x32xf32, #tpu.memory_space<vmem>>, vector<8x8xf32>
      tpu.vector_store %arg11[%c0_117, %c24_118], %188 {strides = array<i32>} : memref<8x32xf32, #tpu.memory_space<vmem>>, vector<8x8xf32>,
      %c0_119 = arith.constant 0 : index
      %c0_120 = arith.constant 0 : index
      %190 = vector.load %arg11[%c0_119, %c0_120] : memref<8x32xf32, #tpu.memory_space<vmem>>, vector<8x32xf32>
      %191 = arith.truncf %190 : vector<8x32xf32> to vector<8x32xbf16>
      %c0_121 = arith.constant 0 : index
      %c0_122 = arith.constant 0 : index
      %c0_123 = arith.constant 0 : index
      %192 = vector.load %arg8[%c0_121, %c0_122, %c0_123] : memref<1x8x32xbf16, #tpu.memory_space<vmem>>, vector<1x8x32xbf16>
      %193 = vector.shape_cast %192 : vector<1x8x32xbf16> to vector<8x32xbf16>
      %194 = vector.shape_cast %191 : vector<8x32xbf16> to vector<1x8x32xbf16>
      tpu.vector_store %arg8[%c0_121, %c0_122, %c0_123], %194 {strides = array<i32>} : memref<1x8x32xbf16, #tpu.memory_space<vmem>>, vector<1x8x32xbf16>,
    } else {
    }
    return
  }
  func.func @transform_0(%arg0: i32, %arg1: i32, %arg2: i32) -> (i32, i32, i32) {
    %c0_i32 = arith.constant 0 : i32
    %c0_i32_0 = arith.constant 0 : i32
    return %arg0, %arg1, %c0_i32 : i32, i32, i32
  }
  func.func @transform_1(%arg0: i32, %arg1: i32, %arg2: i32) -> (i32, i32, i32) {
    %c0_i32 = arith.constant 0 : i32
    %c0_i32_0 = arith.constant 0 : i32
    return %arg0, %arg2, %c0_i32 : i32, i32, i32
  }
  func.func @transform_2(%arg0: i32, %arg1: i32, %arg2: i32) -> (i32, i32, i32) {
    %c0_i32 = arith.constant 0 : i32
    %c0_i32_0 = arith.constant 0 : i32
    return %arg0, %arg2, %c0_i32 : i32, i32, i32
  }
  func.func @transform_3(%arg0: i32, %arg1: i32, %arg2: i32) -> (i32, i32, i32) {
    %c0_i32 = arith.constant 0 : i32
    %c0_i32_0 = arith.constant 0 : i32
    return %arg0, %arg1, %c0_i32 : i32, i32, i32
  }
  func.func @transform_4(%arg0: i32, %arg1: i32, %arg2: i32) -> (i32, i32, i32) {
    %c0_i32 = arith.constant 0 : i32
    %c0_i32_0 = arith.constant 0 : i32
    return %arg0, %c0_i32, %arg2 : i32, i32, i32
  }
  func.func @transform_5(%arg0: i32, %arg1: i32, %arg2: i32) -> (i32, i32, i32) {
    %c0_i32 = arith.constant 0 : i32
    %c0_i32_0 = arith.constant 0 : i32
    return %arg0, %arg1, %c0_i32 : i32, i32, i32
  }
}

module attributes {stable_mosaic.version = 11 : i64} {
  func.func @_matmul_kernel(%arg0: i32, %arg1: i32, %arg2: i32, %arg3: memref<16x128xbf16, #tpu.memory_space<vmem>>, %arg4: memref<128x128xbf16, #tpu.memory_space<vmem>>, %arg5: memref<1x128xf32, #tpu.memory_space<vmem>>, %arg6: memref<16x128xf32, #tpu.memory_space<vmem>>, %arg7: memref<16x128xf32, #tpu.memory_space<vmem>>) attributes {dimension_semantics = [#tpu.dimension_semantics<parallel>, #tpu.dimension_semantics<parallel>, #tpu.dimension_semantics<arbitrary>], iteration_bounds = array<i64: 1, 1, 1>, scalar_prefetch = 0 : i64, scratch_operands = 1 : i64, tpu.core_type = #tpu.core_type<tc>, window_params = [{transform_indices = @transform_0, window_bounds = array<i64: 16, 128>}, {transform_indices = @transform_1, window_bounds = array<i64: 128, 128>}, {transform_indices = @transform_2, window_bounds = array<i64: 1, 128>}, {transform_indices = @transform_3, window_bounds = array<i64: 16, 128>}]} {
    %c0_i32 = arith.constant 0 : i32
    %0 = arith.cmpi eq, %arg2, %c0_i32 : i32
    %1 = arith.extui %0 : i1 to i32
    %c0_i32_0 = arith.constant 0 : i32
    %2 = arith.cmpi ne, %1, %c0_i32_0 : i32
    scf.if %2 {
      %cst_10 = arith.constant 0.000000e+00 : f32
      %12 = vector.broadcast %cst_10 : f32 to vector<16x128xf32>
      %c0_11 = arith.constant 0 : index
      %c0_12 = arith.constant 0 : index
      %13 = vector.load %arg7[%c0_11, %c0_12] : memref<16x128xf32, #tpu.memory_space<vmem>>, vector<16x128xf32>
      tpu.vector_store %arg7[%c0_11, %c0_12], %12 {strides = array<i32>} : memref<16x128xf32, #tpu.memory_space<vmem>>, vector<16x128xf32>,
    } else {
    }
    %c0 = arith.constant 0 : index
    %c0_1 = arith.constant 0 : index
    %3 = vector.load %arg7[%c0, %c0_1] : memref<16x128xf32, #tpu.memory_space<vmem>>, vector<16x128xf32>
    %c0_2 = arith.constant 0 : index
    %c0_3 = arith.constant 0 : index
    %4 = vector.load %arg3[%c0_2, %c0_3] : memref<16x128xbf16, #tpu.memory_space<vmem>>, vector<16x128xbf16>
    %c0_4 = arith.constant 0 : index
    %c0_5 = arith.constant 0 : index
    %5 = vector.load %arg4[%c0_4, %c0_5] : memref<128x128xbf16, #tpu.memory_space<vmem>>, vector<128x128xbf16>
    %cst = arith.constant dense<0.000000e+00> : vector<16x128xf32>
    %6 = tpu.matmul %4, %5, %cst {dimension_numbers = #tpu.dot_dimension_numbers<[1], [0], [0], [1], [0, 0, 1, 1], [], []>} : vector<16x128xbf16>, vector<128x128xbf16>, vector<16x128xf32> -> vector<16x128xf32>
    %7 = arith.addf %3, %6 : vector<16x128xf32>
    %c0_6 = arith.constant 0 : index
    %c0_7 = arith.constant 0 : index
    %8 = vector.load %arg7[%c0_6, %c0_7] : memref<16x128xf32, #tpu.memory_space<vmem>>, vector<16x128xf32>
    tpu.vector_store %arg7[%c0_6, %c0_7], %7 {strides = array<i32>} : memref<16x128xf32, #tpu.memory_space<vmem>>, vector<16x128xf32>,
    %c0_i32_8 = arith.constant 0 : i32
    %9 = arith.cmpi eq, %arg2, %c0_i32_8 : i32
    %10 = arith.extui %9 : i1 to i32
    %c0_i32_9 = arith.constant 0 : i32
    %11 = arith.cmpi ne, %10, %c0_i32_9 : i32
    scf.if %11 {
      %c0_10 = arith.constant 0 : index
      %c0_11 = arith.constant 0 : index
      %12 = vector.load %arg7[%c0_10, %c0_11] : memref<16x128xf32, #tpu.memory_space<vmem>>, vector<16x128xf32>
      %c0_12 = arith.constant 0 : index
      %c0_13 = arith.constant 0 : index
      %13 = vector.load %arg5[%c0_12, %c0_13] : memref<1x128xf32, #tpu.memory_space<vmem>>, vector<1x128xf32>
      %14 = vector.broadcast %13 : vector<1x128xf32> to vector<16x128xf32>
      %15 = arith.addf %12, %14 : vector<16x128xf32>
      %c0_14 = arith.constant 0 : index
      %c0_15 = arith.constant 0 : index
      %16 = vector.load %arg6[%c0_14, %c0_15] : memref<16x128xf32, #tpu.memory_space<vmem>>, vector<16x128xf32>
      tpu.vector_store %arg6[%c0_14, %c0_15], %15 {strides = array<i32>} : memref<16x128xf32, #tpu.memory_space<vmem>>, vector<16x128xf32>,
    } else {
    }
    return
  }
  func.func @transform_0(%arg0: i32, %arg1: i32, %arg2: i32) -> (i32, i32) {
    %c0_i32 = arith.constant 0 : i32
    return %arg0, %arg2 : i32, i32
  }
  func.func @transform_1(%arg0: i32, %arg1: i32, %arg2: i32) -> (i32, i32) {
    %c0_i32 = arith.constant 0 : i32
    return %arg2, %arg1 : i32, i32
  }
  func.func @transform_2(%arg0: i32, %arg1: i32, %arg2: i32) -> (i32, i32) {
    %c0_i32 = arith.constant 0 : i32
    %c0_i32_0 = arith.constant 0 : i32
    return %c0_i32, %arg1 : i32, i32
  }
  func.func @transform_3(%arg0: i32, %arg1: i32, %arg2: i32) -> (i32, i32) {
    %c0_i32 = arith.constant 0 : i32
    return %arg0, %arg1 : i32, i32
  }
}

</mosaic_0001>

<bundles_post_ra>
// kernel: transformer_forward.44
= control target key start
LH: loop header
LB: loop body
LE: loop exit
PB: predicated region body
PF: predicated region fallthrough
CT: control target
= control target key end

     0   :  { %vm27_vm0 = vcmask 261120   ;;  %v117_v10 = vmov 32.0   ;;  %vm93_vm6 = vcmask 257024   ;;  %s165_s0 = inlined_call_operand.vmem [shape: bf16[16,32], index: 0, kind: input, shape index: {}]   ;;  %s166_s1 = inlined_call_operand.vmem [shape: bf16[16,32], index: 1, kind: input, shape index: {}]   ;;  %s167_s2 = inlined_call_operand.vmem [shape: f32[1,32], index: 2, kind: input, shape index: {}]   ;;  %s168_s3 = inlined_call_operand.vmem [shape: f32[1,32], index: 3, kind: input, shape index: {}]   ;;  %s169_s4 = inlined_call_operand.vmem [shape: bf16[16,32], index: 4, kind: output, shape index: {}]  }
   0x1   :  { %v101_v0 = vld [vmem:[%s165_s0] sm:$0xff]   ;;  %111 = vrcp.f32 %v117_v10 }
   0x2   :  { %v105_v1 = vld [vmem:[%s166_s1] sm:$0xff]   ;;  %v102_v2 = vunpack.c.l.bf16 %v101_v0  ;;  %v103_v5 = vunpack.c.h.bf16 %v101_v0 }
   0x3   :  { %v106_v3 = vunpack.c.l.bf16 %v105_v1  ;;  %v107_v6 = vunpack.c.h.bf16 %v105_v1  ;;  %v109_v41 = vld [vmem:[%s167_s2] ss:$0 sm:$0xff] }
   0x4   :  { %v110_v44 = vld [vmem:[%s168_s3] ss:$0 sm:$0xff] }
   0x5   :  { %v25_v4 = vadd.f32 %v106_v3, %v102_v2  ;;  %v26_v8 = vadd.f32 %v107_v6, %v103_v5 }
   0x7   :  { %v28_v7 = vsel %vm27_vm0, %v25_v4, 0.0  ;;  %v31_v9 = vsel %vm27_vm0, %v26_v8, 0.0  ;;  %v112_v11 = vpop.eup %111 }
   0x8   :  { %29 = vadd.xlane.f32.xlu0 %v28_v7  ;;  %v35_v12 = vmul.f32 32.0, %v112_v11  ;;  %vm39_vm1 = vweird.f32 %v112_v11 }
   0xa   :  { %v36_v13 = vsub.f32 1.0, %v35_v12 }
   0xc   :  { %v37_v14 = vmul.f32 %v112_v11, %v36_v13 }
   0xe   :  { %v38_v15 = vadd.f32 %v112_v11, %v37_v14 }
  0x10   :  { %32 = vadd.xlane.f32.xlu0 %v31_v9  ;;  %v40_v16 = vsel %vm39_vm1, %v112_v11, %v38_v15 }
  0x7b   :  { %v30_v17 = vpop.xlane.xlu0 %29 }
  0x7c   :  { %v41_v18 = vmul.f32 %v40_v16, %v30_v17 }
  0x7e   :  { %v43_v19 = vsub.f32 %v25_v4, %v41_v18 }
  0x80   :  { %v45_v20 = vmul.f32 %v43_v19, %v43_v19 }
  0x82   :  { %v47_v21 = vsel %vm27_vm0, %v45_v20, 0.0 }
  0x83   :  { %48 = vadd.xlane.f32.xlu1 %v47_v21  ;;  %v33_v22 = vpop.xlane.xlu0 %32 }
  0x84   :  { %v42_v23 = vmul.f32 %v40_v16, %v33_v22 }
  0x86   :  { %v44_v24 = vsub.f32 %v26_v8, %v42_v23 }
  0x88   :  { %v46_v25 = vmul.f32 %v44_v24, %v44_v24 }
  0x8a   :  { %v50_v26 = vsel %vm27_vm0, %v46_v25, 0.0 }
  0x8b   :  { %51 = vadd.xlane.f32.xlu1 %v50_v26 }
  0xf6   :  { %v49_v27 = vpop.xlane.xlu1 %48 }
  0xf7   :  { %v53_v28 = vmul.f32 %v49_v27, %v40_v16 }
  0xf9   :  { %v55_v29 = vadd.f32 1e-05, %v53_v28 }
  0xfb   :  { %113 = vrsqrt.f32 %v55_v29  ;;  %vm63_vm3 = vweird.f32 %v55_v29 }
  0xfe   :  { %v52_v30 = vpop.xlane.xlu1 %51 }
  0xff   :  { %v54_v31 = vmul.f32 %v52_v30, %v40_v16 }
 0x101   :  { %v114_v32 = vpop.eup %113  ;;  %v56_v33 = vadd.f32 1e-05, %v54_v31 }
 0x102   :  { %v58_v34 = vmul.f32 %v114_v32, %v55_v29  ;;  %vm64_vm2 = vweird.f32 %v114_v32 }
 0x103   :  { %115 = vrsqrt.f32 %v56_v33  ;;  %vm65_vm4 = vmor %vm63_vm3, %vm64_vm2  ;;  %vm73_vm7 = vweird.f32 %v56_v33 }
 0x104   :  { %v59_v35 = vmul.f32 %v114_v32, %v58_v34 }
 0x106   :  { %v60_v36 = vmul.f32 0.5, %v59_v35 }
 0x108   :  { %v61_v37 = vsub.f32 1.5, %v60_v36 }
 0x109   :  { %v116_v38 = vpop.eup %115 }
 0x10a   :  { %v62_v39 = vmul.f32 %v114_v32, %v61_v37  ;;  %v68_v40 = vmul.f32 %v116_v38, %v56_v33  ;;  %vm74_vm5 = vweird.f32 %v116_v38 }
 0x10b   :  { %vm75_vm8 = vmor %vm73_vm7, %vm74_vm5 }
 0x10c   :  { %v66_v42 = vsel %vm65_vm4, %v114_v32, %v62_v39  ;;  %v69_v43 = vmul.f32 %v116_v38, %v68_v40 }
 0x10d   :  { %v77_v45 = vmul.f32 %v66_v42, %v43_v19 }
 0x10e   :  { %v70_v46 = vmul.f32 0.5, %v69_v43 }
 0x10f   :  { %v83_v47 = vmul.f32 %v109_v41, %v77_v45 }
 0x110   :  { %v71_v48 = vsub.f32 1.5, %v70_v46 }
 0x111   :  { %v89_v49 = vadd.f32 %v110_v44, %v83_v47 }
 0x112   :  { %v72_v50 = vmul.f32 %v116_v38, %v71_v48 }
 0x113   :  { %v91_v51 = vpack.c.bf16 %v89_v49, %v89_v49 }
 0x114   :  { %v76_v52 = vsel %vm75_vm8, %v116_v38, %v72_v50 }
 0x115   :  { %94 = vst.msk [vmem:[%s169_s4] sm:$0xf] %vm93_vm6, %v91_v51  ;;  %v78_v53 = vmul.f32 %v76_v52, %v44_v24 }
 0x117   :  { %v84_v54 = vmul.f32 %v109_v41, %v78_v53 }
 0x119   :  { %v90_v55 = vadd.f32 %v110_v44, %v84_v54 }
 0x11b   :  { %v92_v56 = vpack.c.bf16 %v90_v55, %v90_v55 }
 0x11d   :  { %95 = vst.msk [vmem:[%s169_s4 + $0x4] sm:$0xf] %vm93_vm6, %v92_v56 }

// kernel: transformer_forward.40
= control target key start
LH: loop header
LB: loop body
LE: loop exit
PB: predicated region body
PF: predicated region fallthrough
CT: control target
= control target key end

     0   :  { %s235_s1 = inlined_call_operand.vmem [shape: bf16[128,128], index: 1, kind: input, shape index: {}]   ;;  %s236_s2 = inlined_call_operand.vmem [shape: f32[1,128], index: 2, kind: input, shape index: {}]   ;;  %s237_s0 = inlined_call_operand.vmem [shape: bf16[16,128], index: 0, kind: input, shape index: {}]   ;;  %s238_s3 = inlined_call_operand.vmem [shape: bf16[16,128], index: 3, kind: output, shape index: {}]  }
   0x1   :  { %v175_v0 = vld [vmem:[%s235_s1 + $0x38] sm:$0xff]  ;;  %v174_v1 = vld [vmem:[%s235_s1 + $0x30] sm:$0xff]  ;;  %v173_v2 = vld [vmem:[%s235_s1 + $0x28] sm:$0xff] }
   0x2   :  { %94 = vmatpush.bf16.msra.mxu0 %v175_v0  ;;  %v172_v3 = vld [vmem:[%s235_s1 + $0x20] sm:$0xff]  ;;  %v171_v4 = vld [vmem:[%s235_s1 + $0x18] sm:$0xff]  ;;  %v170_v5 = vld [vmem:[%s235_s1 + $0x10] sm:$0xff] }
   0x3   :  { %v169_v6 = vld [vmem:[%s235_s1 + $0x8] sm:$0xff]  ;;  %v168_v7 = vld [vmem:[%s235_s1] sm:$0xff] }
   0x4   :  { %v167_v8 = vld [vmem:[%s237_s0] sm:$0xff] }
   0x5   :  { %v181_v10 = vld [vmem:[%s236_s2] ss:$0 sm:$0xff] }
   0x6   :  { %95 = vmatpush.bf16.msra.mxu0 %v174_v1 }
   0xa   :  { %96 = vmatpush.bf16.msra.mxu0 %v173_v2 }
   0xe   :  { %97 = vmatpush.bf16.msra.mxu0 %v172_v3 }
  0x12   :  { %98 = vmatpush.bf16.msra.mxu0 %v171_v4 }
  0x16   :  { %99 = vmatpush.bf16.msra.mxu0 %v170_v5 }
  0x1a   :  { %100 = vmatpush.bf16.msra.mxu0 %v169_v6 }
  0x1e   :  { %101 = vmatpush.bf16.msra.mxu0 %v168_v7 }
  0x21   :  { %102 = vmatmul.bf16.vlgmr.msra.gmra.mxu0 %v167_v8 }
  0x9e   :  { %v103_v9 = vpop.f32.mrf.mxu0 }
  0x9f   :  { %v121_v12 = vadd.f32 %v181_v10, %v103_v9 }
  0xa6   :  { %v105_v11 = vpop.f32.mrf.mxu0 }
  0xa7   :  { %v122_v13 = vadd.f32 %v181_v10, %v105_v11 }
  0xa9   :  { %v179_v14 = vpack.c.bf16 %v122_v13, %v121_v12 }
  0xab   :  { %180 = vst [vmem:[%s238_s3] sm:$0xff] %v179_v14  }

// kernel: transformer_forward.45
= control target key start
LH: loop header
LB: loop body
LE: loop exit
PB: predicated region body
PF: predicated region fallthrough
CT: control target
= control target key end

     0   :  { %s237_s1 = inlined_call_operand.vmem [shape: bf16[128,128], index: 1, kind: input, shape index: {}]   ;;  %s238_s2 = inlined_call_operand.vmem [shape: f32[1,128], index: 2, kind: input, shape index: {}]   ;;  %s239_s0 = inlined_call_operand.vmem [shape: bf16[16,128], index: 0, kind: input, shape index: {}]   ;;  %s240_s3 = inlined_call_operand.vmem [shape: bf16[16,128], index: 3, kind: output, shape index: {}]  }
   0x1   :  { %v177_v0 = vld [vmem:[%s237_s1 + $0x38] sm:$0xff]  ;;  %v176_v1 = vld [vmem:[%s237_s1 + $0x30] sm:$0xff]  ;;  %v175_v2 = vld [vmem:[%s237_s1 + $0x28] sm:$0xff] }
   0x2   :  { %94 = vmatpush.bf16.msra.mxu0 %v177_v0  ;;  %v174_v3 = vld [vmem:[%s237_s1 + $0x20] sm:$0xff]  ;;  %v173_v4 = vld [vmem:[%s237_s1 + $0x18] sm:$0xff]  ;;  %v172_v5 = vld [vmem:[%s237_s1 + $0x10] sm:$0xff] }
   0x3   :  { %v171_v6 = vld [vmem:[%s237_s1 + $0x8] sm:$0xff]  ;;  %v170_v7 = vld [vmem:[%s237_s1] sm:$0xff] }
   0x4   :  { %v169_v8 = vld [vmem:[%s239_s0] sm:$0xff] }
   0x5   :  { %v183_v10 = vld [vmem:[%s238_s2] ss:$0 sm:$0xff] }
   0x6   :  { %95 = vmatpush.bf16.msra.mxu0 %v176_v1 }
   0xa   :  { %96 = vmatpush.bf16.msra.mxu0 %v175_v2 }
   0xe   :  { %97 = vmatpush.bf16.msra.mxu0 %v174_v3 }
  0x12   :  { %98 = vmatpush.bf16.msra.mxu0 %v173_v4 }
  0x16   :  { %99 = vmatpush.bf16.msra.mxu0 %v172_v5 }
  0x1a   :  { %100 = vmatpush.bf16.msra.mxu0 %v171_v6 }
  0x1e   :  { %101 = vmatpush.bf16.msra.mxu0 %v170_v7 }
  0x21   :  { %102 = vmatmul.bf16.vlgmr.msra.gmra.mxu0 %v169_v8 }
  0x9e   :  { %v103_v9 = vpop.f32.mrf.mxu0 }
  0x9f   :  { %v121_v11 = vadd.f32 %v183_v10, %v103_v9 }
  0xa1   :  { %v123_v14 = vmax.f32 %v121_v11, 0.0 }
  0xa6   :  { %v105_v12 = vpop.f32.mrf.mxu0 }
  0xa7   :  { %v122_v13 = vadd.f32 %v183_v10, %v105_v12 }
  0xa9   :  { %v124_v15 = vmax.f32 %v122_v13, 0.0 }
  0xab   :  { %v181_v16 = vpack.c.bf16 %v124_v15, %v123_v14 }
  0xad   :  { %182 = vst [vmem:[%s240_s3] sm:$0xff] %v181_v16  }

// kernel: transformer_forward.42
= control target key start
LH: loop header
LB: loop body
LE: loop exit
PB: predicated region body
PF: predicated region fallthrough
CT: control target
= control target key end

     0   :  { %s1052_s18 = smov 0   ;;  %s1054_s19 = smov 0   ;;  %s1194_s0 = inlined_call_operand.vmem [shape: bf16[2,8,32], index: 0, kind: input, shape index: {}]   ;;  %s1195_s1 = inlined_call_operand.vmem [shape: bf16[2,8,32], index: 1, kind: input, shape index: {}]   ;;  %s1196_s2 = inlined_call_operand.vmem [shape: bf16[2,8,32], index: 2, kind: input, shape index: {}]   ;;  %s1197_s3 = inlined_call_operand.vmem [shape: f32[2,8,1], index: 3, kind: input, shape index: {}]   ;;  %s1198_s4 = inlined_call_operand.vmem [shape: f32[2,1,8], index: 4, kind: input, shape index: {}]   ;;  %s1199_s5 = inlined_call_operand.vmem [shape: bf16[2,8,32], index: 5, kind: output, shape index: {}]  }
   0x1   :  { %s1056_s20 = smov 0  }
   0x2 LB: > { %s34_s3 = sadd.s32 1, %s1007_s19  ;;  %p914_p0 = scmp.ge.s32.totalorder %s1011_s20, 1  ;;  %s1011_s20 = sphi %s1056_s20, %s15_s20   ;;  %s1007_s19 = sphi %s1054_s19, %s1201_s19   ;;  %s1003_s18 = sphi %s1052_s18, %s1200_s18  }
   0x3   : > { %p36_p1 = scmp.ge.s32.totalorder %s34_s3, 2  ;;  %p267_p2 = scmp.lt.s32.totalorder %s1011_s20, 3 }
   0x5   : > { %s1203_s3 = smov (%p36_p1, %s34_s3), 0  ;;  %p268_p3 = pnand %p914_p0, %p267_p2 }
   0x6   : > { %p326_p4 = scmp.lt.s32.totalorder (!%p268_p3), %s1003_s18, 1  ;;  %s1014_s27 = smov (!%p268_p3), 112  }
   0x7   : > { %271 = sbr.rel (%p268_p3) target bundleno = 1195 (0x4ab), region = 40  ;;  %s1015_s28 = smov (!%p268_p3), 120  }
   0x8   : > { %s1016_s29 = smov (!%p268_p3), 104   ;;  %s1019_s8 = smov (!%p268_p3), 8  }
   0x9   : > { %s1020_s9 = smov (!%p268_p3), 16   ;;  %s1021_s10 = smov (!%p268_p3), 24  }
   0xc   : > { %s1205_s18 = smov (!%p326_p4, %s1003_s18), 1  ;;  %vm386_vm0 = vcmask 64512   ;;  %vm372_vm1 = vcmask 7168   ;;  %v1013_v3 = vmov -inf   ;;  %v1017_v12 = vmov 0  }
   0xd   : > { %s1070_s4 = sshll.u32 %s1205_s18, 2  ;;  %373 = vst.msk [vmem:[#allocation2] sm:$0xff] %vm372_vm1, %v1013_v3  ;;  %962 = vset.pattern.permute.xlu1 %v1017_v12  ;;  %963 = vset.pattern.permute.xlu2 %v1017_v12  ;;  %v1018_v13 = vmov 0.0   ;;  %vm442_vm2 = vcmask 1043456   ;;  %vm381_vm3 = vcmask 261120   ;;  %vm554_vm4 = vcmask 130112  }
   0xe   : > { %s339_s23 = scalar_lea.vmem %s1195_s1, %s1070_s4  ;;  %s332_s26 = scalar_lea.vmem %s1194_s0, %s1070_s4  ;;  %374 = vst.msk [vmem:[#allocation2 + $0x8] sm:$0xff] %vm372_vm1, %v1013_v3  ;;  %964 = vset.pattern.permute.xlu0 %v1017_v12  ;;  %vm640_vm5 = vcmask 195712   ;;  %vm726_vm6 = vcmask 261312   ;;  %vm774_vm7 = vcmask 257024  }
   0xf   : > { %v384_v0 = vld [vmem:[%s339_s23] sm:$0xf]  ;;  %375 = vst.msk [vmem:[#allocation2 + $0x10] sm:$0xff] %vm372_vm1, %v1013_v3  ;;  %s346_s7 = scalar_lea.vmem %s1196_s2, %s1070_s4  ;;  %s366_s13 = scalar_lea.vmem %s1199_s5, %s1070_s4 }
  0x10   : > { %v391_v1 = vsel %vm386_vm0, %v384_v0, 0  ;;  %v383_v2 = vld [vmem:[%s332_s26] sm:$0xf]  ;;  %376 = vst.msk [vmem:[#allocation2 + $0x18] sm:$0xff] %vm372_vm1, %v1013_v3  ;;  %v468_v7 = vunpack.c.l.b16 %v384_v0 }
  0x11   : > { %400 = vmatpush.bf16.xpose.msra.mxu0 %v391_v1  ;;  %v463_v10 = vunpack.c.l.b16 %v383_v2  ;;  %377 = vst.msk [vmem:[#allocation3] sm:$0xff] %vm372_vm1, %v1018_v13  ;;  %v385_v20 = vld [vmem:[%s346_s7] sm:$0xf] }
  0x12   : > { %v469_v9 = vpack.c.b16 %v468_v7, %v468_v7  ;;  %378 = vst.msk [vmem:[#allocation3 + $0x8] sm:$0xff] %vm372_vm1, %v1018_v13  ;;  %v444_v21 = vsel %vm442_vm2, %v385_v20, 0  ;;  %v526_v47 = vunpack.c.l.b16 %v385_v20 }
  0x13   : > { %v464_v11 = vpack.c.b16 %v463_v10, %v463_v10  ;;  %379 = vst.msk [vmem:[#allocation3 + $0x10] sm:$0xff] %vm372_vm1, %v1018_v13  ;;  %453 = vmatpush.bf16.msra.mxu1 %v444_v21 }
  0x14   : > { %559 = vrot.lane.b32.xlu2 %v469_v9, %s1014_s27  ;;  %380 = vst.msk [vmem:[#allocation3 + $0x18] sm:$0xff] %vm372_vm1, %v1018_v13  ;;  %v1099_v14 = vld [vmem:[#allocation2] sm:$0xff]  ;;  %v527_v49 = vpack.c.b16 %v526_v47, %v526_v47 }
  0x15   : > { %v493_v50 = vld [vmem:[#allocation2 + $0x8] sm:$0xff]  ;;  %382 = vst.msk [vmem:[#allocation4] sm:$0xff] %vm381_vm3, %v1018_v13 }
  0x16   : > { %v582_v57 = vld [vmem:[#allocation2 + $0x10] sm:$0xff] }
  0x17   : > { %v668_v53 = vld [vmem:[#allocation2 + $0x18] sm:$0xff] }
  0x18   : > { %919 = vmatmul.msk.bf16.vlgmr.msra.gmra.mxu0 %vm386_vm0, %v383_v2 }
  0x1c   : > { %557 = vrot.lane.b32.xlu2 %v464_v11, %s1014_s27 }
  0x24   : > { %643 = vrot.lane.b32.xlu2 %v464_v11, %s1016_s29 }
  0x6e   : > { %v560_v22 = vpop.permute.xlu2 %559 }
  0x6f   : > { %v565_v23 = vsel %vm386_vm0, %v560_v22, 0 }
  0x70   : > { %574 = vmatpush.bf16.xpose.msrb.mxu1 %v565_v23 }
  0x76   : > { %v558_v30 = vpop.permute.xlu2 %557 }
  0x7e   : > { %v644_v33 = vpop.permute.xlu2 %643 }
  0x95   : > { %v402_v4 = vpop.f32.mrf.mxu0 }
  0x96   : > { %v406_v5 = vmul.f32 0.35355338, %v402_v4 }
  0x98   : > { %v408_v6 = vsel %vm386_vm0, %v406_v5, -inf }
  0x99   : > { %409 = vmax.xlane.f32.xlu0 %v408_v6 }
  0x9d   : > { %v404_v8 = vpop.f32.mrf.mxu0 }
  0xad   : > { %470 = vrot.lane.b32.xlu0 %v469_v9, %s1015_s28 }
 0x10c   : > { %v410_v15 = vpop.xlane.xlu0 %409 }
 0x10d   : > { %v1102_v16 = vmax.f32 %v1099_v14, %v410_v15 }
 0x10f   : > { %v412_v17 = vsub.f32 %v1099_v14, %v1102_v16  ;;  %461 = vst.msk [vmem:[#allocation2] sm:$0xff] %vm372_vm1, %v1102_v16  ;;  %417 = vperm.xlu1 %962, %v1102_v16  }
 0x111   : > { %v413_v59 = vmul.f32 1.442695, %v412_v17 }
 0x117   : > { %465 = vrot.lane.b32.xlu1 %v464_v11, %s1015_s28 }
 0x11f   : > { %645 = vrot.lane.b32.xlu1 %v469_v9, %s1016_s29  ;;  %v471_v18 = vpop.permute.xlu0 %470 }
 0x120   : > { %v476_v19 = vsel %vm386_vm0, %v471_v18, 0 }
 0x121   : > { %485 = vmatpush.bf16.xpose.msra.mxu2 %v476_v19  ;;  %v431_v19 = vld [vmem:[#allocation4] sm:$0xff] }
 0x181   : > { %v418_v24 = vpop.permute.xlu1 %417 }
 0x182   : > { %v420_v25 = vsub.f32 %v406_v5, %v418_v24 }
 0x184   : > { %v421_v26 = vmul.f32 1.442695, %v420_v25 }
 0x186   : > { %965 = vpow2.f32 %v421_v26 }
 0x187   : > { %967 = vpow2.f32 %v413_v59 }
 0x189   : > { %v466_v27 = vpop.permute.xlu1 %465 }
 0x18a   : > { %921 = vmatmul.msk.bf16.vlgmr.msra.gmra.mxu2 %vm386_vm0, %v466_v27 }
 0x18c   : > { %v966_v28 = vpop.eup %965 }
 0x18d   : > { %v438_v29 = vpack.c.bf16 %v966_v28, %v966_v28  ;;  %v968_v63 = vpop.eup %967  ;;  %v425_v1 = vsel %vm386_vm0, %v966_v28, 0.0 }
 0x18f   : > { %920 = vmatmul.msk.bf16.vlgmr.msra.gmra.mxu1 %vm386_vm0, %v438_v29 }
 0x191   : > { %v646_v31 = vpop.permute.xlu1 %645 }
 0x192   : > { %v651_v32 = vsel %vm386_vm0, %v646_v31, 0 }
 0x193   : > { %660 = vmatpush.bf16.xpose.msrb.mxu0 %v651_v32 }
 0x19a   : > { %925 = vmatmul.msk.bf16.vlgmr.msrb.gmra.mxu0 %vm386_vm0, %v644_v33 }
 0x19f   : > { %923 = vmatmul.msk.bf16.vlgmr.msrb.gmra.mxu1 %vm386_vm0, %v558_v30 }
 0x20c   : > { %v1123_v34 = vpop.f32.mrf.mxu1 }
 0x20d   : > { %v487_v35 = vpop.f32.mrf.mxu2 }
 0x20e   : > { %v1125_v36 = vmul.f32 0.35355338, %v487_v35 }
 0x210   : > { %v494_v37 = vsel %vm386_vm0, %v1125_v36, -inf }
 0x211   : > { %495 = vmax.xlane.f32.xlu1 %v494_v37 }
 0x214   : > { %v457_v38 = vpop.f32.mrf.mxu1 }
 0x215   : > { %v489_v39 = vpop.f32.mrf.mxu2 }
 0x217   : > { %v662_v40 = vpop.f32.mrf.mxu0 }
 0x218   : > { %v1129_v41 = vmul.f32 0.35355338, %v662_v40  ;;  %v510_v40 = vld [vmem:[#allocation3 + $0x8] sm:$0xff] }
 0x21a   : > { %v669_v42 = vsel %vm386_vm0, %v1129_v41, -inf }
 0x21b   : > { %670 = vmax.xlane.f32.xlu0 %v669_v42 }
 0x21c   : > { %v576_v43 = vpop.f32.mrf.mxu1 }
 0x21d   : > { %v1133_v44 = vmul.f32 0.35355338, %v576_v43 }
 0x21f   : > { %v583_v45 = vsel %vm386_vm0, %v1133_v44, -inf  ;;  %v664_v46 = vpop.f32.mrf.mxu0 }
 0x220   : > { %584 = vmax.xlane.f32.xlu2 %v583_v45  ;;  %v685_v46 = vld [vmem:[#allocation3 + $0x18] sm:$0xff] }
 0x224   : > { %v578_v48 = vpop.f32.mrf.mxu1 }
 0x22a   : > { %528 = vrot.lane.b32.xlu1 %v527_v49, %s1015_s28 }
 0x284   : > { %v496_v51 = vpop.xlane.xlu1 %495 }
 0x285   : > { %v497_v52 = vmax.f32 %v493_v50, %v496_v51 }
 0x287   : > { %556 = vst.msk [vmem:[#allocation2 + $0x8] sm:$0xff] %vm372_vm1, %v497_v52  ;;  %503 = vperm.xlu2 %963, %v497_v52   ;;  %v498_v61 = vsub.f32 %v493_v50, %v497_v52 }
 0x289   : > { %v499_v62 = vmul.f32 1.442695, %v498_v61 }
 0x28b   : > { %969 = vpow2.f32 %v499_v62 }
 0x28e   : > { %v671_v54 = vpop.xlane.xlu0 %670 }
 0x28f   : > { %v672_v55 = vmax.f32 %v668_v53, %v671_v54  ;;  %614 = vrot.lane.b32.xlu2 %v527_v49, %s1014_s27 }
 0x291   : > { %v673_v56 = vsub.f32 %v668_v53, %v672_v55  ;;  %728 = vst.msk [vmem:[#allocation2 + $0x18] sm:$0xff] %vm372_vm1, %v672_v55  ;;  %678 = vperm.xlu1 %962, %v672_v55   ;;  %v1146_v0 = vpop.eup %969 }
 0x293   : > { %v585_v58 = vpop.xlane.xlu2 %584  ;;  %v674_v6 = vmul.f32 1.442695, %v673_v56 }
 0x294   : > { %v586_v60 = vmax.f32 %v582_v57, %v585_v58 }
 0x296   : > { %642 = vst.msk [vmem:[#allocation2 + $0x10] sm:$0xff] %vm372_vm1, %v586_v60  ;;  %592 = vperm.xlu0 %964, %v586_v60   ;;  %v587_v2 = vsub.f32 %v582_v57, %v586_v60 }
 0x297   : > { %700 = vrot.lane.b32.xlu2 %v527_v49, %s1016_s29 }
 0x298   : > { %v588_v3 = vmul.f32 1.442695, %v587_v2 }
 0x29a   : > { %971 = vpow2.f32 %v588_v3  ;;  %v599_v3 = vld [vmem:[#allocation3 + $0x10] sm:$0xff] }
 0x29b   : > { %973 = vpow2.f32 %v674_v6 }
 0x29c   : > { %v529_v4 = vpop.permute.xlu1 %528 }
 0x29d   : > { %v534_v5 = vsel %vm442_vm2, %v529_v4, 0 }
 0x29e   : > { %543 = vmatpush.bf16.msra.mxu3 %v534_v5 }
 0x29f   : > { %434 = vperm.xlu2 %963, %v968_v63  }
 0x2a0   : > { %v1151_v7 = vpop.eup %971 }
 0x2a1   : > { %v974_v8 = vpop.eup %973  ;;  %v600_v6 = vmul.f32 %v1151_v7, %v599_v3 }
 0x2a2   : > { %v686_v47 = vmul.f32 %v974_v8, %v685_v46 }
 0x2a7   : > { %520 = vperm.xlu2 %963, %v1146_v0  }
 0x2bb   : > { %426 = vadd.xlane.f32.xlu1 %v425_v1 }
 0x2d4   : > { %609 = vperm.xlu1 %962, %v1151_v7  }
 0x2dc   : > { %695 = vperm.xlu1 %962, %v974_v8  }
 0x2e1   : > { %v504_v9 = vpop.permute.xlu2 %503 }
 0x2e2   : > { %v506_v10 = vsub.f32 %v1125_v36, %v504_v9 }
 0x2e4   : > { %v507_v11 = vmul.f32 1.442695, %v506_v10 }
 0x2e6   : > { %975 = vpow2.f32 %v507_v11 }
 0x2e9   : > { %v615_v12 = vpop.permute.xlu2 %614 }
 0x2ea   : > { %v620_v13 = vsel %vm442_vm2, %v615_v12, 0 }
 0x2eb   : > { %629 = vmatpush.bf16.msrb.mxu3 %v620_v13 }
 0x2ec   : > { %v976_v14 = vpop.eup %975 }
 0x2ed   : > { %v512_v15 = vsel %vm386_vm0, %v976_v14, 0.0  ;;  %v524_v16 = vpack.c.bf16 %v976_v14, %v976_v14 }
 0x2ee   : > { %513 = vadd.xlane.f32.xlu0 %v512_v15 }
 0x2ef   : > { %922 = vmatmul.msk.bf16.vlgmr.msra.gmra.mxu3 %vm386_vm0, %v524_v16 }
 0x2f1   : > { %v701_v17 = vpop.permute.xlu2 %700 }
 0x2f2   : > { %v706_v18 = vsel %vm442_vm2, %v701_v17, 0 }
 0x2f3   : > { %715 = vmatpush.bf16.msrb.mxu2 %v706_v18 }
 0x2f9   : > { %v435_v20 = vpop.permute.xlu2 %434 }
 0x2fa   : > { %v437_v21 = vmul.f32 %v435_v20, %v431_v19 }
 0x2fc   : > { %v459_v22 = vadd.f32 %v1123_v34, %v437_v21  ;;  %v423_v34 = vld [vmem:[#allocation3] sm:$0xff] }
 0x2fd   : > { %v424_v35 = vmul.f32 %v968_v63, %v423_v34 }
 0x2fe   : > { %460 = vst.msk [vmem:[#allocation4] sm:$0xff] %vm386_vm0, %v459_v22 }
 0x301   : > { %v521_v59 = vpop.permute.xlu2 %520 }
 0x303   : > { %v679_v23 = vpop.permute.xlu1 %678 }
 0x304   : > { %v681_v24 = vsub.f32 %v1129_v41, %v679_v23  ;;  %v511_v41 = vmul.f32 %v1146_v0, %v510_v40 }
 0x305   : > { %v517_v60 = vld [vmem:[#allocation4] sm:$0xff] }
 0x306   : > { %v682_v25 = vmul.f32 1.442695, %v681_v24  ;;  %v523_v61 = vmul.f32 %v521_v59, %v517_v60 }
 0x308   : > { %977 = vpow2.f32 %v682_v25  ;;  %v593_v26 = vpop.permute.xlu0 %592 }
 0x309   : > { %v595_v27 = vsub.f32 %v1133_v44, %v593_v26 }
 0x30b   : > { %v596_v28 = vmul.f32 1.442695, %v595_v27 }
 0x30d   : > { %979 = vpow2.f32 %v596_v28 }
 0x30e   : > { %v978_v29 = vpop.eup %977 }
 0x30f   : > { %v687_v30 = vsel %vm386_vm0, %v978_v29, 0.0  ;;  %v699_v31 = vpack.c.bf16 %v978_v29, %v978_v29 }
 0x310   : > { %688 = vadd.xlane.f32.xlu0 %v687_v30 }
 0x311   : > { %926 = vmatmul.msk.bf16.vlgmr.msrb.gmra.mxu2 %vm386_vm0, %v699_v31 }
 0x313   : > { %v980_v32 = vpop.eup %979 }
 0x314   : > { %v613_v33 = vpack.c.bf16 %v980_v32, %v980_v32  ;;  %v601_v53 = vsel %vm386_vm0, %v980_v32, 0.0 }
 0x316   : > { %924 = vmatmul.msk.bf16.vlgmr.msrb.gmra.mxu3 %vm386_vm0, %v613_v33 }
 0x32e   : > { %v427_v36 = vpop.xlane.xlu1 %426 }
 0x32f   : > { %v428_v37 = vadd.f32 %v427_v36, %v424_v35 }
 0x331   : > { %430 = vst.msk [vmem:[#allocation3] sm:$0xff] %vm372_vm1, %v428_v37 }
 0x338   : > { %v733_v38 = vld [vmem:[#allocation3] sm:$0xff] }
 0x339   : > { %981 = vrcp.f32 %v733_v38 }
 0x33f   : > { %v982_v39 = vpop.eup %981 }
 0x340   : > { %737 = vperm.xlu1 %962, %v982_v39  }
 0x346   : > { %v610_v1 = vpop.permute.xlu1 %609 }
 0x34e   : > { %v696_v10 = vpop.permute.xlu1 %695 }
 0x361   : > { %v514_v42 = vpop.xlane.xlu0 %513 }
 0x362   : > { %v515_v43 = vadd.f32 %v514_v42, %v511_v41 }
 0x364   : > { %516 = vst.msk [vmem:[#allocation3 + $0x8] sm:$0xff] %vm372_vm1, %v515_v43 }
 0x36b   : > { %v743_v51 = vld [vmem:[#allocation3 + $0x8] sm:$0xff] }
 0x36c   : > { %983 = vrcp.f32 %v743_v51 }
 0x372   : > { %v545_v44 = vpop.f32.mrf.mxu3  ;;  %v984_v56 = vpop.eup %983 }
 0x373   : > { %550 = vrot.lane.b32.xlu2 %v545_v44, %s1019_s8 }
 0x37a   : > { %v547_v45 = vpop.f32.mrf.mxu3 }
 0x383   : > { %v689_v48 = vpop.xlane.xlu0 %688 }
 0x384   : > { %v690_v49 = vadd.f32 %v689_v48, %v686_v47 }
 0x386   : > { %691 = vst.msk [vmem:[#allocation3 + $0x18] sm:$0xff] %vm372_vm1, %v690_v49 }
 0x38d   : > { %v763_v55 = vld [vmem:[#allocation3 + $0x18] sm:$0xff] }
 0x38e   : > { %985 = vrcp.f32 %v763_v55 }
 0x394   : > { %v717_v50 = vpop.f32.mrf.mxu2  ;;  %v986_v58 = vpop.eup %985 }
 0x399   : > { %v631_v52 = vpop.f32.mrf.mxu3 }
 0x39a   : > { %636 = vrot.lane.b32.xlu0 %v631_v52, %s1020_s9 }
 0x39c   : > { %v719_v54 = vpop.f32.mrf.mxu2  ;;  %602 = vadd.xlane.f32.xlu2 %v601_v53 }
 0x3a1   : > { %v633_v57 = vpop.f32.mrf.mxu3 }
 0x3a2   : > { %747 = vperm.xlu0 %964, %v984_v56  }
 0x3aa   : > { %767 = vperm.xlu0 %964, %v986_v58  }
 0x3b2   : > { %v738_v13 = vpop.permute.xlu1 %737 }
 0x3b4   : > { %722 = vrot.lane.b32.xlu2 %v717_v50, %s1021_s10 }
 0x3cd   : > { %v551_v62 = vpop.permute.xlu2 %550 }
 0x3ce   : > { %v553_v63 = vadd.f32 %v551_v62, %v523_v61 }
 0x3d0   : > { %555 = vst.msk [vmem:[#allocation4] sm:$0xff] %vm554_vm4, %v553_v63 }
 0x3d7   : > { %v606_v0 = vld [vmem:[#allocation4] sm:$0xff] }
 0x3d8   : > { %v612_v2 = vmul.f32 %v610_v1, %v606_v0 }
 0x40c   : > { %v637_v4 = vpop.permute.xlu0 %636 }
 0x40d   : > { %v639_v5 = vadd.f32 %v637_v4, %v612_v2 }
 0x40f   : > { %641 = vst.msk [vmem:[#allocation4] sm:$0xff] %vm640_vm5, %v639_v5  ;;  %v603_v8 = vpop.xlane.xlu2 %602 }
 0x410   : > { %v604_v9 = vadd.f32 %v603_v8, %v600_v6 }
 0x412   : > { %605 = vst.msk [vmem:[#allocation3 + $0x10] sm:$0xff] %vm372_vm1, %v604_v9 }
 0x414   : > { %v748_v19 = vpop.permute.xlu0 %747 }
 0x416   : > { %v692_v11 = vld [vmem:[#allocation4] sm:$0xff] }
 0x417   : > { %v723_v12 = vpop.permute.xlu2 %722  ;;  %v698_v14 = vmul.f32 %v696_v10, %v692_v11 }
 0x419   : > { %v725_v15 = vadd.f32 %v723_v12, %v698_v14  ;;  %v753_v16 = vld [vmem:[#allocation3 + $0x10] sm:$0xff] }
 0x41a   : > { %987 = vrcp.f32 %v753_v16 }
 0x41b   : > { %727 = vst.msk [vmem:[#allocation4] sm:$0xff] %vm726_vm6, %v725_v15 }
 0x41c   : > { %v768_v25 = vpop.permute.xlu0 %767 }
 0x420   : > { %v988_v17 = vpop.eup %987 }
 0x421   : > { %757 = vperm.xlu1 %962, %v988_v17  }
 0x422   : > { %v732_v7 = vld [vmem:[#allocation4] sm:$0xff] }
 0x423   : > { %v740_v18 = vmul.f32 %v738_v13, %v732_v7 }
 0x425   : > { %741 = vst.msk [vmem:[#allocation4] sm:$0xff] %vm386_vm0, %v740_v18 }
 0x42c   : > { %v742_v20 = vld [vmem:[#allocation4] sm:$0xff] }
 0x42d   : > { %v750_v21 = vmul.f32 %v748_v19, %v742_v20 }
 0x42f   : > { %751 = vst.msk [vmem:[#allocation4] sm:$0xff] %vm554_vm4, %v750_v21 }
 0x436   : > { %v752_v23 = vld [vmem:[#allocation4] sm:$0xff] }
 0x493   : > { %v758_v22 = vpop.permute.xlu1 %757 }
 0x494   : > { %v760_v24 = vmul.f32 %v758_v22, %v752_v23 }
 0x496   : > { %761 = vst.msk [vmem:[#allocation4] sm:$0xff] %vm640_vm5, %v760_v24 }
 0x49d   : > { %v762_v26 = vld [vmem:[#allocation4] sm:$0xff] }
 0x49e   : > { %v770_v27 = vmul.f32 %v768_v25, %v762_v26 }
 0x4a0   : > { %771 = vst.msk [vmem:[#allocation4] sm:$0xff] %vm726_vm6, %v770_v27 }
 0x4a7   : > { %v772_v28 = vld [vmem:[#allocation4] sm:$0xff] }
 0x4a8   : > { %v773_v29 = vpack.c.bf16 %v772_v28, %v772_v28 }
 0x4aa   : > { %775 = vst.msk [vmem:[%s366_s13] sm:$0xf] %vm774_vm7, %v773_v29 }
 0x4ab PF: > { %s15_s20 = sadd.s32 1, %s1011_s20   ;;  %s1200_s18 = smov %s1007_s19 }
 0x4ac   : > { %p12_p5 = scmp.ge.s32.totalorder %s15_s20, 4   ;;  %s1201_s19 = smov %s1203_s3 }
 0x4ae   :  { %14 = sbr.rel (!%p12_p5) target bundleno = 2 (0x2), region = 96 }

// kernel: transformer_forward.58
= control target key start
LH: loop header
LB: loop body
LE: loop exit
PB: predicated region body
PF: predicated region fallthrough
CT: control target
= control target key end

     0   :  { %vm25_vm0 = vcmask 261120   ;;  %v111_v9 = vmov 32.0   ;;  %vm91_vm6 = vcmask 257024   ;;  %s162_s0 = inlined_call_operand.vmem [shape: f32[16,32], index: 0, kind: input, shape index: {}]   ;;  %s163_s1 = inlined_call_operand.vmem [shape: bf16[16,32], index: 1, kind: input, shape index: {}]   ;;  %s164_s2 = inlined_call_operand.vmem [shape: f32[1,32], index: 2, kind: input, shape index: {}]   ;;  %s165_s3 = inlined_call_operand.vmem [shape: f32[1,32], index: 3, kind: input, shape index: {}]   ;;  %s166_s4 = inlined_call_operand.vmem [shape: bf16[16,32], index: 4, kind: output, shape index: {}]  }
   0x1   :  { %v17_v0 = vld [vmem:[%s162_s0] sm:$0xff]  ;;  %v18_v5 = vld [vmem:[%s162_s0 + $0x8] sm:$0xff]  ;;  %105 = vrcp.f32 %v111_v9 }
   0x2   :  { %v99_v1 = vld [vmem:[%s163_s1] sm:$0xff]  }
   0x3   :  { %v100_v2 = vunpack.c.l.bf16 %v99_v1  ;;  %v101_v4 = vunpack.c.h.bf16 %v99_v1  ;;  %v103_v40 = vld [vmem:[%s164_s2] ss:$0 sm:$0xff] }
   0x4   :  { %v104_v43 = vld [vmem:[%s165_s3] ss:$0 sm:$0xff] }
   0x5   :  { %v23_v3 = vadd.f32 %v100_v2, %v17_v0  ;;  %v24_v7 = vadd.f32 %v101_v4, %v18_v5 }
   0x7   :  { %v26_v6 = vsel %vm25_vm0, %v23_v3, 0.0  ;;  %v29_v8 = vsel %vm25_vm0, %v24_v7, 0.0  ;;  %v106_v10 = vpop.eup %105 }
   0x8   :  { %27 = vadd.xlane.f32.xlu0 %v26_v6  ;;  %v33_v11 = vmul.f32 32.0, %v106_v10  ;;  %vm37_vm1 = vweird.f32 %v106_v10 }
   0xa   :  { %v34_v12 = vsub.f32 1.0, %v33_v11 }
   0xc   :  { %v35_v13 = vmul.f32 %v106_v10, %v34_v12 }
   0xe   :  { %v36_v14 = vadd.f32 %v106_v10, %v35_v13 }
  0x10   :  { %30 = vadd.xlane.f32.xlu0 %v29_v8  ;;  %v38_v15 = vsel %vm37_vm1, %v106_v10, %v36_v14 }
  0x7b   :  { %v28_v16 = vpop.xlane.xlu0 %27 }
  0x7c   :  { %v39_v17 = vmul.f32 %v38_v15, %v28_v16 }
  0x7e   :  { %v41_v18 = vsub.f32 %v23_v3, %v39_v17 }
  0x80   :  { %v43_v19 = vmul.f32 %v41_v18, %v41_v18 }
  0x82   :  { %v45_v20 = vsel %vm25_vm0, %v43_v19, 0.0 }
  0x83   :  { %46 = vadd.xlane.f32.xlu1 %v45_v20  ;;  %v31_v21 = vpop.xlane.xlu0 %30 }
  0x84   :  { %v40_v22 = vmul.f32 %v38_v15, %v31_v21 }
  0x86   :  { %v42_v23 = vsub.f32 %v24_v7, %v40_v22 }
  0x88   :  { %v44_v24 = vmul.f32 %v42_v23, %v42_v23 }
  0x8a   :  { %v48_v25 = vsel %vm25_vm0, %v44_v24, 0.0 }
  0x8b   :  { %49 = vadd.xlane.f32.xlu1 %v48_v25 }
  0xf6   :  { %v47_v26 = vpop.xlane.xlu1 %46 }
  0xf7   :  { %v51_v27 = vmul.f32 %v47_v26, %v38_v15 }
  0xf9   :  { %v53_v28 = vadd.f32 1e-05, %v51_v27 }
  0xfb   :  { %107 = vrsqrt.f32 %v53_v28  ;;  %vm61_vm3 = vweird.f32 %v53_v28 }
  0xfe   :  { %v50_v29 = vpop.xlane.xlu1 %49 }
  0xff   :  { %v52_v30 = vmul.f32 %v50_v29, %v38_v15 }
 0x101   :  { %v108_v31 = vpop.eup %107  ;;  %v54_v32 = vadd.f32 1e-05, %v52_v30 }
 0x102   :  { %v56_v33 = vmul.f32 %v108_v31, %v53_v28  ;;  %vm62_vm2 = vweird.f32 %v108_v31 }
 0x103   :  { %109 = vrsqrt.f32 %v54_v32  ;;  %vm63_vm4 = vmor %vm61_vm3, %vm62_vm2  ;;  %vm71_vm7 = vweird.f32 %v54_v32 }
 0x104   :  { %v57_v34 = vmul.f32 %v108_v31, %v56_v33 }
 0x106   :  { %v58_v35 = vmul.f32 0.5, %v57_v34 }
 0x108   :  { %v59_v36 = vsub.f32 1.5, %v58_v35 }
 0x109   :  { %v110_v37 = vpop.eup %109 }
 0x10a   :  { %v60_v38 = vmul.f32 %v108_v31, %v59_v36  ;;  %v66_v39 = vmul.f32 %v110_v37, %v54_v32  ;;  %vm72_vm5 = vweird.f32 %v110_v37 }
 0x10b   :  { %vm73_vm8 = vmor %vm71_vm7, %vm72_vm5 }
 0x10c   :  { %v64_v41 = vsel %vm63_vm4, %v108_v31, %v60_v38  ;;  %v67_v42 = vmul.f32 %v110_v37, %v66_v39 }
 0x10d   :  { %v75_v44 = vmul.f32 %v64_v41, %v41_v18 }
 0x10e   :  { %v68_v45 = vmul.f32 0.5, %v67_v42 }
 0x10f   :  { %v81_v46 = vmul.f32 %v103_v40, %v75_v44 }
 0x110   :  { %v69_v47 = vsub.f32 1.5, %v68_v45 }
 0x111   :  { %v87_v48 = vadd.f32 %v104_v43, %v81_v46 }
 0x112   :  { %v70_v49 = vmul.f32 %v110_v37, %v69_v47 }
 0x113   :  { %v89_v50 = vpack.c.bf16 %v87_v48, %v87_v48 }
 0x114   :  { %v74_v51 = vsel %vm73_vm8, %v110_v37, %v70_v49 }
 0x115   :  { %92 = vst.msk [vmem:[%s166_s4] sm:$0xf] %vm91_vm6, %v89_v50  ;;  %v76_v52 = vmul.f32 %v74_v51, %v42_v23 }
 0x117   :  { %v82_v53 = vmul.f32 %v103_v40, %v76_v52 }
 0x119   :  { %v88_v54 = vadd.f32 %v104_v43, %v82_v53 }
 0x11b   :  { %v90_v55 = vpack.c.bf16 %v88_v54, %v88_v54 }
 0x11d   :  { %93 = vst.msk [vmem:[%s166_s4 + $0x4] sm:$0xf] %vm91_vm6, %v90_v55 }

// kernel: transformer_forward.56
= control target key start
LH: loop header
LB: loop body
LE: loop exit
PB: predicated region body
PF: predicated region fallthrough
CT: control target
= control target key end

     0   :  { %s1078_s18 = smov 0   ;;  %s1080_s19 = smov 0   ;;  %s1205_s0 = inlined_call_operand.vmem [shape: bf16[2,8,32], index: 0, kind: input, shape index: {}]   ;;  %s1206_s1 = inlined_call_operand.vmem [shape: bf16[2,8,32], index: 1, kind: input, shape index: {}]   ;;  %s1207_s2 = inlined_call_operand.vmem [shape: bf16[2,8,32], index: 2, kind: input, shape index: {}]   ;;  %s1208_s3 = inlined_call_operand.vmem [shape: f32[2,8,1], index: 3, kind: input, shape index: {}]   ;;  %s1209_s4 = inlined_call_operand.vmem [shape: f32[2,1,8], index: 4, kind: input, shape index: {}]   ;;  %s1210_s5 = inlined_call_operand.vmem [shape: bf16[2,8,32], index: 5, kind: output, shape index: {}]  }
   0x1   :  { %s1082_s20 = smov 0  }
   0x2 LB: > { %s34_s4 = sadd.s32 1, %s1032_s19  ;;  %p937_p0 = scmp.ge.s32.totalorder %s1036_s20, 1  ;;  %s1036_s20 = sphi %s1082_s20, %s15_s20   ;;  %s1032_s19 = sphi %s1080_s19, %s1212_s19   ;;  %s1028_s18 = sphi %s1078_s18, %s1211_s18  }
   0x3   : > { %p36_p1 = scmp.ge.s32.totalorder %s34_s4, 2  ;;  %p267_p2 = scmp.lt.s32.totalorder %s1036_s20, 3 }
   0x5   : > { %s1214_s4 = smov (%p36_p1, %s34_s4), 0  ;;  %p268_p3 = pnand %p937_p0, %p267_p2 }
   0x6   : > { %p326_p4 = scmp.lt.s32.totalorder (!%p268_p3), %s1028_s18, 1  ;;  %s1039_s7 = smov (!%p268_p3), 120  }
   0x7   : > { %271 = sbr.rel (%p268_p3) target bundleno = 1127 (0x467), region = 40  ;;  %s1040_s8 = smov (!%p268_p3), 112  }
   0x8   : > { %s1041_s9 = smov (!%p268_p3), 104   ;;  %s1045_s13 = smov (!%p268_p3), 8  }
   0x9   : > { %s1046_s14 = smov (!%p268_p3), 24   ;;  %s1047_s15 = smov (!%p268_p3), 16  }
   0xc   : > { %v1038_v0 = vmov 0   ;;  %s1216_s18 = smov (!%p326_p4, %s1028_s18), 1  ;;  %vm405_vm0 = vcmask 64512   ;;  %vm372_vm1 = vcmask 7168   ;;  %v1042_v9 = vmov -inf  }
   0xd   : > { %987 = vset.pattern.permute.xlu0 %v1038_v0  ;;  %988 = vset.pattern.permute.xlu1 %v1038_v0  ;;  %s1096_s21 = sshll.u32 %s1216_s18, 2  ;;  %s941_s22 = sshll.u32 %s1216_s18, 3  ;;  %373 = vst.msk [vmem:[#allocation2] sm:$0xff] %vm372_vm1, %v1042_v9  ;;  %v387_v11 = vlaneseq  ;;  %v1043_v16 = vmov -1e+09   ;;  %v1044_v25 = vmov 0.0  }
   0xe   : > { %989 = vset.pattern.permute.xlu2 %v1038_v0  ;;  %s339_s25 = scalar_lea.vmem %s1206_s1, %s1096_s21  ;;  %s332_s28 = scalar_lea.vmem %s1205_s0, %s1096_s21  ;;  %374 = vst.msk [vmem:[#allocation2 + $0x8] sm:$0xff] %vm372_vm1, %v1042_v9  ;;  %vm462_vm3 = vcmask 1043456   ;;  %vm381_vm4 = vcmask 261120   ;;  %vm575_vm5 = vcmask 130112   ;;  %vm662_vm6 = vcmask 195712  }
   0xf   : > { %v384_v1 = vld [vmem:[%s339_s25] sm:$0xf]  ;;  %s353_s6 = scalar_lea.vmem %s1208_s3, %s941_s22  ;;  %375 = vst.msk [vmem:[#allocation2 + $0x10] sm:$0xff] %vm372_vm1, %v1042_v9  ;;  %v388_v13 = vshrl.u32 %v387_v11, 7  ;;  %v393_v14 = vand.u32 127, %v387_v11  ;;  %s346_s12 = scalar_lea.vmem %s1207_s2, %s1096_s21  ;;  %vm749_vm7 = vcmask 261312  }
  0x10   : > { %v410_v2 = vsel %vm405_vm0, %v384_v1, 0  ;;  %v488_v3 = vunpack.c.l.b16 %v384_v1  ;;  %v383_v4 = vld [vmem:[%s332_s28] sm:$0xf]  ;;  %376 = vst.msk [vmem:[#allocation2 + $0x18] sm:$0xff] %vm372_vm1, %v1042_v9  ;;  %s366_s18 = scalar_lea.vmem %s1210_s5, %s1096_s21  ;;  %vm797_vm8 = vcmask 257024  }
  0x11   : > { %v386_v5 = vld [vmem:[%s353_s6] sm:$0xff]  ;;  %419 = vmatpush.bf16.xpose.msra.mxu0 %v410_v2  ;;  %v483_v6 = vunpack.c.l.b16 %v383_v4  ;;  %vm397_vm2 = vcmp.le.s32.totalorder %v393_v14, %v388_v13  ;;  %377 = vst.msk [vmem:[#allocation3] sm:$0xff] %vm372_vm1, %v1044_v25 }
  0x12   : > { %401 = vperm.xlu0 %987, %v386_v5   ;;  %v489_v7 = vpack.c.b16 %v488_v3, %v488_v3  ;;  %v398_v17 = vsel %vm397_vm2, 0.0, %v1043_v16  ;;  %378 = vst.msk [vmem:[#allocation3 + $0x8] sm:$0xff] %vm372_vm1, %v1044_v25  ;;  %v385_v34 = vld [vmem:[%s346_s12] sm:$0xf] }
  0x13   : > { %v484_v8 = vpack.c.b16 %v483_v6, %v483_v6  ;;  %379 = vst.msk [vmem:[#allocation3 + $0x10] sm:$0xff] %vm372_vm1, %v1044_v25  ;;  %v464_v36 = vsel %vm462_vm3, %v385_v34, 0  ;;  %v547_v38 = vunpack.c.l.b16 %v385_v34 }
  0x14   : > { %490 = vrot.lane.b32.xlu1 %v489_v7, %s1039_s7  ;;  %380 = vst.msk [vmem:[#allocation3 + $0x18] sm:$0xff] %vm372_vm1, %v1044_v25  ;;  %v427_v26 = vld [vmem:[#allocation2] sm:$0xff]  ;;  %473 = vmatpush.bf16.msra.mxu1 %v464_v36 }
  0x15   : > { %485 = vrot.lane.b32.xlu2 %v484_v8, %s1039_s7  ;;  %v548_v39 = vpack.c.b16 %v547_v38, %v547_v38  ;;  %382 = vst.msk [vmem:[#allocation4] sm:$0xff] %vm381_vm4, %v1044_v25  ;;  %v514_v48 = vld [vmem:[#allocation2 + $0x8] sm:$0xff] }
  0x16   : > { %v604_v16 = vld [vmem:[#allocation2 + $0x10] sm:$0xff] }
  0x17   : > { %v691_v13 = vld [vmem:[#allocation2 + $0x18] sm:$0xff] }
  0x18   : > { %943 = vmatmul.msk.bf16.vlgmr.msra.gmra.mxu0 %vm405_vm0, %v383_v4 }
  0x1c   : > { %v451_v60 = vld [vmem:[#allocation4] sm:$0xff] }
  0x1d   : > { %580 = vrot.lane.b32.xlu2 %v489_v7, %s1040_s8 }
  0x25   : > { %667 = vrot.lane.b32.xlu2 %v489_v7, %s1041_s9 }
  0x6f   : > { %v486_v15 = vpop.permute.xlu2 %485 }
  0x77   : > { %v581_v35 = vpop.permute.xlu2 %580 }
  0x78   : > { %v586_v37 = vsel %vm405_vm0, %v581_v35, 0 }
  0x79   : > { %595 = vmatpush.bf16.xpose.msrb.mxu1 %v586_v37 }
  0x7f   : > { %v668_v43 = vpop.permute.xlu2 %667 }
  0x80   : > { %v673_v44 = vsel %vm405_vm0, %v668_v43, 0 }
  0x81   : > { %682 = vmatpush.bf16.xpose.msrb.mxu0 %v673_v44 }
  0x84   : > { %v402_v18 = vpop.permute.xlu0 %401 }
  0x85   : > { %v1121_v19 = vadd.f32 %v402_v18, %v398_v17 }
  0x86   : > { %v491_v10 = vpop.permute.xlu1 %490 }
  0x87   : > { %v496_v12 = vsel %vm405_vm0, %v491_v10, 0 }
  0x88   : > { %505 = vmatpush.bf16.xpose.msra.mxu2 %v496_v12 }
  0x8f   : > { %945 = vmatmul.msk.bf16.vlgmr.msra.gmra.mxu2 %vm405_vm0, %v486_v15 }
  0x95   : > { %v421_v20 = vpop.f32.mrf.mxu0 }
  0x96   : > { %v425_v21 = vmul.f32 0.35355338, %v421_v20 }
  0x98   : > { %v426_v22 = vadd.f32 %v425_v21, %v1121_v19 }
  0x9a   : > { %v428_v23 = vsel %vm405_vm0, %v426_v22, -inf }
  0x9b   : > { %429 = vmax.xlane.f32.xlu0 %v428_v23 }
  0x9d   : > { %v423_v24 = vpop.f32.mrf.mxu0 }
 0x10e   : > { %v430_v27 = vpop.xlane.xlu0 %429 }
 0x10f   : > { %v431_v28 = vmax.f32 %v427_v26, %v430_v27 }
 0x111   : > { %481 = vst.msk [vmem:[#allocation2] sm:$0xff] %vm372_vm1, %v431_v28  ;;  %437 = vperm.xlu1 %988, %v431_v28   ;;  %v432_v40 = vsub.f32 %v427_v26, %v431_v28 }
 0x112   : > { %v507_v29 = vpop.f32.mrf.mxu2 }
 0x113   : > { %v511_v30 = vmul.f32 0.35355338, %v507_v29  ;;  %v433_v41 = vmul.f32 1.442695, %v432_v40 }
 0x115   : > { %v1131_v31 = vadd.f32 %v511_v30, %v1121_v19  ;;  %990 = vpow2.f32 %v433_v41 }
 0x117   : > { %v515_v32 = vsel %vm405_vm0, %v1131_v31, -inf }
 0x118   : > { %516 = vmax.xlane.f32.xlu2 %v515_v32 }
 0x119   : > { %578 = vrot.lane.b32.xlu1 %v484_v8, %s1040_s8 }
 0x11a   : > { %v509_v33 = vpop.f32.mrf.mxu2 }
 0x11b   : > { %v1145_v42 = vpop.eup %990 }
 0x121   : > { %665 = vrot.lane.b32.xlu1 %v484_v8, %s1041_s9 }
 0x130   : > { %549 = vrot.lane.b32.xlu2 %v548_v39, %s1039_s7 }
 0x138   : > { %723 = vrot.lane.b32.xlu2 %v548_v39, %s1041_s9 }
 0x140   : > { %454 = vperm.xlu2 %989, %v1145_v42  }
 0x183   : > { %v438_v45 = vpop.permute.xlu1 %437 }
 0x184   : > { %v440_v46 = vsub.f32 %v426_v22, %v438_v45 }
 0x186   : > { %v441_v47 = vmul.f32 1.442695, %v440_v46 }
 0x188   : > { %992 = vpow2.f32 %v441_v47  ;;  %v443_v47 = vld [vmem:[#allocation3] sm:$0xff] }
 0x18b   : > { %v517_v49 = vpop.xlane.xlu2 %516  ;;  %v579_v50 = vpop.permute.xlu1 %578 }
 0x18c   : > { %v518_v51 = vmax.f32 %v514_v48, %v517_v49 }
 0x18e   : > { %v993_v52 = vpop.eup %992  ;;  %v519_v53 = vsub.f32 %v514_v48, %v518_v51  ;;  %577 = vst.msk [vmem:[#allocation2 + $0x8] sm:$0xff] %vm372_vm1, %v518_v51  ;;  %v444_v48 = vmul.f32 %v1145_v42, %v443_v47 }
 0x18f   : > { %v458_v54 = vpack.c.bf16 %v993_v52, %v993_v52  ;;  %v445_v24 = vsel %vm405_vm0, %v993_v52, 0.0  ;;  %v531_v52 = vld [vmem:[#allocation3 + $0x8] sm:$0xff] }
 0x190   : > { %v520_v55 = vmul.f32 1.442695, %v519_v53 }
 0x191   : > { %944 = vmatmul.msk.bf16.vlgmr.msra.gmra.mxu1 %vm405_vm0, %v458_v54 }
 0x192   : > { %994 = vpow2.f32 %v520_v55 }
 0x193   : > { %v666_v56 = vpop.permute.xlu1 %665  ;;  %v550_v58 = vpop.permute.xlu2 %549 }
 0x194   : > { %949 = vmatmul.msk.bf16.vlgmr.msrb.gmra.mxu0 %vm405_vm0, %v666_v56  ;;  %v555_v12 = vsel %vm462_vm3, %v550_v58, 0 }
 0x195   : > { %564 = vmatpush.bf16.msra.mxu3 %v555_v12  ;;  %v621_v12 = vld [vmem:[#allocation3 + $0x10] sm:$0xff] }
 0x198   : > { %v1152_v57 = vpop.eup %994 }
 0x199   : > { %541 = vperm.xlu2 %989, %v1152_v57   ;;  %v532_v55 = vmul.f32 %v1152_v57, %v531_v52 }
 0x19b   : > { %v724_v59 = vpop.permute.xlu2 %723 }
 0x19c   : > { %v729_v32 = vsel %vm462_vm3, %v724_v59, 0 }
 0x19d   : > { %738 = vmatpush.bf16.msrb.mxu2 %v729_v32 }
 0x1a1   : > { %947 = vmatmul.msk.bf16.vlgmr.msrb.gmra.mxu1 %vm405_vm0, %v579_v50 }
 0x1a3   : > { %v455_v61 = vpop.permute.xlu2 %454 }
 0x1a4   : > { %v457_v62 = vmul.f32 %v455_v61, %v451_v60 }
 0x20e   : > { %v475_v63 = vpop.f32.mrf.mxu1 }
 0x20f   : > { %v479_v0 = vadd.f32 %v475_v63, %v457_v62  ;;  %v708_v62 = vld [vmem:[#allocation3 + $0x18] sm:$0xff] }
 0x211   : > { %480 = vst.msk [vmem:[#allocation4] sm:$0xff] %vm405_vm0, %v479_v0  ;;  %v684_v1 = vpop.f32.mrf.mxu0 }
 0x212   : > { %v688_v2 = vmul.f32 0.35355338, %v684_v1 }
 0x214   : > { %v689_v3 = vadd.f32 %v688_v2, %v1121_v19  ;;  %v542_v2 = vpop.permute.xlu2 %541 }
 0x216   : > { %v477_v4 = vpop.f32.mrf.mxu1  ;;  %v692_v5 = vsel %vm405_vm0, %v689_v3, -inf }
 0x217   : > { %693 = vmax.xlane.f32.xlu0 %v692_v5 }
 0x218   : > { %v538_v57 = vld [vmem:[#allocation4] sm:$0xff] }
 0x219   : > { %v686_v6 = vpop.f32.mrf.mxu0 }
 0x21e   : > { %v597_v7 = vpop.f32.mrf.mxu1 }
 0x21f   : > { %v601_v8 = vmul.f32 0.35355338, %v597_v7 }
 0x221   : > { %v602_v9 = vadd.f32 %v601_v8, %v1121_v19 }
 0x223   : > { %v605_v10 = vsel %vm405_vm0, %v602_v9, -inf }
 0x224   : > { %606 = vmax.xlane.f32.xlu1 %v605_v10 }
 0x226   : > { %v599_v11 = vpop.f32.mrf.mxu1 }
 0x22b   : > { %524 = vperm.xlu0 %987, %v518_v51  }
 0x233   : > { %636 = vrot.lane.b32.xlu0 %v548_v39, %s1040_s8 }
 0x28a   : > { %v694_v14 = vpop.xlane.xlu0 %693 }
 0x28b   : > { %v695_v15 = vmax.f32 %v691_v13, %v694_v14 }
 0x28d   : > { %751 = vst.msk [vmem:[#allocation2 + $0x18] sm:$0xff] %vm372_vm1, %v695_v15  ;;  %701 = vperm.xlu0 %987, %v695_v15   ;;  %v696_v28 = vsub.f32 %v691_v13, %v695_v15 }
 0x28f   : > { %v697_v29 = vmul.f32 1.442695, %v696_v28 }
 0x297   : > { %v607_v17 = vpop.xlane.xlu1 %606 }
 0x298   : > { %v608_v18 = vmax.f32 %v604_v16, %v607_v17 }
 0x29a   : > { %664 = vst.msk [vmem:[#allocation2 + $0x10] sm:$0xff] %vm372_vm1, %v608_v18  ;;  %614 = vperm.xlu1 %988, %v608_v18   ;;  %v609_v25 = vsub.f32 %v604_v16, %v608_v18 }
 0x29c   : > { %v610_v26 = vmul.f32 1.442695, %v609_v25 }
 0x29d   : > { %v525_v19 = vpop.permute.xlu0 %524 }
 0x29e   : > { %v527_v20 = vsub.f32 %v1131_v31, %v525_v19 }
 0x2a0   : > { %v528_v21 = vmul.f32 1.442695, %v527_v20 }
 0x2a2   : > { %996 = vpow2.f32 %v528_v21 }
 0x2a3   : > { %998 = vpow2.f32 %v610_v26 }
 0x2a4   : > { %1000 = vpow2.f32 %v697_v29 }
 0x2a5   : > { %v637_v33 = vpop.permute.xlu0 %636 }
 0x2a6   : > { %v642_v34 = vsel %vm462_vm3, %v637_v33, 0 }
 0x2a7   : > { %651 = vmatpush.bf16.msrb.mxu3 %v642_v34 }
 0x2a8   : > { %v997_v22 = vpop.eup %996 }
 0x2a9   : > { %v545_v23 = vpack.c.bf16 %v997_v22, %v997_v22  ;;  %v533_v27 = vsel %vm405_vm0, %v997_v22, 0.0  ;;  %v1169_v30 = vpop.eup %998 }
 0x2aa   : > { %v1001_v31 = vpop.eup %1000  ;;  %v622_v13 = vmul.f32 %v1169_v30, %v621_v12 }
 0x2ab   : > { %946 = vmatmul.msk.bf16.vlgmr.msra.gmra.mxu3 %vm405_vm0, %v545_v23  ;;  %v709_v63 = vmul.f32 %v1001_v31, %v708_v62 }
 0x2b7   : > { %446 = vadd.xlane.f32.xlu0 %v445_v24 }
 0x2c4   : > { %534 = vadd.xlane.f32.xlu1 %v533_v27 }
 0x2cb   : > { %631 = vperm.xlu0 %987, %v1169_v30  }
 0x2d3   : > { %718 = vperm.xlu0 %987, %v1001_v31  }
 0x2ff   : > { %v702_v35 = vpop.permute.xlu0 %701 }
 0x300   : > { %v704_v36 = vsub.f32 %v689_v3, %v702_v35  ;;  %v544_v3 = vmul.f32 %v542_v2, %v538_v57 }
 0x302   : > { %v705_v37 = vmul.f32 1.442695, %v704_v36 }
 0x304   : > { %1002 = vpow2.f32 %v705_v37 }
 0x30a   : > { %v1003_v38 = vpop.eup %1002 }
 0x30b   : > { %v710_v39 = vsel %vm405_vm0, %v1003_v38, 0.0  ;;  %v722_v40 = vpack.c.bf16 %v1003_v38, %v1003_v38 }
 0x30c   : > { %v615_v41 = vpop.permute.xlu1 %614  ;;  %711 = vadd.xlane.f32.xlu1 %v710_v39 }
 0x30d   : > { %v617_v43 = vsub.f32 %v602_v9, %v615_v41  ;;  %950 = vmatmul.msk.bf16.vlgmr.msrb.gmra.mxu2 %vm405_vm0, %v722_v40 }
 0x30f   : > { %v618_v44 = vmul.f32 1.442695, %v617_v43 }
 0x311   : > { %1004 = vpow2.f32 %v618_v44 }
 0x317   : > { %v1005_v45 = vpop.eup %1004 }
 0x318   : > { %v635_v46 = vpack.c.bf16 %v1005_v45, %v1005_v45  ;;  %v623_v61 = vsel %vm405_vm0, %v1005_v45, 0.0 }
 0x31a   : > { %948 = vmatmul.msk.bf16.vlgmr.msrb.gmra.mxu3 %vm405_vm0, %v635_v46 }
 0x32a   : > { %v447_v49 = vpop.xlane.xlu0 %446 }
 0x32b   : > { %v448_v50 = vadd.f32 %v447_v49, %v444_v48 }
 0x32d   : > { %450 = vst.msk [vmem:[#allocation3] sm:$0xff] %vm372_vm1, %v448_v50 }
 0x32e   : > { %v566_v51 = vpop.f32.mrf.mxu3 }
 0x32f   : > { %571 = vrot.lane.b32.xlu2 %v566_v51, %s1045_s13 }
 0x334   : > { %v756_v53 = vld [vmem:[#allocation3] sm:$0xff] }
 0x335   : > { %1006 = vrcp.f32 %v756_v53 }
 0x336   : > { %v568_v54 = vpop.f32.mrf.mxu3 }
 0x337   : > { %v535_v56 = vpop.xlane.xlu1 %534 }
 0x338   : > { %v536_v58 = vadd.f32 %v535_v56, %v532_v55 }
 0x33a   : > { %537 = vst.msk [vmem:[#allocation3 + $0x8] sm:$0xff] %vm372_vm1, %v536_v58 }
 0x33b   : > { %v1007_v59 = vpop.eup %1006 }
 0x33c   : > { %760 = vperm.xlu0 %987, %v1007_v59  }
 0x33d   : > { %v632_v19 = vpop.permute.xlu0 %631 }
 0x341   : > { %v766_v42 = vld [vmem:[#allocation3 + $0x8] sm:$0xff] }
 0x342   : > { %1008 = vrcp.f32 %v766_v42 }
 0x345   : > { %v719_v23 = vpop.permute.xlu0 %718 }
 0x348   : > { %v1009_v60 = vpop.eup %1008 }
 0x349   : > { %770 = vperm.xlu0 %987, %v1009_v60  }
 0x358   : > { %624 = vadd.xlane.f32.xlu2 %v623_v61 }
 0x37f   : > { %v712_v0 = vpop.xlane.xlu1 %711 }
 0x380   : > { %v713_v1 = vadd.f32 %v712_v0, %v709_v63 }
 0x382   : > { %714 = vst.msk [vmem:[#allocation3 + $0x18] sm:$0xff] %vm372_vm1, %v713_v1 }
 0x389   : > { %v572_v4 = vpop.permute.xlu2 %571  ;;  %v786_v5 = vld [vmem:[#allocation3 + $0x18] sm:$0xff] }
 0x38a   : > { %v574_v6 = vadd.f32 %v572_v4, %v544_v3  ;;  %1010 = vrcp.f32 %v786_v5 }
 0x38c   : > { %576 = vst.msk [vmem:[#allocation4] sm:$0xff] %vm575_vm5, %v574_v6 }
 0x390   : > { %v1011_v7 = vpop.eup %1010  ;;  %v740_v8 = vpop.f32.mrf.mxu2 }
 0x391   : > { %745 = vrot.lane.b32.xlu2 %v740_v8, %s1046_s14  ;;  %790 = vperm.xlu0 %987, %v1011_v7  }
 0x393   : > { %v628_v18 = vld [vmem:[#allocation4] sm:$0xff] }
 0x394   : > { %v634_v20 = vmul.f32 %v632_v19, %v628_v18 }
 0x398   : > { %v742_v9 = vpop.f32.mrf.mxu2 }
 0x39d   : > { %v653_v10 = vpop.f32.mrf.mxu3 }
 0x39e   : > { %658 = vrot.lane.b32.xlu1 %v653_v10, %s1047_s15 }
 0x3a5   : > { %v655_v11 = vpop.f32.mrf.mxu3 }
 0x3ae   : > { %v761_v28 = vpop.permute.xlu0 %760 }
 0x3bb   : > { %v771_v31 = vpop.permute.xlu0 %770 }
 0x3cb   : > { %v625_v14 = vpop.xlane.xlu2 %624 }
 0x3cc   : > { %v626_v15 = vadd.f32 %v625_v14, %v622_v13 }
 0x3ce   : > { %627 = vst.msk [vmem:[#allocation3 + $0x10] sm:$0xff] %vm372_vm1, %v626_v15 }
 0x3d5   : > { %v776_v16 = vld [vmem:[#allocation3 + $0x10] sm:$0xff] }
 0x3d6   : > { %1012 = vrcp.f32 %v776_v16 }
 0x3dc   : > { %v1013_v17 = vpop.eup %1012 }
 0x3dd   : > { %780 = vperm.xlu1 %988, %v1013_v17  }
 0x3eb   : > { %v746_v26 = vpop.permute.xlu2 %745 }
 0x403   : > { %v791_v37 = vpop.permute.xlu0 %790 }
 0x410   : > { %v659_v21 = vpop.permute.xlu1 %658 }
 0x411   : > { %v661_v22 = vadd.f32 %v659_v21, %v634_v20 }
 0x413   : > { %663 = vst.msk [vmem:[#allocation4] sm:$0xff] %vm662_vm6, %v661_v22 }
 0x41a   : > { %v715_v24 = vld [vmem:[#allocation4] sm:$0xff] }
 0x41b   : > { %v721_v25 = vmul.f32 %v719_v23, %v715_v24 }
 0x41d   : > { %v748_v27 = vadd.f32 %v746_v26, %v721_v25 }
 0x41f   : > { %750 = vst.msk [vmem:[#allocation4] sm:$0xff] %vm749_vm7, %v748_v27 }
 0x426   : > { %v755_v29 = vld [vmem:[#allocation4] sm:$0xff] }
 0x427   : > { %v763_v30 = vmul.f32 %v761_v28, %v755_v29 }
 0x429   : > { %764 = vst.msk [vmem:[#allocation4] sm:$0xff] %vm405_vm0, %v763_v30 }
 0x430   : > { %v765_v32 = vld [vmem:[#allocation4] sm:$0xff] }
 0x431   : > { %v773_v33 = vmul.f32 %v771_v31, %v765_v32 }
 0x433   : > { %774 = vst.msk [vmem:[#allocation4] sm:$0xff] %vm575_vm5, %v773_v33 }
 0x43a   : > { %v775_v35 = vld [vmem:[#allocation4] sm:$0xff] }
 0x44f   : > { %v781_v34 = vpop.permute.xlu1 %780 }
 0x450   : > { %v783_v36 = vmul.f32 %v781_v34, %v775_v35 }
 0x452   : > { %784 = vst.msk [vmem:[#allocation4] sm:$0xff] %vm662_vm6, %v783_v36 }
 0x459   : > { %v785_v38 = vld [vmem:[#allocation4] sm:$0xff] }
 0x45a   : > { %v793_v39 = vmul.f32 %v791_v37, %v785_v38 }
 0x45c   : > { %794 = vst.msk [vmem:[#allocation4] sm:$0xff] %vm749_vm7, %v793_v39 }
 0x463   : > { %v795_v40 = vld [vmem:[#allocation4] sm:$0xff] }
 0x464   : > { %v796_v41 = vpack.c.bf16 %v795_v40, %v795_v40 }
 0x466   : > { %798 = vst.msk [vmem:[%s366_s18] sm:$0xf] %vm797_vm8, %v796_v41 }
 0x467 PF: > { %s15_s20 = sadd.s32 1, %s1036_s20   ;;  %s1211_s18 = smov %s1032_s19 }
 0x468   : > { %p12_p5 = scmp.ge.s32.totalorder %s15_s20, 4   ;;  %s1212_s19 = smov %s1214_s4 }
 0x46a   :  { %14 = sbr.rel (!%p12_p5) target bundleno = 2 (0x2), region = 96 }

// kernel: transformer_forward.79
= control target key start
LH: loop header
LB: loop body
LE: loop exit
PB: predicated region body
PF: predicated region fallthrough
CT: control target
= control target key end

     0   :  { %s231_s1 = inlined_call_operand.vmem [shape: bf16[128,128], index: 1, kind: input, shape index: {}]   ;;  %s232_s2 = inlined_call_operand.vmem [shape: f32[1,128], index: 2, kind: input, shape index: {}]   ;;  %s233_s0 = inlined_call_operand.vmem [shape: bf16[16,128], index: 0, kind: input, shape index: {}]   ;;  %s234_s3 = inlined_call_operand.vmem [shape: f32[16,128], index: 3, kind: output, shape index: {}]  }
   0x1   :  { %v173_v0 = vld [vmem:[%s231_s1 + $0x38] sm:$0xff]  ;;  %v172_v1 = vld [vmem:[%s231_s1 + $0x30] sm:$0xff]  ;;  %v171_v2 = vld [vmem:[%s231_s1 + $0x28] sm:$0xff] }
   0x2   :  { %94 = vmatpush.bf16.msra.mxu0 %v173_v0  ;;  %v170_v3 = vld [vmem:[%s231_s1 + $0x20] sm:$0xff]  ;;  %v169_v4 = vld [vmem:[%s231_s1 + $0x18] sm:$0xff]  ;;  %v168_v5 = vld [vmem:[%s231_s1 + $0x10] sm:$0xff] }
   0x3   :  { %v167_v6 = vld [vmem:[%s231_s1 + $0x8] sm:$0xff]  ;;  %v166_v7 = vld [vmem:[%s231_s1] sm:$0xff] }
   0x4   :  { %v165_v8 = vld [vmem:[%s233_s0] sm:$0xff] }
   0x5   :  { %v174_v9 = vld [vmem:[%s232_s2] ss:$0 sm:$0xff] }
   0x6   :  { %95 = vmatpush.bf16.msra.mxu0 %v172_v1 }
   0xa   :  { %96 = vmatpush.bf16.msra.mxu0 %v171_v2 }
   0xe   :  { %97 = vmatpush.bf16.msra.mxu0 %v170_v3 }
  0x12   :  { %98 = vmatpush.bf16.msra.mxu0 %v169_v4 }
  0x16   :  { %99 = vmatpush.bf16.msra.mxu0 %v168_v5 }
  0x1a   :  { %100 = vmatpush.bf16.msra.mxu0 %v167_v6 }
  0x1e   :  { %101 = vmatpush.bf16.msra.mxu0 %v166_v7 }
  0x21   :  { %102 = vmatmul.bf16.vlgmr.msra.gmra.mxu0 %v165_v8 }
  0x9e   :  { %v103_v10 = vpop.f32.mrf.mxu0 }
  0x9f   :  { %v121_v11 = vadd.f32 %v174_v9, %v103_v10 }
  0xa1   :  { %123 = vst [vmem:[%s234_s3] sm:$0xff] %v121_v11 }
  0xa6   :  { %v105_v12 = vpop.f32.mrf.mxu0 }
  0xa7   :  { %v122_v13 = vadd.f32 %v174_v9, %v105_v12 }
  0xa9   :  { %124 = vst [vmem:[%s234_s3 + $0x8] sm:$0xff] %v122_v13 }

// kernel: transformer_forward.61
= control target key start
LH: loop header
LB: loop body
LE: loop exit
PB: predicated region body
PF: predicated region fallthrough
CT: control target
= control target key end

     0   :  { %s1061_s18 = smov 0   ;;  %s1063_s19 = smov 0   ;;  %s1212_s0 = inlined_call_operand.vmem [shape: bf16[2,8,32], index: 0, kind: input, shape index: {}]   ;;  %s1213_s1 = inlined_call_operand.vmem [shape: bf16[2,8,32], index: 1, kind: input, shape index: {}]   ;;  %s1214_s2 = inlined_call_operand.vmem [shape: bf16[2,8,32], index: 2, kind: input, shape index: {}]   ;;  %s1215_s3 = inlined_call_operand.vmem [shape: f32[2,8,1], index: 3, kind: input, shape index: {}]   ;;  %s1216_s4 = inlined_call_operand.vmem [shape: f32[2,1,8], index: 4, kind: input, shape index: {}]   ;;  %s1217_s5 = inlined_call_operand.vmem [shape: bf16[2,8,32], index: 5, kind: output, shape index: {}]  }
   0x1   :  { %s1065_s20 = smov 0  }
   0x2 LB: > { %s34_s3 = sadd.s32 1, %s1016_s19  ;;  %p922_p0 = scmp.ge.s32.totalorder %s1020_s20, 1  ;;  %s1020_s20 = sphi %s1065_s20, %s15_s20   ;;  %s1016_s19 = sphi %s1063_s19, %s1219_s19   ;;  %s1012_s18 = sphi %s1061_s18, %s1218_s18  }
   0x3   : > { %p36_p1 = scmp.ge.s32.totalorder %s34_s3, 2  ;;  %p267_p2 = scmp.lt.s32.totalorder %s1020_s20, 3 }
   0x5   : > { %s1221_s3 = smov (%p36_p1, %s34_s3), 0  ;;  %p268_p3 = pnand %p922_p0, %p267_p2 }
   0x6   : > { %p326_p4 = scmp.lt.s32.totalorder (!%p268_p3), %s1012_s18, 1  ;;  %s1023_s6 = smov (!%p268_p3), 112  }
   0x7   : > { %271 = sbr.rel (%p268_p3) target bundleno = 1199 (0x4af), region = 40  ;;  %s1024_s7 = smov (!%p268_p3), 120  }
   0x8   : > { %s1025_s8 = smov (!%p268_p3), 104   ;;  %s1028_s12 = smov (!%p268_p3), 8  }
   0x9   : > { %s1029_s13 = smov (!%p268_p3), 16   ;;  %s1030_s14 = smov (!%p268_p3), 24  }
   0xc   : > { %s1223_s18 = smov (!%p326_p4, %s1012_s18), 1  ;;  %vm387_vm0 = vcmask 64512   ;;  %vm372_vm1 = vcmask 7168   ;;  %v1022_v3 = vmov -inf   ;;  %v1026_v14 = vmov 0  }
   0xd   : > { %s1079_s21 = sshll.u32 %s1223_s18, 2  ;;  %s359_s24 = scalar_lea.vmem %s1216_s4, %s1223_s18  ;;  %373 = vst.msk [vmem:[#allocation2] sm:$0xff] %vm372_vm1, %v1022_v3  ;;  %970 = vset.pattern.permute.xlu1 %v1026_v14  ;;  %971 = vset.pattern.permute.xlu2 %v1026_v14  ;;  %v1027_v15 = vmov 0.0   ;;  %vm447_vm2 = vcmask 1043456   ;;  %vm381_vm3 = vcmask 261120   ;;  %vm560_vm4 = vcmask 130112  }
   0xe   : > { %s339_s27 = scalar_lea.vmem %s1213_s1, %s1079_s21  ;;  %s332_s30 = scalar_lea.vmem %s1212_s0, %s1079_s21  ;;  %374 = vst.msk [vmem:[#allocation2 + $0x8] sm:$0xff] %vm372_vm1, %v1022_v3  ;;  %v1098_v4 = vld [vmem:[%s359_s24] ss:$0 sm:$0xff]  ;;  %972 = vset.pattern.permute.xlu0 %v1026_v14  ;;  %vm647_vm5 = vcmask 195712   ;;  %vm734_vm6 = vcmask 261312   ;;  %vm782_vm7 = vcmask 257024  }
   0xf   : > { %v384_v0 = vld [vmem:[%s339_s27] sm:$0xf]  ;;  %375 = vst.msk [vmem:[#allocation2 + $0x10] sm:$0xff] %vm372_vm1, %v1022_v3  ;;  %s346_s11 = scalar_lea.vmem %s1214_s2, %s1079_s21  ;;  %s366_s17 = scalar_lea.vmem %s1217_s5, %s1079_s21 }
  0x10   : > { %v392_v1 = vsel %vm387_vm0, %v384_v0, 0  ;;  %v383_v2 = vld [vmem:[%s332_s30] sm:$0xf]  ;;  %376 = vst.msk [vmem:[#allocation2 + $0x18] sm:$0xff] %vm372_vm1, %v1022_v3  ;;  %v473_v9 = vunpack.c.l.b16 %v384_v0 }
  0x11   : > { %401 = vmatpush.bf16.xpose.msra.mxu0 %v392_v1  ;;  %v468_v12 = vunpack.c.l.b16 %v383_v2  ;;  %377 = vst.msk [vmem:[#allocation3] sm:$0xff] %vm372_vm1, %v1027_v15  ;;  %v385_v22 = vld [vmem:[%s346_s11] sm:$0xf] }
  0x12   : > { %v474_v11 = vpack.c.b16 %v473_v9, %v473_v9  ;;  %378 = vst.msk [vmem:[#allocation3 + $0x8] sm:$0xff] %vm372_vm1, %v1027_v15  ;;  %v449_v23 = vsel %vm447_vm2, %v385_v22, 0  ;;  %v532_v52 = vunpack.c.l.b16 %v385_v22 }
  0x13   : > { %v469_v13 = vpack.c.b16 %v468_v12, %v468_v12  ;;  %379 = vst.msk [vmem:[#allocation3 + $0x10] sm:$0xff] %vm372_vm1, %v1027_v15  ;;  %458 = vmatpush.bf16.msra.mxu1 %v449_v23 }
  0x14   : > { %565 = vrot.lane.b32.xlu2 %v474_v11, %s1023_s6  ;;  %380 = vst.msk [vmem:[#allocation3 + $0x18] sm:$0xff] %vm372_vm1, %v1027_v15  ;;  %v1114_v16 = vld [vmem:[#allocation2] sm:$0xff]  ;;  %v533_v54 = vpack.c.b16 %v532_v52, %v532_v52 }
  0x15   : > { %v499_v55 = vld [vmem:[#allocation2 + $0x8] sm:$0xff]  ;;  %382 = vst.msk [vmem:[#allocation4] sm:$0xff] %vm381_vm3, %v1027_v15 }
  0x16   : > { %v589_v62 = vld [vmem:[#allocation2 + $0x10] sm:$0xff] }
  0x17   : > { %v676_v58 = vld [vmem:[#allocation2 + $0x18] sm:$0xff] }
  0x18   : > { %927 = vmatmul.msk.bf16.vlgmr.msra.gmra.mxu0 %vm387_vm0, %v383_v2 }
  0x1c   : > { %563 = vrot.lane.b32.xlu2 %v469_v13, %s1023_s6 }
  0x24   : > { %650 = vrot.lane.b32.xlu2 %v469_v13, %s1025_s8 }
  0x6e   : > { %v566_v24 = vpop.permute.xlu2 %565 }
  0x6f   : > { %v571_v25 = vsel %vm387_vm0, %v566_v24, 0  ;;  %v436_v24 = vld [vmem:[#allocation4] sm:$0xff] }
  0x70   : > { %580 = vmatpush.bf16.xpose.msrb.mxu1 %v571_v25 }
  0x76   : > { %v564_v32 = vpop.permute.xlu2 %563 }
  0x7e   : > { %v651_v35 = vpop.permute.xlu2 %650 }
  0x95   : > { %v403_v5 = vpop.f32.mrf.mxu0 }
  0x96   : > { %v407_v6 = vmul.f32 0.35355338, %v403_v5 }
  0x98   : > { %v411_v7 = vadd.f32 %v1098_v4, %v407_v6 }
  0x9a   : > { %v413_v8 = vsel %vm387_vm0, %v411_v7, -inf }
  0x9b   : > { %414 = vmax.xlane.f32.xlu0 %v413_v8 }
  0x9d   : > { %v405_v10 = vpop.f32.mrf.mxu0 }
  0xaf   : > { %475 = vrot.lane.b32.xlu0 %v474_v11, %s1024_s7 }
 0x10e   : > { %v415_v17 = vpop.xlane.xlu0 %414 }
 0x10f   : > { %v1117_v18 = vmax.f32 %v1114_v16, %v415_v17 }
 0x111   : > { %v417_v19 = vsub.f32 %v1114_v16, %v1117_v18  ;;  %466 = vst.msk [vmem:[#allocation2] sm:$0xff] %vm372_vm1, %v1117_v18  ;;  %422 = vperm.xlu1 %970, %v1117_v18  }
 0x113   : > { %v418_v0 = vmul.f32 1.442695, %v417_v19 }
 0x119   : > { %470 = vrot.lane.b32.xlu1 %v469_v13, %s1024_s7 }
 0x121   : > { %652 = vrot.lane.b32.xlu1 %v474_v11, %s1025_s8  ;;  %v476_v20 = vpop.permute.xlu0 %475 }
 0x122   : > { %v481_v21 = vsel %vm387_vm0, %v476_v20, 0 }
 0x123   : > { %490 = vmatpush.bf16.xpose.msra.mxu2 %v481_v21 }
 0x183   : > { %v423_v26 = vpop.permute.xlu1 %422 }
 0x184   : > { %v425_v27 = vsub.f32 %v411_v7, %v423_v26 }
 0x186   : > { %v426_v28 = vmul.f32 1.442695, %v425_v27 }
 0x188   : > { %974 = vpow2.f32 %v426_v28 }
 0x189   : > { %976 = vpow2.f32 %v418_v0 }
 0x18b   : > { %v471_v29 = vpop.permute.xlu1 %470 }
 0x18c   : > { %929 = vmatmul.msk.bf16.vlgmr.msra.gmra.mxu2 %vm387_vm0, %v471_v29 }
 0x18e   : > { %v975_v30 = vpop.eup %974 }
 0x18f   : > { %v443_v31 = vpack.c.bf16 %v975_v30, %v975_v30  ;;  %v430_v6 = vsel %vm387_vm0, %v975_v30, 0.0 }
 0x191   : > { %928 = vmatmul.msk.bf16.vlgmr.msra.gmra.mxu1 %vm387_vm0, %v443_v31 }
 0x193   : > { %v653_v33 = vpop.permute.xlu1 %652 }
 0x194   : > { %v658_v34 = vsel %vm387_vm0, %v653_v33, 0 }
 0x195   : > { %667 = vmatpush.bf16.xpose.msrb.mxu0 %v658_v34 }
 0x19c   : > { %933 = vmatmul.msk.bf16.vlgmr.msrb.gmra.mxu0 %vm387_vm0, %v651_v35 }
 0x1a1   : > { %931 = vmatmul.msk.bf16.vlgmr.msrb.gmra.mxu1 %vm387_vm0, %v564_v32 }
 0x20e   : > { %v1138_v36 = vpop.f32.mrf.mxu1 }
 0x20f   : > { %v492_v37 = vpop.f32.mrf.mxu2 }
 0x210   : > { %v496_v38 = vmul.f32 0.35355338, %v492_v37 }
 0x212   : > { %v1141_v39 = vadd.f32 %v1098_v4, %v496_v38 }
 0x214   : > { %v500_v40 = vsel %vm387_vm0, %v1141_v39, -inf }
 0x215   : > { %501 = vmax.xlane.f32.xlu1 %v500_v40 }
 0x216   : > { %v462_v41 = vpop.f32.mrf.mxu1 }
 0x217   : > { %v494_v42 = vpop.f32.mrf.mxu2 }
 0x219   : > { %v669_v43 = vpop.f32.mrf.mxu0 }
 0x21a   : > { %v673_v44 = vmul.f32 0.35355338, %v669_v43 }
 0x21c   : > { %v1146_v45 = vadd.f32 %v1098_v4, %v673_v44 }
 0x21e   : > { %v582_v46 = vpop.f32.mrf.mxu1  ;;  %v677_v47 = vsel %vm387_vm0, %v1146_v45, -inf }
 0x21f   : > { %v586_v48 = vmul.f32 0.35355338, %v582_v46  ;;  %678 = vmax.xlane.f32.xlu0 %v677_v47 }
 0x221   : > { %v1151_v49 = vadd.f32 %v1098_v4, %v586_v48  ;;  %v671_v50 = vpop.f32.mrf.mxu0  ;;  %v977_v4 = vpop.eup %976 }
 0x223   : > { %v590_v51 = vsel %vm387_vm0, %v1151_v49, -inf }
 0x224   : > { %591 = vmax.xlane.f32.xlu2 %v590_v51  ;;  %v693_v51 = vld [vmem:[#allocation3 + $0x18] sm:$0xff] }
 0x226   : > { %v584_v53 = vpop.f32.mrf.mxu1 }
 0x22e   : > { %534 = vrot.lane.b32.xlu1 %v533_v54, %s1024_s7 }
 0x288   : > { %v502_v56 = vpop.xlane.xlu1 %501 }
 0x289   : > { %v503_v57 = vmax.f32 %v499_v55, %v502_v56 }
 0x28b   : > { %562 = vst.msk [vmem:[#allocation2 + $0x8] sm:$0xff] %vm372_vm1, %v503_v57  ;;  %509 = vperm.xlu2 %971, %v503_v57   ;;  %v504_v2 = vsub.f32 %v499_v55, %v503_v57 }
 0x28d   : > { %v505_v3 = vmul.f32 1.442695, %v504_v2 }
 0x28f   : > { %978 = vpow2.f32 %v505_v3 }
 0x292   : > { %v679_v59 = vpop.xlane.xlu0 %678 }
 0x293   : > { %v680_v60 = vmax.f32 %v676_v58, %v679_v59  ;;  %621 = vrot.lane.b32.xlu2 %v533_v54, %s1023_s6 }
 0x295   : > { %v681_v61 = vsub.f32 %v676_v58, %v680_v60  ;;  %736 = vst.msk [vmem:[#allocation2 + $0x18] sm:$0xff] %vm372_vm1, %v680_v60  ;;  %686 = vperm.xlu1 %970, %v680_v60   ;;  %v1164_v5 = vpop.eup %978 }
 0x297   : > { %v592_v63 = vpop.xlane.xlu2 %591  ;;  %v682_v11 = vmul.f32 1.442695, %v681_v61 }
 0x298   : > { %v593_v1 = vmax.f32 %v589_v62, %v592_v63 }
 0x29a   : > { %649 = vst.msk [vmem:[#allocation2 + $0x10] sm:$0xff] %vm372_vm1, %v593_v1  ;;  %599 = vperm.xlu0 %972, %v593_v1   ;;  %v594_v7 = vsub.f32 %v589_v62, %v593_v1 }
 0x29b   : > { %708 = vrot.lane.b32.xlu2 %v533_v54, %s1025_s8 }
 0x29c   : > { %v595_v8 = vmul.f32 1.442695, %v594_v7 }
 0x29e   : > { %980 = vpow2.f32 %v595_v8  ;;  %v606_v8 = vld [vmem:[#allocation3 + $0x10] sm:$0xff] }
 0x29f   : > { %982 = vpow2.f32 %v682_v11 }
 0x2a0   : > { %v535_v9 = vpop.permute.xlu1 %534 }
 0x2a1   : > { %v540_v10 = vsel %vm447_vm2, %v535_v9, 0 }
 0x2a2   : > { %549 = vmatpush.bf16.msra.mxu3 %v540_v10 }
 0x2a3   : > { %439 = vperm.xlu2 %971, %v977_v4  }
 0x2a4   : > { %v1169_v12 = vpop.eup %980 }
 0x2a5   : > { %v983_v13 = vpop.eup %982  ;;  %v607_v11 = vmul.f32 %v1169_v12, %v606_v8 }
 0x2a6   : > { %v694_v52 = vmul.f32 %v983_v13, %v693_v51 }
 0x2ab   : > { %526 = vperm.xlu2 %971, %v1164_v5  }
 0x2bf   : > { %431 = vadd.xlane.f32.xlu1 %v430_v6 }
 0x2d8   : > { %616 = vperm.xlu1 %970, %v1169_v12  }
 0x2e0   : > { %703 = vperm.xlu1 %970, %v983_v13  }
 0x2e5   : > { %v510_v14 = vpop.permute.xlu2 %509 }
 0x2e6   : > { %v512_v16 = vsub.f32 %v1141_v39, %v510_v14  ;;  %v428_v39 = vld [vmem:[#allocation3] sm:$0xff] }
 0x2e7   : > { %v429_v40 = vmul.f32 %v977_v4, %v428_v39 }
 0x2e8   : > { %v513_v17 = vmul.f32 1.442695, %v512_v16 }
 0x2ea   : > { %984 = vpow2.f32 %v513_v17 }
 0x2ed   : > { %v622_v18 = vpop.permute.xlu2 %621 }
 0x2ee   : > { %v627_v15 = vsel %vm447_vm2, %v622_v18, 0 }
 0x2ef   : > { %636 = vmatpush.bf16.msrb.mxu3 %v627_v15 }
 0x2f0   : > { %v985_v19 = vpop.eup %984 }
 0x2f1   : > { %v518_v20 = vsel %vm387_vm0, %v985_v19, 0.0  ;;  %v530_v21 = vpack.c.bf16 %v985_v19, %v985_v19 }
 0x2f2   : > { %519 = vadd.xlane.f32.xlu0 %v518_v20 }
 0x2f3   : > { %930 = vmatmul.msk.bf16.vlgmr.msra.gmra.mxu3 %vm387_vm0, %v530_v21 }
 0x2f5   : > { %v709_v22 = vpop.permute.xlu2 %708 }
 0x2f6   : > { %v714_v23 = vsel %vm447_vm2, %v709_v22, 0 }
 0x2f7   : > { %723 = vmatpush.bf16.msrb.mxu2 %v714_v23 }
 0x2fd   : > { %v440_v25 = vpop.permute.xlu2 %439 }
 0x2fe   : > { %v442_v26 = vmul.f32 %v440_v25, %v436_v24 }
 0x300   : > { %v464_v27 = vadd.f32 %v1138_v36, %v442_v26 }
 0x302   : > { %465 = vst.msk [vmem:[#allocation4] sm:$0xff] %vm387_vm0, %v464_v27 }
 0x305   : > { %v527_v0 = vpop.permute.xlu2 %526 }
 0x307   : > { %v687_v28 = vpop.permute.xlu1 %686 }
 0x308   : > { %v689_v29 = vsub.f32 %v1146_v45, %v687_v28  ;;  %v516_v45 = vld [vmem:[#allocation3 + $0x8] sm:$0xff] }
 0x309   : > { %v517_v46 = vmul.f32 %v1164_v5, %v516_v45  ;;  %v523_v1 = vld [vmem:[#allocation4] sm:$0xff] }
 0x30a   : > { %v690_v30 = vmul.f32 1.442695, %v689_v29  ;;  %v529_v2 = vmul.f32 %v527_v0, %v523_v1 }
 0x30c   : > { %986 = vpow2.f32 %v690_v30  ;;  %v600_v31 = vpop.permute.xlu0 %599 }
 0x30d   : > { %v602_v32 = vsub.f32 %v1151_v49, %v600_v31 }
 0x30f   : > { %v603_v33 = vmul.f32 1.442695, %v602_v32 }
 0x311   : > { %988 = vpow2.f32 %v603_v33 }
 0x312   : > { %v987_v34 = vpop.eup %986 }
 0x313   : > { %v695_v35 = vsel %vm387_vm0, %v987_v34, 0.0  ;;  %v707_v37 = vpack.c.bf16 %v987_v34, %v987_v34 }
 0x314   : > { %696 = vadd.xlane.f32.xlu0 %v695_v35 }
 0x315   : > { %934 = vmatmul.msk.bf16.vlgmr.msrb.gmra.mxu2 %vm387_vm0, %v707_v37 }
 0x317   : > { %v989_v36 = vpop.eup %988 }
 0x318   : > { %v620_v38 = vpack.c.bf16 %v989_v36, %v989_v36  ;;  %v608_v58 = vsel %vm387_vm0, %v989_v36, 0.0 }
 0x31a   : > { %932 = vmatmul.msk.bf16.vlgmr.msrb.gmra.mxu3 %vm387_vm0, %v620_v38 }
 0x332   : > { %v432_v41 = vpop.xlane.xlu1 %431 }
 0x333   : > { %v433_v42 = vadd.f32 %v432_v41, %v429_v40 }
 0x335   : > { %435 = vst.msk [vmem:[#allocation3] sm:$0xff] %vm372_vm1, %v433_v42 }
 0x33c   : > { %v741_v43 = vld [vmem:[#allocation3] sm:$0xff] }
 0x33d   : > { %990 = vrcp.f32 %v741_v43 }
 0x343   : > { %v991_v44 = vpop.eup %990 }
 0x344   : > { %745 = vperm.xlu1 %970, %v991_v44  }
 0x34a   : > { %v617_v6 = vpop.permute.xlu1 %616 }
 0x352   : > { %v704_v16 = vpop.permute.xlu1 %703 }
 0x365   : > { %v520_v47 = vpop.xlane.xlu0 %519 }
 0x366   : > { %v521_v48 = vadd.f32 %v520_v47, %v517_v46 }
 0x368   : > { %522 = vst.msk [vmem:[#allocation3 + $0x8] sm:$0xff] %vm372_vm1, %v521_v48 }
 0x36f   : > { %v751_v56 = vld [vmem:[#allocation3 + $0x8] sm:$0xff] }
 0x370   : > { %992 = vrcp.f32 %v751_v56 }
 0x376   : > { %v551_v49 = vpop.f32.mrf.mxu3  ;;  %v993_v61 = vpop.eup %992 }
 0x377   : > { %556 = vrot.lane.b32.xlu2 %v551_v49, %s1028_s12 }
 0x37e   : > { %v553_v50 = vpop.f32.mrf.mxu3 }
 0x387   : > { %v697_v53 = vpop.xlane.xlu0 %696 }
 0x388   : > { %v698_v54 = vadd.f32 %v697_v53, %v694_v52 }
 0x38a   : > { %699 = vst.msk [vmem:[#allocation3 + $0x18] sm:$0xff] %vm372_vm1, %v698_v54 }
 0x391   : > { %v771_v60 = vld [vmem:[#allocation3 + $0x18] sm:$0xff] }
 0x392   : > { %994 = vrcp.f32 %v771_v60 }
 0x398   : > { %v725_v55 = vpop.f32.mrf.mxu2  ;;  %v995_v63 = vpop.eup %994 }
 0x39d   : > { %v638_v57 = vpop.f32.mrf.mxu3 }
 0x39e   : > { %643 = vrot.lane.b32.xlu0 %v638_v57, %s1029_s13 }
 0x3a0   : > { %v727_v59 = vpop.f32.mrf.mxu2  ;;  %609 = vadd.xlane.f32.xlu2 %v608_v58 }
 0x3a5   : > { %v640_v62 = vpop.f32.mrf.mxu3 }
 0x3a6   : > { %755 = vperm.xlu0 %972, %v993_v61  }
 0x3ae   : > { %775 = vperm.xlu0 %972, %v995_v63  }
 0x3b6   : > { %v746_v15 = vpop.permute.xlu1 %745 }
 0x3b8   : > { %730 = vrot.lane.b32.xlu2 %v725_v55, %s1030_s14 }
 0x3d1   : > { %v557_v3 = vpop.permute.xlu2 %556 }
 0x3d2   : > { %v559_v4 = vadd.f32 %v557_v3, %v529_v2 }
 0x3d4   : > { %561 = vst.msk [vmem:[#allocation4] sm:$0xff] %vm560_vm4, %v559_v4 }
 0x3db   : > { %v613_v5 = vld [vmem:[#allocation4] sm:$0xff] }
 0x3dc   : > { %v619_v7 = vmul.f32 %v617_v6, %v613_v5 }
 0x410   : > { %v644_v9 = vpop.permute.xlu0 %643 }
 0x411   : > { %v646_v10 = vadd.f32 %v644_v9, %v619_v7 }
 0x413   : > { %648 = vst.msk [vmem:[#allocation4] sm:$0xff] %vm647_vm5, %v646_v10  ;;  %v610_v13 = vpop.xlane.xlu2 %609 }
 0x414   : > { %v611_v14 = vadd.f32 %v610_v13, %v607_v11 }
 0x416   : > { %612 = vst.msk [vmem:[#allocation3 + $0x10] sm:$0xff] %vm372_vm1, %v611_v14 }
 0x418   : > { %v756_v24 = vpop.permute.xlu0 %755 }
 0x41a   : > { %v700_v17 = vld [vmem:[#allocation4] sm:$0xff] }
 0x41b   : > { %v731_v18 = vpop.permute.xlu2 %730  ;;  %v706_v19 = vmul.f32 %v704_v16, %v700_v17 }
 0x41d   : > { %v733_v20 = vadd.f32 %v731_v18, %v706_v19  ;;  %v761_v21 = vld [vmem:[#allocation3 + $0x10] sm:$0xff] }
 0x41e   : > { %996 = vrcp.f32 %v761_v21 }
 0x41f   : > { %735 = vst.msk [vmem:[#allocation4] sm:$0xff] %vm734_vm6, %v733_v20 }
 0x420   : > { %v776_v30 = vpop.permute.xlu0 %775 }
 0x424   : > { %v997_v22 = vpop.eup %996 }
 0x425   : > { %765 = vperm.xlu1 %970, %v997_v22  }
 0x426   : > { %v740_v12 = vld [vmem:[#allocation4] sm:$0xff] }
 0x427   : > { %v748_v23 = vmul.f32 %v746_v15, %v740_v12 }
 0x429   : > { %749 = vst.msk [vmem:[#allocation4] sm:$0xff] %vm387_vm0, %v748_v23 }
 0x430   : > { %v750_v25 = vld [vmem:[#allocation4] sm:$0xff] }
 0x431   : > { %v758_v26 = vmul.f32 %v756_v24, %v750_v25 }
 0x433   : > { %759 = vst.msk [vmem:[#allocation4] sm:$0xff] %vm560_vm4, %v758_v26 }
 0x43a   : > { %v760_v28 = vld [vmem:[#allocation4] sm:$0xff] }
 0x497   : > { %v766_v27 = vpop.permute.xlu1 %765 }
 0x498   : > { %v768_v29 = vmul.f32 %v766_v27, %v760_v28 }
 0x49a   : > { %769 = vst.msk [vmem:[#allocation4] sm:$0xff] %vm647_vm5, %v768_v29 }
 0x4a1   : > { %v770_v31 = vld [vmem:[#allocation4] sm:$0xff] }
 0x4a2   : > { %v778_v32 = vmul.f32 %v776_v30, %v770_v31 }
 0x4a4   : > { %779 = vst.msk [vmem:[#allocation4] sm:$0xff] %vm734_vm6, %v778_v32 }
 0x4ab   : > { %v780_v33 = vld [vmem:[#allocation4] sm:$0xff] }
 0x4ac   : > { %v781_v34 = vpack.c.bf16 %v780_v33, %v780_v33 }
 0x4ae   : > { %783 = vst.msk [vmem:[%s366_s17] sm:$0xf] %vm782_vm7, %v781_v34 }
 0x4af PF: > { %s15_s20 = sadd.s32 1, %s1020_s20   ;;  %s1218_s18 = smov %s1016_s19 }
 0x4b0   : > { %p12_p5 = scmp.ge.s32.totalorder %s15_s20, 4   ;;  %s1219_s19 = smov %s1221_s3 }
 0x4b2   :  { %14 = sbr.rel (!%p12_p5) target bundleno = 2 (0x2), region = 96 }

</bundles_post_ra>
